<compile_context>
chip_gen: v5e
topology: v5e:2x2
jax: 0.10.0
libtpu: 0.0.40
codegen_flags: <defaults>
</compile_context>

<pallas_src>
import functools

import jax
import jax.numpy as jnp
from jax.experimental import pallas as pl
from jax.experimental.pallas import tpu as pltpu


# ----------------------------------------------------------------------------- kernel
def basic_block_kernel(x_ref, w1_ref, s1_ref, b1_ref, w2_ref, s2_ref, b2_ref,
                       o_ref, xpad_ref, hpad_ref, *, H, W):
    Cin = x_ref.shape[-1]
    Cmid = w1_ref.shape[-1]
    Cout = w2_ref.shape[-1]

    x = x_ref[0]                                            # (H, W, Cin)

    # ---- zero-pad the input spatially (pad=1) into VMEM scratch ------------
    xpad_ref[...] = jnp.zeros_like(xpad_ref)
    xpad_ref[pl.ds(1, H), pl.ds(1, W), :] = x

    # ---- conv1: 9 shifted (H*W, Cin) @ (Cin, Cmid) MXU matmuls -------------
    acc = jnp.zeros((H * W, Cmid), jnp.float32)
    for k in range(9):                                      # static tap loop
        dy, dx = divmod(k, 3)
        xs = xpad_ref[pl.ds(dy, H), pl.ds(dx, W), :].reshape(H * W, Cin)
        acc = acc + jnp.dot(xs, w1_ref[k], preferred_element_type=jnp.float32)

    # BN1 (folded scale/bias) + ReLU
    h = jnp.maximum(acc * s1_ref[...] + b1_ref[...], 0.0)

    # ---- zero-pad the intermediate for conv2 --------------------------------
    hpad_ref[...] = jnp.zeros_like(hpad_ref)
    hpad_ref[pl.ds(1, H), pl.ds(1, W), :] = h.reshape(H, W, Cmid)

    # ---- conv2 ---------------------------------------------------------------
    acc2 = jnp.zeros((H * W, Cout), jnp.float32)
    for k in range(9):
        dy, dx = divmod(k, 3)
        hs = hpad_ref[pl.ds(dy, H), pl.ds(dx, W), :].reshape(H * W, Cmid)
        acc2 = acc2 + jnp.dot(hs, w2_ref[k], preferred_element_type=jnp.float32)

    # BN2 (folded) + identity residual + final ReLU (all fused in the epilogue)
    res = x.reshape(H * W, Cin)
    out = jnp.maximum(acc2 * s2_ref[...] + b2_ref[...] + res, 0.0)
    o_ref[0] = out.reshape(H, W, Cout).astype(o_ref.dtype)


# ----------------------------------------------------------------------------- wrapper
def basic_block_pallas(x, w1, gamma1, beta1, mean1, var1,
                       w2, gamma2, beta2, mean2, var2, eps=1e-5):
    """x: (B, H, W, Cin) NHWC.  w1: (3,3,Cin,Cmid) HWIO, w2: (3,3,Cmid,Cout)."""
    B, H, W, Cin = x.shape
    Cmid = w1.shape[-1]
    Cout = w2.shape[-1]
    assert Cout == Cin, "identity residual requires planes == inplanes"
    # TODO(synk): downsample / stride != 1 residual path not implemented
    # (reference module's default path: downsample=None, stride=1).

    # Fold inference-mode BatchNorm into per-channel scale + bias.
    inv1 = jax.lax.rsqrt(var1 + eps)
    inv2 = jax.lax.rsqrt(var2 + eps)
    s1 = (gamma1 * inv1).reshape(1, Cmid)
    t1 = (beta1 - mean1 * gamma1 * inv1).reshape(1, Cmid)
    s2 = (gamma2 * inv2).reshape(1, Cout)
    t2 = (beta2 - mean2 * gamma2 * inv2).reshape(1, Cout)

    # Tap-major, MXU-ready weights: (3,3,Cin,Cout) -> (9, Cin, Cout).
    w1_taps = w1.reshape(9, Cin, Cmid)
    w2_taps = w2.reshape(9, Cmid, Cout)

    kernel = functools.partial(basic_block_kernel, H=H, W=W)
    return pl.pallas_call(
        kernel,
        out_shape=jax.ShapeDtypeStruct((B, H, W, Cout), x.dtype),
        grid=(B,),
        in_specs=[
            pl.BlockSpec((1, H, W, Cin), lambda b: (b, 0, 0, 0)),
            pl.BlockSpec((9, Cin, Cmid), lambda b: (0, 0, 0)),
            pl.BlockSpec((1, Cmid), lambda b: (0, 0)),
            pl.BlockSpec((1, Cmid), lambda b: (0, 0)),
            pl.BlockSpec((9, Cmid, Cout), lambda b: (0, 0, 0)),
            pl.BlockSpec((1, Cout), lambda b: (0, 0)),
            pl.BlockSpec((1, Cout), lambda b: (0, 0)),
        ],
        out_specs=pl.BlockSpec((1, H, W, Cout), lambda b: (b, 0, 0, 0)),
        scratch_shapes=[pltpu.VMEM((H + 2, W + 2, Cin), jnp.float32),
                        pltpu.VMEM((H + 2, W + 2, Cmid), jnp.float32)],
        compiler_params=pltpu.CompilerParams(
            dimension_semantics=("parallel",)),
    )(x, w1_taps, s1, t1, w2_taps, s2, t2)


# ----------------------------------------------------------------------------- reference (pure JAX)
def _ref_basic_block(x, w1, gamma1, beta1, mean1, var1,
                     w2, gamma2, beta2, mean2, var2, eps=1e-5):
    def conv(h, w):
        return jax.lax.conv_general_dilated(
            h, w, window_strides=(1, 1), padding=((1, 1), (1, 1)),
            dimension_numbers=("NHWC", "HWIO", "NHWC"),
            precision=jax.lax.Precision.HIGHEST)

    def bn(h, g, b, m, v):
        return (h - m) * jax.lax.rsqrt(v + eps) * g + b

    out = jax.nn.relu(bn(conv(x, w1), gamma1, beta1, mean1, var1))
    out = bn(conv(out, w2), gamma2, beta2, mean2, var2)
    return jax.nn.relu(out + x)            # downsample=None -> identity residual


# ----------------------------------------------------------------------------- main
if __name__ == "__main__":
    B, H, W, C = 2, 16, 16, 32             # inplanes = planes = 32, stride = 1

    key = jax.random.PRNGKey(0)
    ks = jax.random.split(key, 11)

    x = jax.random.normal(ks[0], (B, H, W, C), jnp.float32)
    w1 = 0.1 * jax.random.normal(ks[1], (3, 3, C, C), jnp.float32)
    w2 = 0.1 * jax.random.normal(ks[2], (3, 3, C, C), jnp.float32)
    gamma1 = 1.0 + 0.1 * jax.random.normal(ks[3], (C,), jnp.float32)
    beta1 = 0.1 * jax.random.normal(ks[4], (C,), jnp.float32)
    mean1 = 0.1 * jax.random.normal(ks[5], (C,), jnp.float32)
    var1 = 0.5 + jnp.abs(jax.random.normal(ks[6], (C,), jnp.float32))
    gamma2 = 1.0 + 0.1 * jax.random.normal(ks[7], (C,), jnp.float32)
    beta2 = 0.1 * jax.random.normal(ks[8], (C,), jnp.float32)
    mean2 = 0.1 * jax.random.normal(ks[9], (C,), jnp.float32)
    var2 = 0.5 + jnp.abs(jax.random.normal(ks[10], (C,), jnp.float32))

    out = basic_block_pallas(x, w1, gamma1, beta1, mean1, var1,
                             w2, gamma2, beta2, mean2, var2)
    out = jax.block_until_ready(out)

    ref = _ref_basic_block(x, w1, gamma1, beta1, mean1, var1,
                           w2, gamma2, beta2, mean2, var2)
    assert out.shape == (B, H, W, C)
    assert jnp.allclose(out, ref, atol=5e-4, rtol=5e-4), "mismatch vs JAX reference"

    print("KERNEL_OK")
</pallas_src>

<mosaic_0001>
module attributes {stable_mosaic.version = 11 : i64} {
  func.func @basic_block_kernel(%arg0: i32, %arg1: memref<1x16x16x32xf32, #tpu.memory_space<vmem>>, %arg2: memref<9x32x32xf32, #tpu.memory_space<vmem>>, %arg3: memref<1x32xf32, #tpu.memory_space<vmem>>, %arg4: memref<1x32xf32, #tpu.memory_space<vmem>>, %arg5: memref<9x32x32xf32, #tpu.memory_space<vmem>>, %arg6: memref<1x32xf32, #tpu.memory_space<vmem>>, %arg7: memref<1x32xf32, #tpu.memory_space<vmem>>, %arg8: memref<1x16x16x32xf32, #tpu.memory_space<vmem>>, %arg9: memref<18x18x32xf32, #tpu.memory_space<vmem>>, %arg10: memref<18x18x32xf32, #tpu.memory_space<vmem>>) attributes {dimension_semantics = [#tpu.dimension_semantics<parallel>], iteration_bounds = array<i64: 2>, scalar_prefetch = 0 : i64, scratch_operands = 2 : i64, tpu.core_type = #tpu.core_type<tc>, window_params = [{transform_indices = @transform_0, window_bounds = array<i64: 1, 16, 16, 32>}, {pipeline_mode = #tpu.pipeline_mode<synchronous>, transform_indices = @transform_1, window_bounds = array<i64: 9, 32, 32>}, {pipeline_mode = #tpu.pipeline_mode<synchronous>, transform_indices = @transform_2, window_bounds = array<i64: 1, 32>}, {pipeline_mode = #tpu.pipeline_mode<synchronous>, transform_indices = @transform_3, window_bounds = array<i64: 1, 32>}, {pipeline_mode = #tpu.pipeline_mode<synchronous>, transform_indices = @transform_4, window_bounds = array<i64: 9, 32, 32>}, {pipeline_mode = #tpu.pipeline_mode<synchronous>, transform_indices = @transform_5, window_bounds = array<i64: 1, 32>}, {pipeline_mode = #tpu.pipeline_mode<synchronous>, transform_indices = @transform_6, window_bounds = array<i64: 1, 32>}, {transform_indices = @transform_7, window_bounds = array<i64: 1, 16, 16, 32>}]} {
    %c0 = arith.constant 0 : index
    %c0_0 = arith.constant 0 : index
    %c0_1 = arith.constant 0 : index
    %c0_2 = arith.constant 0 : index
    %0 = vector.load %arg1[%c0, %c0_0, %c0_1, %c0_2] : memref<1x16x16x32xf32, #tpu.memory_space<vmem>>, vector<1x16x16x32xf32>
    %1 = vector.shape_cast %0 : vector<1x16x16x32xf32> to vector<16x16x32xf32>
    %cst = arith.constant 0.000000e+00 : f32
    %2 = vector.broadcast %cst : f32 to vector<18x18x32xf32>
    %c0_3 = arith.constant 0 : index
    %c0_4 = arith.constant 0 : index
    %c0_5 = arith.constant 0 : index
    %3 = vector.load %arg9[%c0_3, %c0_4, %c0_5] : memref<18x18x32xf32, #tpu.memory_space<vmem>>, vector<18x18x32xf32>
    tpu.vector_store %arg9[%c0_3, %c0_4, %c0_5], %2 {strides = array<i32>} : memref<18x18x32xf32, #tpu.memory_space<vmem>>, vector<18x18x32xf32>,
    %c1 = arith.constant 1 : index
    %c1_6 = arith.constant 1 : index
    %c0_7 = arith.constant 0 : index
    %4 = vector.load %arg9[%c1, %c1_6, %c0_7] : memref<18x18x32xf32, #tpu.memory_space<vmem>>, vector<16x16x32xf32>
    tpu.vector_store %arg9[%c1, %c1_6, %c0_7], %1 {strides = array<i32>} : memref<18x18x32xf32, #tpu.memory_space<vmem>>, vector<16x16x32xf32>,
    %cst_8 = arith.constant 0.000000e+00 : f32
    %5 = vector.broadcast %cst_8 : f32 to vector<256x32xf32>
    %c0_9 = arith.constant 0 : index
    %c0_10 = arith.constant 0 : index
    %c0_11 = arith.constant 0 : index
    %6 = vector.load %arg9[%c0_9, %c0_10, %c0_11] : memref<18x18x32xf32, #tpu.memory_space<vmem>>, vector<16x16x32xf32>
    %7 = vector.shape_cast %6 : vector<16x16x32xf32> to vector<256x32xf32>
    %c0_12 = arith.constant 0 : index
    %c0_13 = arith.constant 0 : index
    %c0_14 = arith.constant 0 : index
    %8 = vector.load %arg2[%c0_12, %c0_13, %c0_14] : memref<9x32x32xf32, #tpu.memory_space<vmem>>, vector<1x32x32xf32>
    %9 = vector.shape_cast %8 : vector<1x32x32xf32> to vector<32x32xf32>
    %cst_15 = arith.constant dense<0.000000e+00> : vector<256x32xf32>
    %10 = tpu.matmul %7, %9, %cst_15 {dimension_numbers = #tpu.dot_dimension_numbers<[1], [0], [0], [1], [0, 0, 1, 1], [], []>} : vector<256x32xf32>, vector<32x32xf32>, vector<256x32xf32> -> vector<256x32xf32>
    %11 = arith.addf %5, %10 : vector<256x32xf32>
    %c0_16 = arith.constant 0 : index
    %c1_17 = arith.constant 1 : index
    %c0_18 = arith.constant 0 : index
    %12 = vector.load %arg9[%c0_16, %c1_17, %c0_18] : memref<18x18x32xf32, #tpu.memory_space<vmem>>, vector<16x16x32xf32>
    %13 = vector.shape_cast %12 : vector<16x16x32xf32> to vector<256x32xf32>
    %c1_19 = arith.constant 1 : index
    %c0_20 = arith.constant 0 : index
    %c0_21 = arith.constant 0 : index
    %14 = vector.load %arg2[%c1_19, %c0_20, %c0_21] : memref<9x32x32xf32, #tpu.memory_space<vmem>>, vector<1x32x32xf32>
    %15 = vector.shape_cast %14 : vector<1x32x32xf32> to vector<32x32xf32>
    %cst_22 = arith.constant dense<0.000000e+00> : vector<256x32xf32>
    %16 = tpu.matmul %13, %15, %cst_22 {dimension_numbers = #tpu.dot_dimension_numbers<[1], [0], [0], [1], [0, 0, 1, 1], [], []>} : vector<256x32xf32>, vector<32x32xf32>, vector<256x32xf32> -> vector<256x32xf32>
    %17 = arith.addf %11, %16 : vector<256x32xf32>
    %c0_23 = arith.constant 0 : index
    %c2 = arith.constant 2 : index
    %c0_24 = arith.constant 0 : index
    %18 = vector.load %arg9[%c0_23, %c2, %c0_24] : memref<18x18x32xf32, #tpu.memory_space<vmem>>, vector<16x16x32xf32>
    %19 = vector.shape_cast %18 : vector<16x16x32xf32> to vector<256x32xf32>
    %c2_25 = arith.constant 2 : index
    %c0_26 = arith.constant 0 : index
    %c0_27 = arith.constant 0 : index
    %20 = vector.load %arg2[%c2_25, %c0_26, %c0_27] : memref<9x32x32xf32, #tpu.memory_space<vmem>>, vector<1x32x32xf32>
    %21 = vector.shape_cast %20 : vector<1x32x32xf32> to vector<32x32xf32>
    %cst_28 = arith.constant dense<0.000000e+00> : vector<256x32xf32>
    %22 = tpu.matmul %19, %21, %cst_28 {dimension_numbers = #tpu.dot_dimension_numbers<[1], [0], [0], [1], [0, 0, 1, 1], [], []>} : vector<256x32xf32>, vector<32x32xf32>, vector<256x32xf32> -> vector<256x32xf32>
    %23 = arith.addf %17, %22 : vector<256x32xf32>
    %c1_29 = arith.constant 1 : index
    %c0_30 = arith.constant 0 : index
    %c0_31 = arith.constant 0 : index
    %24 = vector.load %arg9[%c1_29, %c0_30, %c0_31] : memref<18x18x32xf32, #tpu.memory_space<vmem>>, vector<16x16x32xf32>
    %25 = vector.shape_cast %24 : vector<16x16x32xf32> to vector<256x32xf32>
    %c3 = arith.constant 3 : index
    %c0_32 = arith.constant 0 : index
    %c0_33 = arith.constant 0 : index
    %26 = vector.load %arg2[%c3, %c0_32, %c0_33] : memref<9x32x32xf32, #tpu.memory_space<vmem>>, vector<1x32x32xf32>
    %27 = vector.shape_cast %26 : vector<1x32x32xf32> to vector<32x32xf32>
    %cst_34 = arith.constant dense<0.000000e+00> : vector<256x32xf32>
    %28 = tpu.matmul %25, %27, %cst_34 {dimension_numbers = #tpu.dot_dimension_numbers<[1], [0], [0], [1], [0, 0, 1, 1], [], []>} : vector<256x32xf32>, vector<32x32xf32>, vector<256x32xf32> -> vector<256x32xf32>
    %29 = arith.addf %23, %28 : vector<256x32xf32>
    %c1_35 = arith.constant 1 : index
    %c1_36 = arith.constant 1 : index
    %c0_37 = arith.constant 0 : index
    %30 = vector.load %arg9[%c1_35, %c1_36, %c0_37] : memref<18x18x32xf32, #tpu.memory_space<vmem>>, vector<16x16x32xf32>
    %31 = vector.shape_cast %30 : vector<16x16x32xf32> to vector<256x32xf32>
    %c4 = arith.constant 4 : index
    %c0_38 = arith.constant 0 : index
    %c0_39 = arith.constant 0 : index
    %32 = vector.load %arg2[%c4, %c0_38, %c0_39] : memref<9x32x32xf32, #tpu.memory_space<vmem>>, vector<1x32x32xf32>
    %33 = vector.shape_cast %32 : vector<1x32x32xf32> to vector<32x32xf32>
    %cst_40 = arith.constant dense<0.000000e+00> : vector<256x32xf32>
    %34 = tpu.matmul %31, %33, %cst_40 {dimension_numbers = #tpu.dot_dimension_numbers<[1], [0], [0], [1], [0, 0, 1, 1], [], []>} : vector<256x32xf32>, vector<32x32xf32>, vector<256x32xf32> -> vector<256x32xf32>
    %35 = arith.addf %29, %34 : vector<256x32xf32>
    %c1_41 = arith.constant 1 : index
    %c2_42 = arith.constant 2 : index
    %c0_43 = arith.constant 0 : index
    %36 = vector.load %arg9[%c1_41, %c2_42, %c0_43] : memref<18x18x32xf32, #tpu.memory_space<vmem>>, vector<16x16x32xf32>
    %37 = vector.shape_cast %36 : vector<16x16x32xf32> to vector<256x32xf32>
    %c5 = arith.constant 5 : index
    %c0_44 = arith.constant 0 : index
    %c0_45 = arith.constant 0 : index
    %38 = vector.load %arg2[%c5, %c0_44, %c0_45] : memref<9x32x32xf32, #tpu.memory_space<vmem>>, vector<1x32x32xf32>
    %39 = vector.shape_cast %38 : vector<1x32x32xf32> to vector<32x32xf32>
    %cst_46 = arith.constant dense<0.000000e+00> : vector<256x32xf32>
    %40 = tpu.matmul %37, %39, %cst_46 {dimension_numbers = #tpu.dot_dimension_numbers<[1], [0], [0], [1], [0, 0, 1, 1], [], []>} : vector<256x32xf32>, vector<32x32xf32>, vector<256x32xf32> -> vector<256x32xf32>
    %41 = arith.addf %35, %40 : vector<256x32xf32>
    %c2_47 = arith.constant 2 : index
    %c0_48 = arith.constant 0 : index
    %c0_49 = arith.constant 0 : index
    %42 = vector.load %arg9[%c2_47, %c0_48, %c0_49] : memref<18x18x32xf32, #tpu.memory_space<vmem>>, vector<16x16x32xf32>
    %43 = vector.shape_cast %42 : vector<16x16x32xf32> to vector<256x32xf32>
    %c6 = arith.constant 6 : index
    %c0_50 = arith.constant 0 : index
    %c0_51 = arith.constant 0 : index
    %44 = vector.load %arg2[%c6, %c0_50, %c0_51] : memref<9x32x32xf32, #tpu.memory_space<vmem>>, vector<1x32x32xf32>
    %45 = vector.shape_cast %44 : vector<1x32x32xf32> to vector<32x32xf32>
    %cst_52 = arith.constant dense<0.000000e+00> : vector<256x32xf32>
    %46 = tpu.matmul %43, %45, %cst_52 {dimension_numbers = #tpu.dot_dimension_numbers<[1], [0], [0], [1], [0, 0, 1, 1], [], []>} : vector<256x32xf32>, vector<32x32xf32>, vector<256x32xf32> -> vector<256x32xf32>
    %47 = arith.addf %41, %46 : vector<256x32xf32>
    %c2_53 = arith.constant 2 : index
    %c1_54 = arith.constant 1 : index
    %c0_55 = arith.constant 0 : index
    %48 = vector.load %arg9[%c2_53, %c1_54, %c0_55] : memref<18x18x32xf32, #tpu.memory_space<vmem>>, vector<16x16x32xf32>
    %49 = vector.shape_cast %48 : vector<16x16x32xf32> to vector<256x32xf32>
    %c7 = arith.constant 7 : index
    %c0_56 = arith.constant 0 : index
    %c0_57 = arith.constant 0 : index
    %50 = vector.load %arg2[%c7, %c0_56, %c0_57] : memref<9x32x32xf32, #tpu.memory_space<vmem>>, vector<1x32x32xf32>
    %51 = vector.shape_cast %50 : vector<1x32x32xf32> to vector<32x32xf32>
    %cst_58 = arith.constant dense<0.000000e+00> : vector<256x32xf32>
    %52 = tpu.matmul %49, %51, %cst_58 {dimension_numbers = #tpu.dot_dimension_numbers<[1], [0], [0], [1], [0, 0, 1, 1], [], []>} : vector<256x32xf32>, vector<32x32xf32>, vector<256x32xf32> -> vector<256x32xf32>
    %53 = arith.addf %47, %52 : vector<256x32xf32>
    %c2_59 = arith.constant 2 : index
    %c2_60 = arith.constant 2 : index
    %c0_61 = arith.constant 0 : index
    %54 = vector.load %arg9[%c2_59, %c2_60, %c0_61] : memref<18x18x32xf32, #tpu.memory_space<vmem>>, vector<16x16x32xf32>
    %55 = vector.shape_cast %54 : vector<16x16x32xf32> to vector<256x32xf32>
    %c8 = arith.constant 8 : index
    %c0_62 = arith.constant 0 : index
    %c0_63 = arith.constant 0 : index
    %56 = vector.load %arg2[%c8, %c0_62, %c0_63] : memref<9x32x32xf32, #tpu.memory_space<vmem>>, vector<1x32x32xf32>
    %57 = vector.shape_cast %56 : vector<1x32x32xf32> to vector<32x32xf32>
    %cst_64 = arith.constant dense<0.000000e+00> : vector<256x32xf32>
    %58 = tpu.matmul %55, %57, %cst_64 {dimension_numbers = #tpu.dot_dimension_numbers<[1], [0], [0], [1], [0, 0, 1, 1], [], []>} : vector<256x32xf32>, vector<32x32xf32>, vector<256x32xf32> -> vector<256x32xf32>
    %59 = arith.addf %53, %58 : vector<256x32xf32>
    %c0_65 = arith.constant 0 : index
    %c0_66 = arith.constant 0 : index
    %60 = vector.load %arg3[%c0_65, %c0_66] : memref<1x32xf32, #tpu.memory_space<vmem>>, vector<1x32xf32>
    %61 = vector.broadcast %60 : vector<1x32xf32> to vector<256x32xf32>
    %62 = arith.mulf %59, %61 : vector<256x32xf32>
    %c0_67 = arith.constant 0 : index
    %c0_68 = arith.constant 0 : index
    %63 = vector.load %arg4[%c0_67, %c0_68] : memref<1x32xf32, #tpu.memory_space<vmem>>, vector<1x32xf32>
    %64 = vector.broadcast %63 : vector<1x32xf32> to vector<256x32xf32>
    %65 = arith.addf %62, %64 : vector<256x32xf32>
    %cst_69 = arith.constant 0.000000e+00 : f32
    %66 = vector.broadcast %cst_69 : f32 to vector<256x32xf32>
    %67 = arith.maximumf %65, %66 : vector<256x32xf32>
    %cst_70 = arith.constant 0.000000e+00 : f32
    %68 = vector.broadcast %cst_70 : f32 to vector<18x18x32xf32>
    %c0_71 = arith.constant 0 : index
    %c0_72 = arith.constant 0 : index
    %c0_73 = arith.constant 0 : index
    %69 = vector.load %arg10[%c0_71, %c0_72, %c0_73] : memref<18x18x32xf32, #tpu.memory_space<vmem>>, vector<18x18x32xf32>
    tpu.vector_store %arg10[%c0_71, %c0_72, %c0_73], %68 {strides = array<i32>} : memref<18x18x32xf32, #tpu.memory_space<vmem>>, vector<18x18x32xf32>,
    %70 = vector.shape_cast %67 : vector<256x32xf32> to vector<16x16x32xf32>
    %c1_74 = arith.constant 1 : index
    %c1_75 = arith.constant 1 : index
    %c0_76 = arith.constant 0 : index
    %71 = vector.load %arg10[%c1_74, %c1_75, %c0_76] : memref<18x18x32xf32, #tpu.memory_space<vmem>>, vector<16x16x32xf32>
    tpu.vector_store %arg10[%c1_74, %c1_75, %c0_76], %70 {strides = array<i32>} : memref<18x18x32xf32, #tpu.memory_space<vmem>>, vector<16x16x32xf32>,
    %cst_77 = arith.constant 0.000000e+00 : f32
    %72 = vector.broadcast %cst_77 : f32 to vector<256x32xf32>
    %c0_78 = arith.constant 0 : index
    %c0_79 = arith.constant 0 : index
    %c0_80 = arith.constant 0 : index
    %73 = vector.load %arg10[%c0_78, %c0_79, %c0_80] : memref<18x18x32xf32, #tpu.memory_space<vmem>>, vector<16x16x32xf32>
    %74 = vector.shape_cast %73 : vector<16x16x32xf32> to vector<256x32xf32>
    %c0_81 = arith.constant 0 : index
    %c0_82 = arith.constant 0 : index
    %c0_83 = arith.constant 0 : index
    %75 = vector.load %arg5[%c0_81, %c0_82, %c0_83] : memref<9x32x32xf32, #tpu.memory_space<vmem>>, vector<1x32x32xf32>
    %76 = vector.shape_cast %75 : vector<1x32x32xf32> to vector<32x32xf32>
    %cst_84 = arith.constant dense<0.000000e+00> : vector<256x32xf32>
    %77 = tpu.matmul %74, %76, %cst_84 {dimension_numbers = #tpu.dot_dimension_numbers<[1], [0], [0], [1], [0, 0, 1, 1], [], []>} : vector<256x32xf32>, vector<32x32xf32>, vector<256x32xf32> -> vector<256x32xf32>
    %78 = arith.addf %72, %77 : vector<256x32xf32>
    %c0_85 = arith.constant 0 : index
    %c1_86 = arith.constant 1 : index
    %c0_87 = arith.constant 0 : index
    %79 = vector.load %arg10[%c0_85, %c1_86, %c0_87] : memref<18x18x32xf32, #tpu.memory_space<vmem>>, vector<16x16x32xf32>
    %80 = vector.shape_cast %79 : vector<16x16x32xf32> to vector<256x32xf32>
    %c1_88 = arith.constant 1 : index
    %c0_89 = arith.constant 0 : index
    %c0_90 = arith.constant 0 : index
    %81 = vector.load %arg5[%c1_88, %c0_89, %c0_90] : memref<9x32x32xf32, #tpu.memory_space<vmem>>, vector<1x32x32xf32>
    %82 = vector.shape_cast %81 : vector<1x32x32xf32> to vector<32x32xf32>
    %cst_91 = arith.constant dense<0.000000e+00> : vector<256x32xf32>
    %83 = tpu.matmul %80, %82, %cst_91 {dimension_numbers = #tpu.dot_dimension_numbers<[1], [0], [0], [1], [0, 0, 1, 1], [], []>} : vector<256x32xf32>, vector<32x32xf32>, vector<256x32xf32> -> vector<256x32xf32>
    %84 = arith.addf %78, %83 : vector<256x32xf32>
    %c0_92 = arith.constant 0 : index
    %c2_93 = arith.constant 2 : index
    %c0_94 = arith.constant 0 : index
    %85 = vector.load %arg10[%c0_92, %c2_93, %c0_94] : memref<18x18x32xf32, #tpu.memory_space<vmem>>, vector<16x16x32xf32>
    %86 = vector.shape_cast %85 : vector<16x16x32xf32> to vector<256x32xf32>
    %c2_95 = arith.constant 2 : index
    %c0_96 = arith.constant 0 : index
    %c0_97 = arith.constant 0 : index
    %87 = vector.load %arg5[%c2_95, %c0_96, %c0_97] : memref<9x32x32xf32, #tpu.memory_space<vmem>>, vector<1x32x32xf32>
    %88 = vector.shape_cast %87 : vector<1x32x32xf32> to vector<32x32xf32>
    %cst_98 = arith.constant dense<0.000000e+00> : vector<256x32xf32>
    %89 = tpu.matmul %86, %88, %cst_98 {dimension_numbers = #tpu.dot_dimension_numbers<[1], [0], [0], [1], [0, 0, 1, 1], [], []>} : vector<256x32xf32>, vector<32x32xf32>, vector<256x32xf32> -> vector<256x32xf32>
    %90 = arith.addf %84, %89 : vector<256x32xf32>
    %c1_99 = arith.constant 1 : index
    %c0_100 = arith.constant 0 : index
    %c0_101 = arith.constant 0 : index
    %91 = vector.load %arg10[%c1_99, %c0_100, %c0_101] : memref<18x18x32xf32, #tpu.memory_space<vmem>>, vector<16x16x32xf32>
    %92 = vector.shape_cast %91 : vector<16x16x32xf32> to vector<256x32xf32>
    %c3_102 = arith.constant 3 : index
    %c0_103 = arith.constant 0 : index
    %c0_104 = arith.constant 0 : index
    %93 = vector.load %arg5[%c3_102, %c0_103, %c0_104] : memref<9x32x32xf32, #tpu.memory_space<vmem>>, vector<1x32x32xf32>
    %94 = vector.shape_cast %93 : vector<1x32x32xf32> to vector<32x32xf32>
    %cst_105 = arith.constant dense<0.000000e+00> : vector<256x32xf32>
    %95 = tpu.matmul %92, %94, %cst_105 {dimension_numbers = #tpu.dot_dimension_numbers<[1], [0], [0], [1], [0, 0, 1, 1], [], []>} : vector<256x32xf32>, vector<32x32xf32>, vector<256x32xf32> -> vector<256x32xf32>
    %96 = arith.addf %90, %95 : vector<256x32xf32>
    %c1_106 = arith.constant 1 : index
    %c1_107 = arith.constant 1 : index
    %c0_108 = arith.constant 0 : index
    %97 = vector.load %arg10[%c1_106, %c1_107, %c0_108] : memref<18x18x32xf32, #tpu.memory_space<vmem>>, vector<16x16x32xf32>
    %98 = vector.shape_cast %97 : vector<16x16x32xf32> to vector<256x32xf32>
    %c4_109 = arith.constant 4 : index
    %c0_110 = arith.constant 0 : index
    %c0_111 = arith.constant 0 : index
    %99 = vector.load %arg5[%c4_109, %c0_110, %c0_111] : memref<9x32x32xf32, #tpu.memory_space<vmem>>, vector<1x32x32xf32>
    %100 = vector.shape_cast %99 : vector<1x32x32xf32> to vector<32x32xf32>
    %cst_112 = arith.constant dense<0.000000e+00> : vector<256x32xf32>
    %101 = tpu.matmul %98, %100, %cst_112 {dimension_numbers = #tpu.dot_dimension_numbers<[1], [0], [0], [1], [0, 0, 1, 1], [], []>} : vector<256x32xf32>, vector<32x32xf32>, vector<256x32xf32> -> vector<256x32xf32>
    %102 = arith.addf %96, %101 : vector<256x32xf32>
    %c1_113 = arith.constant 1 : index
    %c2_114 = arith.constant 2 : index
    %c0_115 = arith.constant 0 : index
    %103 = vector.load %arg10[%c1_113, %c2_114, %c0_115] : memref<18x18x32xf32, #tpu.memory_space<vmem>>, vector<16x16x32xf32>
    %104 = vector.shape_cast %103 : vector<16x16x32xf32> to vector<256x32xf32>
    %c5_116 = arith.constant 5 : index
    %c0_117 = arith.constant 0 : index
    %c0_118 = arith.constant 0 : index
    %105 = vector.load %arg5[%c5_116, %c0_117, %c0_118] : memref<9x32x32xf32, #tpu.memory_space<vmem>>, vector<1x32x32xf32>
    %106 = vector.shape_cast %105 : vector<1x32x32xf32> to vector<32x32xf32>
    %cst_119 = arith.constant dense<0.000000e+00> : vector<256x32xf32>
    %107 = tpu.matmul %104, %106, %cst_119 {dimension_numbers = #tpu.dot_dimension_numbers<[1], [0], [0], [1], [0, 0, 1, 1], [], []>} : vector<256x32xf32>, vector<32x32xf32>, vector<256x32xf32> -> vector<256x32xf32>
    %108 = arith.addf %102, %107 : vector<256x32xf32>
    %c2_120 = arith.constant 2 : index
    %c0_121 = arith.constant 0 : index
    %c0_122 = arith.constant 0 : index
    %109 = vector.load %arg10[%c2_120, %c0_121, %c0_122] : memref<18x18x32xf32, #tpu.memory_space<vmem>>, vector<16x16x32xf32>
    %110 = vector.shape_cast %109 : vector<16x16x32xf32> to vector<256x32xf32>
    %c6_123 = arith.constant 6 : index
    %c0_124 = arith.constant 0 : index
    %c0_125 = arith.constant 0 : index
    %111 = vector.load %arg5[%c6_123, %c0_124, %c0_125] : memref<9x32x32xf32, #tpu.memory_space<vmem>>, vector<1x32x32xf32>
    %112 = vector.shape_cast %111 : vector<1x32x32xf32> to vector<32x32xf32>
    %cst_126 = arith.constant dense<0.000000e+00> : vector<256x32xf32>
    %113 = tpu.matmul %110, %112, %cst_126 {dimension_numbers = #tpu.dot_dimension_numbers<[1], [0], [0], [1], [0, 0, 1, 1], [], []>} : vector<256x32xf32>, vector<32x32xf32>, vector<256x32xf32> -> vector<256x32xf32>
    %114 = arith.addf %108, %113 : vector<256x32xf32>
    %c2_127 = arith.constant 2 : index
    %c1_128 = arith.constant 1 : index
    %c0_129 = arith.constant 0 : index
    %115 = vector.load %arg10[%c2_127, %c1_128, %c0_129] : memref<18x18x32xf32, #tpu.memory_space<vmem>>, vector<16x16x32xf32>
    %116 = vector.shape_cast %115 : vector<16x16x32xf32> to vector<256x32xf32>
    %c7_130 = arith.constant 7 : index
    %c0_131 = arith.constant 0 : index
    %c0_132 = arith.constant 0 : index
    %117 = vector.load %arg5[%c7_130, %c0_131, %c0_132] : memref<9x32x32xf32, #tpu.memory_space<vmem>>, vector<1x32x32xf32>
    %118 = vector.shape_cast %117 : vector<1x32x32xf32> to vector<32x32xf32>
    %cst_133 = arith.constant dense<0.000000e+00> : vector<256x32xf32>
    %119 = tpu.matmul %116, %118, %cst_133 {dimension_numbers = #tpu.dot_dimension_numbers<[1], [0], [0], [1], [0, 0, 1, 1], [], []>} : vector<256x32xf32>, vector<32x32xf32>, vector<256x32xf32> -> vector<256x32xf32>
    %120 = arith.addf %114, %119 : vector<256x32xf32>
    %c2_134 = arith.constant 2 : index
    %c2_135 = arith.constant 2 : index
    %c0_136 = arith.constant 0 : index
    %121 = vector.load %arg10[%c2_134, %c2_135, %c0_136] : memref<18x18x32xf32, #tpu.memory_space<vmem>>, vector<16x16x32xf32>
    %122 = vector.shape_cast %121 : vector<16x16x32xf32> to vector<256x32xf32>
    %c8_137 = arith.constant 8 : index
    %c0_138 = arith.constant 0 : index
    %c0_139 = arith.constant 0 : index
    %123 = vector.load %arg5[%c8_137, %c0_138, %c0_139] : memref<9x32x32xf32, #tpu.memory_space<vmem>>, vector<1x32x32xf32>
    %124 = vector.shape_cast %123 : vector<1x32x32xf32> to vector<32x32xf32>
    %cst_140 = arith.constant dense<0.000000e+00> : vector<256x32xf32>
    %125 = tpu.matmul %122, %124, %cst_140 {dimension_numbers = #tpu.dot_dimension_numbers<[1], [0], [0], [1], [0, 0, 1, 1], [], []>} : vector<256x32xf32>, vector<32x32xf32>, vector<256x32xf32> -> vector<256x32xf32>
    %126 = arith.addf %120, %125 : vector<256x32xf32>
    %127 = vector.shape_cast %1 : vector<16x16x32xf32> to vector<256x32xf32>
    %c0_141 = arith.constant 0 : index
    %c0_142 = arith.constant 0 : index
    %128 = vector.load %arg6[%c0_141, %c0_142] : memref<1x32xf32, #tpu.memory_space<vmem>>, vector<1x32xf32>
    %129 = vector.broadcast %128 : vector<1x32xf32> to vector<256x32xf32>
    %130 = arith.mulf %126, %129 : vector<256x32xf32>
    %c0_143 = arith.constant 0 : index
    %c0_144 = arith.constant 0 : index
    %131 = vector.load %arg7[%c0_143, %c0_144] : memref<1x32xf32, #tpu.memory_space<vmem>>, vector<1x32xf32>
    %132 = vector.broadcast %131 : vector<1x32xf32> to vector<256x32xf32>
    %133 = arith.addf %130, %132 : vector<256x32xf32>
    %134 = arith.addf %133, %127 : vector<256x32xf32>
    %cst_145 = arith.constant 0.000000e+00 : f32
    %135 = vector.broadcast %cst_145 : f32 to vector<256x32xf32>
    %136 = arith.maximumf %134, %135 : vector<256x32xf32>
    %137 = vector.shape_cast %136 : vector<256x32xf32> to vector<16x16x32xf32>
    %c0_146 = arith.constant 0 : index
    %c0_147 = arith.constant 0 : index
    %c0_148 = arith.constant 0 : index
    %c0_149 = arith.constant 0 : index
    %138 = vector.load %arg8[%c0_146, %c0_147, %c0_148, %c0_149] : memref<1x16x16x32xf32, #tpu.memory_space<vmem>>, vector<1x16x16x32xf32>
    %139 = vector.shape_cast %138 : vector<1x16x16x32xf32> to vector<16x16x32xf32>
    %140 = vector.shape_cast %137 : vector<16x16x32xf32> to vector<1x16x16x32xf32>
    tpu.vector_store %arg8[%c0_146, %c0_147, %c0_148, %c0_149], %140 {strides = array<i32>} : memref<1x16x16x32xf32, #tpu.memory_space<vmem>>, vector<1x16x16x32xf32>,
    return
  }
  func.func @transform_0(%arg0: i32) -> (i32, i32, i32, i32) {
    %c0_i32 = arith.constant 0 : i32
    %c0_i32_0 = arith.constant 0 : i32
    %c0_i32_1 = arith.constant 0 : i32
    %c0_i32_2 = arith.constant 0 : i32
    return %arg0, %c0_i32, %c0_i32_0, %c0_i32_1 : i32, i32, i32, i32
  }
  func.func @transform_1(%arg0: i32) -> (i32, i32, i32) {
    %c0_i32 = arith.constant 0 : i32
    %c0_i32_0 = arith.constant 0 : i32
    %c0_i32_1 = arith.constant 0 : i32
    %c0_i32_2 = arith.constant 0 : i32
    return %c0_i32, %c0_i32_0, %c0_i32_1 : i32, i32, i32
  }
  func.func @transform_2(%arg0: i32) -> (i32, i32) {
    %c0_i32 = arith.constant 0 : i32
    %c0_i32_0 = arith.constant 0 : i32
    %c0_i32_1 = arith.constant 0 : i32
    return %c0_i32, %c0_i32_0 : i32, i32
  }
  func.func @transform_3(%arg0: i32) -> (i32, i32) {
    %c0_i32 = arith.constant 0 : i32
    %c0_i32_0 = arith.constant 0 : i32
    %c0_i32_1 = arith.constant 0 : i32
    return %c0_i32, %c0_i32_0 : i32, i32
  }
  func.func @transform_4(%arg0: i32) -> (i32, i32, i32) {
    %c0_i32 = arith.constant 0 : i32
    %c0_i32_0 = arith.constant 0 : i32
    %c0_i32_1 = arith.constant 0 : i32
    %c0_i32_2 = arith.constant 0 : i32
    return %c0_i32, %c0_i32_0, %c0_i32_1 : i32, i32, i32
  }
  func.func @transform_5(%arg0: i32) -> (i32, i32) {
    %c0_i32 = arith.constant 0 : i32
    %c0_i32_0 = arith.constant 0 : i32
    %c0_i32_1 = arith.constant 0 : i32
    return %c0_i32, %c0_i32_0 : i32, i32
  }
  func.func @transform_6(%arg0: i32) -> (i32, i32) {
    %c0_i32 = arith.constant 0 : i32
    %c0_i32_0 = arith.constant 0 : i32
    %c0_i32_1 = arith.constant 0 : i32
    return %c0_i32, %c0_i32_0 : i32, i32
  }
  func.func @transform_7(%arg0: i32) -> (i32, i32, i32, i32) {
    %c0_i32 = arith.constant 0 : i32
    %c0_i32_0 = arith.constant 0 : i32
    %c0_i32_1 = arith.constant 0 : i32
    %c0_i32_2 = arith.constant 0 : i32
    return %arg0, %c0_i32, %c0_i32_0, %c0_i32_1 : i32, i32, i32, i32
  }
}

</mosaic_0001>

<bundles_post_ra>
// kernel: tpu_custom_call.1
= control target key start
LH: loop header
LB: loop body
LE: loop exit
PB: predicated region body
PF: predicated region fallthrough
CT: control target
= control target key end

     0   :  { %s9536_s0 = inlined_call_operand.hbm [shape: f32[2,16,16,32], index: 0, kind: input, shape index: {}]   ;;  %s9537_s1 = inlined_call_operand.hbm [shape: f32[9,32,32], index: 1, kind: input, shape index: {}]   ;;  %s9538_s2 = inlined_call_operand.vmem [shape: f32[1,32], index: 2, kind: input, shape index: {}]   ;;  %s9539_s3 = inlined_call_operand.vmem [shape: f32[1,32], index: 3, kind: input, shape index: {}]   ;;  %s9540_s4 = inlined_call_operand.hbm [shape: f32[9,32,32], index: 4, kind: input, shape index: {}]   ;;  %s9541_s5 = inlined_call_operand.vmem [shape: f32[1,32], index: 5, kind: input, shape index: {}]   ;;  %s9542_s6 = inlined_call_operand.vmem [shape: f32[1,32], index: 6, kind: input, shape index: {}]   ;;  %s9543_s7 = inlined_call_operand.hbm [shape: f32[2,16,16,32], index: 7, kind: output, shape index: {}]  }
   0x1   :  { %9642 = sst [smem:[#allocation105_spill]] %s9537_s1 }
   0x2   :  { %12 = vsyncpa [#allocation5], 0 }
   0x3   :  { %14 = vsyncpa [#allocation5 + $0x1], 0 }
   0x4   :  { %15 = vsyncpa [#allocation8], 0 }
   0x5   :  { %16 = vsyncpa [#allocation6], 0 }
   0x6   :  { %18 = vsyncpa [#allocation6 + $0x1], 0  ;;  %s6688_s24 = smov 0   ;;  %s6690_s25 = smov 0  }
   0x7   :  { %s6692_s26 = smov 0   ;;  %s6694_s27 = smov 0  }
   0x8 LB: > { %s6709_s28 = sadd.s32 4294967295, %s6639_s27   ;;  %s5796_s29 = sadd.s32 4294967294, %s6639_s27   ;;  %s6639_s27 = sphi %s6694_s27, %s9957_s27   ;;  %s6635_s26 = sphi %s6692_s26, %s9956_s26   ;;  %s6631_s25 = sphi %s6690_s25, %s9955_s25   ;;  %s6627_s24 = sphi %s6688_s24, %s9954_s24  }
   0x9   : > { %p44_p0 = scmp.ne.s32.totalorder %s6631_s25, %s6627_s24  ;;  %p45_p1 = scmp.eq.s32.totalorder %s6709_s28, 0 }
   0xa   : > { %p194_p2 = scmp.eq.s32.totalorder %s6709_s28, 1  ;;  %p200_p3 = scmp.eq.s32.totalorder %s5796_s29, 1 }
   0xb   : > { %p6718_p4 = por %p45_p1, %p44_p0  ;;  %p5797_p5 = scmp.ge.s32.totalorder %s6639_s27, 1 }
   0xc   : > { %p6723_p6 = por %p200_p3, %p44_p0  ;;  %p207_p7 = scmp.lt.s32.totalorder %s6639_s27, 3 }
   0xd   : > { %s9645_s1 = sld [smem:[#allocation105_spill]]  ;;  %s6641_s13 = smov [#allocation7]  }
   0xe   : > { %p6731_p8 = pnand %p5797_p5, %p207_p7  ;;  %s220_s14 = sshll.u32 %s6641_s13, 4  ;;  %s221_s14 = int_to_ptr.vmem [resolvable:$true] %s220_s14 }
   0xf   : > { %s238_s17 = sshll.u32 %s9540_s4, 4  ;;  %s9544_s18 = smov 128   ;;  %s239_s17 = int_to_ptr.hbm [resolvable:$true] %s238_s17 }
  0x10   : > { %p6412_p9 = pneg %p6731_p8  ;;  %s9545_s19 = smov 8  }
  0x11   : > { %s6644_s20 = smov [#allocation9]   ;;  %s6750_s22 = sadd.s32 1, %s6639_s27  }
  0x12   : > { %p6413_p10 = pnand %p6412_p9, %p45_p1  ;;  %s240_s21 = sshll.u32 %s6644_s20, 4  ;;  %s241_s21 = int_to_ptr.vmem [resolvable:$true] %s240_s21 }
  0x13   : > { %s218_s11 = sshll.u32 %s9645_s1, 4  ;;  %s31_s23 = sadd.s32 1, %s6635_s26  ;;  %s219_s11 = int_to_ptr.hbm [resolvable:$true] %s218_s11 }
  0x14   : > { %6415 = dma.hbm_to_vmem [thread:$0]  (!%p6413_p10), %s219_s11, 4608, %s221_s14, [#allocation8], %s9544_s18, %s9544_s18, %s9545_s19  }
  0x15   : > { %6418 = dma.hbm_to_vmem [thread:$0]  (!%p6413_p10), %s239_s17, 4608, %s241_s21, [#allocation8], %s9544_s18, %s9544_s18, %s9545_s19  }
  0x16   : > { %s28_s29 = ssub.s32 %s6639_s27, %s6750_s22  ;;  %p38_p12 = scmp.ne.s32.totalorder %s6635_s26, %s6631_s25 }
  0x17   : > { %p29_p13 = scmp.eq.s32.totalorder %s28_s29, 0  ;;  %p39_p0 = scmp.eq.s32.totalorder %s6639_s27, 0 }
  0x18   : > { %p6760_p3 = por %p194_p2, %p38_p12  ;;  %p6429_p5 = scmp.lt.s32.totalorder %s6639_s27, 2 }
  0x19   : > { %s6766_s10 = scalar_select %p29_p13, %s6635_s26, %s31_s23  }
  0x1a   : > { %p40_p7 = por %p39_p0, %p38_p12  ;;  %s260_s11 = sand.u32 1, %s6635_s26  }
  0x1b   : > { %s5801_s13 = sshll.u32 %s260_s11, 8  ;;  %s6390_s14 = sshll.u32 %s6639_s27, 8 }
  0x1c   : > { %s269_s17 = scalar_lea.hbm %s9536_s0, %s6390_s14  ;;  %s264_s20 = scalar_lea.vmem [#allocation4], %s5801_s13 }
  0x1d   : > { %s272_s21 = sshll.u32 %s264_s20, 4  ;;  %s270_s29 = sshll.u32 %s269_s17, 4  ;;  %s273_s21 = int_to_ptr.vmem [resolvable:$true] %s272_s21  ;;  %s271_s29 = int_to_ptr.hbm [resolvable:$true] %s270_s29 }
  0x1e   : > { %p6773_p2 = pnand %p6429_p5, %p40_p7  ;;  %s261_s23 = scalar_lea.sflag [#allocation5], %s260_s11 }
  0x1f   : > { %s6539_s19 = sshra.s32 %s271_s29, 4  ;;  %s6546_s15 = scalar_lea.hbm %s9536_s0, 512  ;;  %s6540_s19 = int_to_ptr.hbm [resolvable:$true] %s6539_s19 }
  0x20   : > { %s6541_s1 = scalar_lea.hbm %s6540_s19, 256  ;;  %p6543_p10 = pneg %p6773_p2 }
  0x21   : > { %p6542_p9 = scmp.ne.s32.totalorder %s6540_s19, %s6541_s1  ;;  %p6547_p0 = scmp.lt.s32.totalorder %s6540_s19, %s9536_s0 }
  0x22   : > { %p6548_p5 = scmp.lt.s32.totalorder %s6546_s15, %s6541_s1 }
  0x23   : > { %p6544_p12 = pnand %p6543_p10, %p6542_p9 }
  0x24   : > { %p6549_p7 = por %p6548_p5, %p6547_p0 }
  0x25   : > { %p6545_p13 = pneg %p6544_p12 }
  0x27   : > { %p6550_p11 = pnand %p6549_p7, %p6545_p13 }
  0x29   : > { %6553 = shalt.err (!%p6550_p11)
}
  0x2a   : > { %s9649_s11 = smov 8   ;;  %s9650_s20 = smov 128  }
  0x2b   : > { %6422 = dma.hbm_to_vmem [thread:$0]  (!%p6773_p2), %s271_s29, 4096, %s273_s21, %s261_s23, %s9650_s20, %s9650_s20, %s9649_s11  }
  0x2c   : > { %284 = sbr.rel (%p6731_p8) target bundleno = 1590 (0x636), region = 48 }
  0x31   : > { %s6793_s14 = sand.u32 1, %s6631_s25  }
  0x32   : > { %s5805_s1 = sshll.u32 %s6793_s14, 8  ;;  %s287_s19 = scalar_lea.sflag [#allocation5], %s6793_s14 }
  0x33   : > { %s6799_s13 = scalar_lea.vmem [#allocation4], %s5805_s1 }
  0x34   : > { %6614 = dma.done.wait (%p6718_p4), %s287_s19, 4096  }
  0x35   : > { %6616 = vsyncadd (%p6718_p4), %s287_s19, 4294963200 }
  0x36   : > { %6618 = dma.done.wait (%p45_p1), [#allocation8], 9216  }
  0x37   : > { %6620 = vsyncadd (%p45_p1), [#allocation8], 4294958080  ;;  %vm364_vm0 = vcmask 261120   ;;  %v6645_v0 = vmov 0.0   ;;  %v525_v1 = vld [vmem:[#allocation7 + $0x38] sm:$0xff]  ;;  %v524_v3 = vld [vmem:[#allocation7 + $0x30] sm:$0xff] }
  0x38   : > { %365 = vst.msk [vmem:[#allocation2] sm:$0xff] %vm364_vm0, %v6645_v0  ;;  %v488_v2 = vld [vmem:[#allocation7 + $0x18] sm:$0xff]  ;;  %634 = vmatpush.msra.mxu0 %v525_v1  ;;  %6392 = vmatpush.msra.mxu2 %v525_v1  ;;  %v487_v4 = vld [vmem:[#allocation7 + $0x10] sm:$0xff]  ;;  %v523_v5 = vld [vmem:[#allocation7 + $0x28] sm:$0xff]  ;;  %vm367_vm1 = vcmask 254976   ;;  %s6589_s11 = scalar_lea.hbm %s9543_s7, 512 }
  0x39   : > { %366 = vst.msk [vmem:[#allocation2 + $0x8] sm:$0xff] %vm364_vm0, %v6645_v0  ;;  %6396 = vmatpush.msra.mxu3 %v488_v2  ;;  %843 = vmatpush.msra.mxu1 %v488_v2  ;;  %v486_v6 = vld [vmem:[#allocation7 + $0x8] sm:$0xff]  ;;  %v522_v7 = vld [vmem:[#allocation7 + $0x20] sm:$0xff]  ;;  %v980_v10 = vld [vmem:[#allocation7 + $0x58] sm:$0xff] }
  0x3a   : > { %369 = vst.msk [vmem:[#allocation2 + $0x18] sm:$0xff] %vm364_vm0, %v6645_v0  ;;  %635 = vmatpush.msra.mxu0 %v524_v3  ;;  %6393 = vmatpush.msra.mxu2 %v524_v3  ;;  %v485_v9 = vld [vmem:[#allocation7] sm:$0xff]  ;;  %v1258_v11 = vld [vmem:[#allocation7 + $0x78] sm:$0xff]  ;;  %v6951_v12 = vld [vmem:[%s6799_s13 + $0x70] sm:$0xff] }
  0x3b   : > { %370 = vst.msk [vmem:[#allocation2 + $0x20] sm:$0xff] %vm364_vm0, %v6645_v0  ;;  %6397 = vmatpush.msra.mxu3 %v487_v4  ;;  %844 = vmatpush.msra.mxu1 %v487_v4  ;;  %v1536_v17 = vld [vmem:[#allocation7 + $0x98] sm:$0xff]  ;;  %v7044_v20 = vld [vmem:[%s6799_s13] sm:$0xff]  ;;  %v7054_v22 = vld [vmem:[%s6799_s13 + $0x8] sm:$0xff] }
  0x3c   : > { %372 = vst.msk [vmem:[#allocation2 + $0x30] sm:$0xff] %vm364_vm0, %v6645_v0  ;;  %636 = vmatpush.msra.mxu0 %v523_v5  ;;  %6394 = vmatpush.msra.mxu2 %v523_v5  ;;  %v7039_v19 = vld [vmem:[%s6799_s13 + $0x78] sm:$0xff]  ;;  %v7049_v21 = vld [vmem:[%s6799_s13 + $0x80] sm:$0xff]  ;;  %v979_v23 = vld [vmem:[#allocation7 + $0x50] sm:$0xff] }
  0x3d   : > { %373 = vst.msk [vmem:[#allocation2 + $0x38] sm:$0xff] %vm364_vm0, %v6645_v0  ;;  %6398 = vmatpush.msra.mxu3 %v486_v6  ;;  %845 = vmatpush.msra.mxu1 %v486_v6  ;;  %v1257_v24 = vld [vmem:[#allocation7 + $0x70] sm:$0xff]  ;;  %v7059_v25 = vld [vmem:[%s6799_s13 + $0x88] sm:$0xff]  ;;  %v7074_v28 = vld [vmem:[%s6799_s13 + $0x18] sm:$0xff] }
  0x3e   : > { %375 = vst.msk [vmem:[#allocation2 + $0x48] sm:$0xff] %vm364_vm0, %v6645_v0  ;;  %637 = vmatpush.msra.mxu0 %v522_v7  ;;  %6395 = vmatpush.msra.mxu2 %v522_v7  ;;  %v7064_v26 = vld [vmem:[%s6799_s13 + $0x10] sm:$0xff]  ;;  %v7079_v29 = vld [vmem:[%s6799_s13 + $0x98] sm:$0xff]  ;;  %v7084_v30 = vld [vmem:[%s6799_s13 + $0x20] sm:$0xff] }
  0x3f   : > { %376 = vst.msk [vmem:[#allocation2 + $0x50] sm:$0xff] %vm364_vm0, %v6645_v0  ;;  %6399 = vmatpush.msra.mxu3 %v485_v9  ;;  %846 = vmatpush.msra.mxu1 %v485_v9  ;;  %v453_v16 = vld [vmem:[#allocation2] sm:$0xff]  ;;  %v7069_v27 = vld [vmem:[%s6799_s13 + $0x90] sm:$0xff]  ;;  %v7122_v41 = vld [vmem:[%s6799_s13 + $0x28] sm:$0xff] }
  0x40   : > { %378 = vst.msk [vmem:[#allocation2 + $0x60] sm:$0xff] %vm364_vm0, %v6645_v0  ;;  %v489_v8 = vld [vmem:[#allocation2 + $0x1] sm:$0xff]  ;;  %1089 = vmatpush.msrb.mxu2 %v980_v10  ;;  %5841 = vmatmul.msk.f32.vlgmr.msra.gmra.mxu1 %vm364_vm0, %v453_v16  ;;  %v1535_v36 = vld [vmem:[#allocation7 + $0x90] sm:$0xff]  ;;  %v7174_v53 = vld [vmem:[%s6799_s13 + $0x38] sm:$0xff] }
  0x41   : > { %379 = vst.msk [vmem:[#allocation2 + $0x68] sm:$0xff] %vm364_vm0, %v6645_v0  ;;  %5809 = vmatmul.msk.f32.vlgmr.msra.gmra.mxu0 %vm364_vm0, %v489_v8  ;;  %1367 = vmatpush.msrb.mxu3 %v1258_v11  ;;  %v454_v18 = vld [vmem:[#allocation2 + $0x8] sm:$0xff]  ;;  %v7093_v33 = vld [vmem:[%s6799_s13 + $0xa0] sm:$0xff]  ;;  %v7148_v47 = vld [vmem:[%s6799_s13 + $0x30] sm:$0xff] }
  0x42   : > { %381 = vst.msk [vmem:[#allocation2 + $0x78] sm:$0xff] %vm364_vm0, %v6645_v0  ;;  %1645 = vmatpush.msrb.mxu0 %v1536_v17  ;;  %1090 = vmatpush.msrb.mxu2 %v979_v23  ;;  %v7127_v42 = vld [vmem:[%s6799_s13 + $0xa8] sm:$0xff]  ;;  %v7153_v48 = vld [vmem:[%s6799_s13 + $0xb0] sm:$0xff]  ;;  %v7179_v54 = vld [vmem:[%s6799_s13 + $0xb8] sm:$0xff] }
  0x43   : > { %382 = vst.msk [vmem:[#allocation2 + $0x80] sm:$0xff] %vm364_vm0, %v6645_v0  ;;  %1368 = vmatpush.msrb.mxu3 %v1257_v24  ;;  %v978_v55 = vld [vmem:[#allocation7 + $0x48] sm:$0xff]  ;;  %v7200_v61 = vld [vmem:[%s6799_s13 + $0x40] sm:$0xff]  ;;  %v7252_v10 = vld [vmem:[%s6799_s13 + $0x50] sm:$0xff] }
  0x44   : > { %384 = vst.msk [vmem:[#allocation2 + $0x90] sm:$0xff] %vm364_vm0, %v6645_v0  ;;  %1646 = vmatpush.msrb.mxu0 %v1535_v36  ;;  %v1256_v56 = vld [vmem:[#allocation7 + $0x68] sm:$0xff]  ;;  %1091 = vmatpush.msrb.mxu2 %v978_v55  ;;  %v7205_v62 = vld [vmem:[%s6799_s13 + $0xc0] sm:$0xff]  ;;  %v7257_v11 = vld [vmem:[%s6799_s13 + $0xd0] sm:$0xff] }
  0x45   : > { %385 = vst.msk [vmem:[#allocation2 + $0x98] sm:$0xff] %vm364_vm0, %v6645_v0  ;;  %1369 = vmatpush.msrb.mxu3 %v1256_v56  ;;  %v1534_v63 = vld [vmem:[#allocation7 + $0x88] sm:$0xff]  ;;  %v7278_v23 = vld [vmem:[%s6799_s13 + $0x58] sm:$0xff]  ;;  %v977_v36 = vld [vmem:[#allocation7 + $0x40] sm:$0xff] }
  0x46   : > { %387 = vst.msk [vmem:[#allocation2 + $0xa8] sm:$0xff] %vm364_vm0, %v6645_v0  ;;  %1647 = vmatpush.msrb.mxu0 %v1534_v63  ;;  %v7226_v4 = vld [vmem:[%s6799_s13 + $0x48] sm:$0xff]  ;;  %v7283_v24 = vld [vmem:[%s6799_s13 + $0xd8] sm:$0xff]  ;;  %v1255_v55 = vld [vmem:[#allocation7 + $0x60] sm:$0xff]  ;;  %1092 = vmatpush.msrb.mxu2 %v977_v36 }
  0x47   : > { %388 = vst.msk [vmem:[#allocation2 + $0xb0] sm:$0xff] %vm364_vm0, %v6645_v0  ;;  %v7231_v5 = vld [vmem:[%s6799_s13 + $0xc8] sm:$0xff]  ;;  %1370 = vmatpush.msrb.mxu3 %v1255_v55  ;;  %v1533_v36 = vld [vmem:[#allocation7 + $0x80] sm:$0xff] }
  0x48   : > { %390 = vst.msk [vmem:[#allocation2 + $0xc0] sm:$0xff] %vm364_vm0, %v6645_v0  ;;  %5842 = vmatmul.msk.f32.gmra.mxu1 %vm364_vm0, %v454_v18  ;;  %1648 = vmatpush.msrb.mxu0 %v1533_v36 }
  0x49   : > { %391 = vst.msk [vmem:[#allocation2 + $0xc8] sm:$0xff] %vm364_vm0, %v6645_v0 }
  0x4a   : > { %393 = vst.msk [vmem:[#allocation2 + $0xd8] sm:$0xff] %vm364_vm0, %v6645_v0 }
  0x4b   : > { %394 = vst.msk [vmem:[#allocation2 + $0xe0] sm:$0xff] %vm364_vm0, %v6645_v0 }
  0x4c   : > { %396 = vst.msk [vmem:[#allocation2 + $0xf0] sm:$0xff] %vm364_vm0, %v6645_v0 }
  0x4d   : > { %397 = vst.msk [vmem:[#allocation2 + $0xf8] sm:$0xff] %vm364_vm0, %v6645_v0 }
  0x4e   : > { %399 = vst.msk [vmem:[#allocation2 + $0x108] sm:$0xff] %vm364_vm0, %v6645_v0 }
  0x4f   : > { %400 = vst.msk [vmem:[#allocation2 + $0x110] sm:$0xff] %vm364_vm0, %v6645_v0 }
  0x50   : > { %402 = vst.msk [vmem:[#allocation2 + $0x120] sm:$0xff] %vm364_vm0, %v6645_v0 }
  0x51   : > { %403 = vst.msk [vmem:[#allocation2 + $0x128] sm:$0xff] %vm364_vm0, %v6645_v0 }
  0x52   : > { %405 = vst.msk [vmem:[#allocation2 + $0x138] sm:$0xff] %vm364_vm0, %v6645_v0 }
  0x53   : > { %406 = vst.msk [vmem:[#allocation2 + $0x140] sm:$0xff] %vm364_vm0, %v6645_v0 }
  0x54   : > { %408 = vst.msk [vmem:[#allocation2 + $0x150] sm:$0xff] %vm364_vm0, %v6645_v0 }
  0x55   : > { %409 = vst.msk [vmem:[#allocation2 + $0x158] sm:$0xff] %vm364_vm0, %v6645_v0 }
  0x56   : > { %411 = vst.msk [vmem:[#allocation2 + $0x168] sm:$0xff] %vm364_vm0, %v6645_v0 }
  0x57   : > { %412 = vst.msk [vmem:[#allocation2 + $0x170] sm:$0xff] %vm364_vm0, %v6645_v0 }
  0x58   : > { %414 = vst.msk [vmem:[#allocation2 + $0x180] sm:$0xff] %vm364_vm0, %v6645_v0 }
  0x59   : > { %415 = vst.msk [vmem:[#allocation2 + $0x188] sm:$0xff] %vm364_vm0, %v6645_v0 }
  0x5a   : > { %417 = vst.msk [vmem:[#allocation2 + $0x198] sm:$0xff] %vm364_vm0, %v6645_v0 }
  0x5b   : > { %418 = vst.msk [vmem:[#allocation2 + $0x1a0] sm:$0xff] %vm364_vm0, %v6645_v0 }
  0x5c   : > { %2995 = vst.msk [vmem:[#allocation3] sm:$0xff] %vm364_vm0, %v6645_v0 }
  0x5d   : > { %2996 = vst.msk [vmem:[#allocation3 + $0x8] sm:$0xff] %vm364_vm0, %v6645_v0 }
  0x5e   : > { %2998 = vst.msk [vmem:[#allocation3 + $0x18] sm:$0xff] %vm364_vm0, %v6645_v0 }
  0x5f   : > { %2999 = vst.msk [vmem:[#allocation3 + $0x20] sm:$0xff] %vm364_vm0, %v6645_v0 }
  0x60   : > { %3001 = vst.msk [vmem:[#allocation3 + $0x30] sm:$0xff] %vm364_vm0, %v6645_v0 }
  0x61   : > { %3002 = vst.msk [vmem:[#allocation3 + $0x38] sm:$0xff] %vm364_vm0, %v6645_v0 }
  0x62   : > { %3004 = vst.msk [vmem:[#allocation3 + $0x48] sm:$0xff] %vm364_vm0, %v6645_v0 }
  0x63   : > { %3005 = vst.msk [vmem:[#allocation3 + $0x50] sm:$0xff] %vm364_vm0, %v6645_v0 }
  0x64   : > { %3007 = vst.msk [vmem:[#allocation3 + $0x60] sm:$0xff] %vm364_vm0, %v6645_v0 }
  0x65   : > { %3008 = vst.msk [vmem:[#allocation3 + $0x68] sm:$0xff] %vm364_vm0, %v6645_v0 }
  0x66   : > { %3010 = vst.msk [vmem:[#allocation3 + $0x78] sm:$0xff] %vm364_vm0, %v6645_v0 }
  0x67   : > { %3011 = vst.msk [vmem:[#allocation3 + $0x80] sm:$0xff] %vm364_vm0, %v6645_v0 }
  0x68   : > { %3013 = vst.msk [vmem:[#allocation3 + $0x90] sm:$0xff] %vm364_vm0, %v6645_v0 }
  0x69   : > { %3014 = vst.msk [vmem:[#allocation3 + $0x98] sm:$0xff] %vm364_vm0, %v6645_v0 }
  0x6a   : > { %3016 = vst.msk [vmem:[#allocation3 + $0xa8] sm:$0xff] %vm364_vm0, %v6645_v0 }
  0x6b   : > { %3017 = vst.msk [vmem:[#allocation3 + $0xb0] sm:$0xff] %vm364_vm0, %v6645_v0 }
  0x6c   : > { %3019 = vst.msk [vmem:[#allocation3 + $0xc0] sm:$0xff] %vm364_vm0, %v6645_v0 }
  0x6d   : > { %3020 = vst.msk [vmem:[#allocation3 + $0xc8] sm:$0xff] %vm364_vm0, %v6645_v0 }
  0x6e   : > { %3022 = vst.msk [vmem:[#allocation3 + $0xd8] sm:$0xff] %vm364_vm0, %v6645_v0 }
  0x6f   : > { %3023 = vst.msk [vmem:[#allocation3 + $0xe0] sm:$0xff] %vm364_vm0, %v6645_v0 }
  0x70   : > { %3025 = vst.msk [vmem:[#allocation3 + $0xf0] sm:$0xff] %vm364_vm0, %v6645_v0 }
  0x71   : > { %3026 = vst.msk [vmem:[#allocation3 + $0xf8] sm:$0xff] %vm364_vm0, %v6645_v0 }
  0x72   : > { %3028 = vst.msk [vmem:[#allocation3 + $0x108] sm:$0xff] %vm364_vm0, %v6645_v0 }
  0x73   : > { %3029 = vst.msk [vmem:[#allocation3 + $0x110] sm:$0xff] %vm364_vm0, %v6645_v0 }
  0x74   : > { %3031 = vst.msk [vmem:[#allocation3 + $0x120] sm:$0xff] %vm364_vm0, %v6645_v0 }
  0x75   : > { %3032 = vst.msk [vmem:[#allocation3 + $0x128] sm:$0xff] %vm364_vm0, %v6645_v0 }
  0x76   : > { %3034 = vst.msk [vmem:[#allocation3 + $0x138] sm:$0xff] %vm364_vm0, %v6645_v0 }
  0x77   : > { %3035 = vst.msk [vmem:[#allocation3 + $0x140] sm:$0xff] %vm364_vm0, %v6645_v0 }
  0x78   : > { %3037 = vst.msk [vmem:[#allocation3 + $0x150] sm:$0xff] %vm364_vm0, %v6645_v0 }
  0x79   : > { %3038 = vst.msk [vmem:[#allocation3 + $0x158] sm:$0xff] %vm364_vm0, %v6645_v0 }
  0x7a   : > { %3040 = vst.msk [vmem:[#allocation3 + $0x168] sm:$0xff] %vm364_vm0, %v6645_v0 }
  0x7b   : > { %3041 = vst.msk [vmem:[#allocation3 + $0x170] sm:$0xff] %vm364_vm0, %v6645_v0 }
  0x7c   : > { %3043 = vst.msk [vmem:[#allocation3 + $0x180] sm:$0xff] %vm364_vm0, %v6645_v0 }
  0x7d   : > { %3044 = vst.msk [vmem:[#allocation3 + $0x188] sm:$0xff] %vm364_vm0, %v6645_v0 }
  0x7e   : > { %9651 = vst [vmem:[#allocation14_spill] sm:$0xff] %v6951_v12 }
  0x7f   : > { %3046 = vst.msk [vmem:[#allocation3 + $0x198] sm:$0xff] %vm364_vm0, %v6645_v0 }
  0x80   : > { %3047 = vst.msk [vmem:[#allocation3 + $0x1a0] sm:$0xff] %vm364_vm0, %v6645_v0 }
  0x81   : > { %435 = vst.msk [vmem:[#allocation2 + $0xc1] sm:$0xff] %vm364_vm0, %v6951_v12 }
  0x82   : > { %368 = vst.msk [vmem:[#allocation2 + $0x10] sm:$0x3] %vm367_vm1, %v6645_v0 }
  0x83   : > { %371 = vst.msk [vmem:[#allocation2 + $0x28] sm:$0x3] %vm367_vm1, %v6645_v0 }
  0x84   : > { %374 = vst.msk [vmem:[#allocation2 + $0x40] sm:$0x3] %vm367_vm1, %v6645_v0 }
  0x85   : > { %377 = vst.msk [vmem:[#allocation2 + $0x58] sm:$0x3] %vm367_vm1, %v6645_v0 }
  0x86   : > { %380 = vst.msk [vmem:[#allocation2 + $0x70] sm:$0x3] %vm367_vm1, %v6645_v0 }
  0x87   : > { %383 = vst.msk [vmem:[#allocation2 + $0x88] sm:$0x3] %vm367_vm1, %v6645_v0 }
  0x88   : > { %v6971_v13 = vld [vmem:[#allocation2 + $0xc1] sm:$0xff]  ;;  %386 = vst.msk [vmem:[#allocation2 + $0xa0] sm:$0x3] %vm367_vm1, %v6645_v0 }
  0x89   : > { %v6973_v14 = vld [vmem:[#allocation2 + $0xc0] sm:$0xff]  ;;  %5825 = vmatmul.msk.f32.vlgmr.msra.gmra.mxu2 %vm364_vm0, %v6971_v13  ;;  %v490_v15 = vld [vmem:[#allocation2 + $0x9] sm:$0xff]  ;;  %389 = vst.msk [vmem:[#allocation2 + $0xb8] sm:$0x3] %vm367_vm1, %v6645_v0 }
  0x8a   : > { %5857 = vmatmul.msk.f32.vlgmr.msra.gmra.mxu3 %vm364_vm0, %v6973_v14  ;;  %5810 = vmatmul.msk.f32.gmra.mxu0 %vm364_vm0, %v490_v15  ;;  %392 = vst.msk [vmem:[#allocation2 + $0xd0] sm:$0x3] %vm367_vm1, %v6645_v0 }
  0x8b   : > { %395 = vst.msk [vmem:[#allocation2 + $0xe8] sm:$0x3] %vm367_vm1, %v6645_v0 }
  0x8c   : > { %398 = vst.msk [vmem:[#allocation2 + $0x100] sm:$0x3] %vm367_vm1, %v6645_v0 }
  0x8d   : > { %401 = vst.msk [vmem:[#allocation2 + $0x118] sm:$0x3] %vm367_vm1, %v6645_v0 }
  0x8e   : > { %404 = vst.msk [vmem:[#allocation2 + $0x130] sm:$0x3] %vm367_vm1, %v6645_v0 }
  0x8f   : > { %407 = vst.msk [vmem:[#allocation2 + $0x148] sm:$0x3] %vm367_vm1, %v6645_v0 }
  0x90   : > { %410 = vst.msk [vmem:[#allocation2 + $0x160] sm:$0x3] %vm367_vm1, %v6645_v0 }
  0x91   : > { %413 = vst.msk [vmem:[#allocation2 + $0x178] sm:$0x3] %vm367_vm1, %v6645_v0 }
  0x92   : > { %416 = vst.msk [vmem:[#allocation2 + $0x190] sm:$0x3] %vm367_vm1, %v6645_v0 }
  0x93   : > { %419 = vst.msk [vmem:[#allocation2 + $0x1a8] sm:$0x3] %vm367_vm1, %v6645_v0 }
  0x94   : > { %2997 = vst.msk [vmem:[#allocation3 + $0x10] sm:$0x3] %vm367_vm1, %v6645_v0 }
  0x95   : > { %3000 = vst.msk [vmem:[#allocation3 + $0x28] sm:$0x3] %vm367_vm1, %v6645_v0 }
  0x96   : > { %3003 = vst.msk [vmem:[#allocation3 + $0x40] sm:$0x3] %vm367_vm1, %v6645_v0 }
  0x97   : > { %3006 = vst.msk [vmem:[#allocation3 + $0x58] sm:$0x3] %vm367_vm1, %v6645_v0 }
  0x98   : > { %3009 = vst.msk [vmem:[#allocation3 + $0x70] sm:$0x3] %vm367_vm1, %v6645_v0 }
  0x99   : > { %3012 = vst.msk [vmem:[#allocation3 + $0x88] sm:$0x3] %vm367_vm1, %v6645_v0 }
  0x9a   : > { %3015 = vst.msk [vmem:[#allocation3 + $0xa0] sm:$0x3] %vm367_vm1, %v6645_v0 }
  0x9b   : > { %3018 = vst.msk [vmem:[#allocation3 + $0xb8] sm:$0x3] %vm367_vm1, %v6645_v0 }
  0x9c   : > { %3021 = vst.msk [vmem:[#allocation3 + $0xd0] sm:$0x3] %vm367_vm1, %v6645_v0 }
  0x9d   : > { %3024 = vst.msk [vmem:[#allocation3 + $0xe8] sm:$0x3] %vm367_vm1, %v6645_v0 }
  0x9e   : > { %3027 = vst.msk [vmem:[#allocation3 + $0x100] sm:$0x3] %vm367_vm1, %v6645_v0 }
  0x9f   : > { %3030 = vst.msk [vmem:[#allocation3 + $0x118] sm:$0x3] %vm367_vm1, %v6645_v0 }
  0xa0   : > { %3033 = vst.msk [vmem:[#allocation3 + $0x130] sm:$0x3] %vm367_vm1, %v6645_v0 }
  0xa1   : > { %3036 = vst.msk [vmem:[#allocation3 + $0x148] sm:$0x3] %vm367_vm1, %v6645_v0 }
  0xa2   : > { %3039 = vst.msk [vmem:[#allocation3 + $0x160] sm:$0x3] %vm367_vm1, %v6645_v0 }
  0xa3   : > { %3042 = vst.msk [vmem:[#allocation3 + $0x178] sm:$0x3] %vm367_vm1, %v6645_v0 }
  0xa4   : > { %9652 = vst [vmem:[#allocation15_spill] sm:$0xff] %v7039_v19 }
  0xa5   : > { %3045 = vst.msk [vmem:[#allocation3 + $0x190] sm:$0x3] %vm367_vm1, %v6645_v0 }
  0xa6   : > { %9653 = vst [vmem:[#allocation16_spill] sm:$0xff] %v7044_v20 }
  0xa7   : > { %3048 = vst.msk [vmem:[#allocation3 + $0x1a8] sm:$0x3] %vm367_vm1, %v6645_v0 }
  0xa8   : > { %9654 = vst [vmem:[#allocation17_spill] sm:$0xff] %v7049_v21 }
  0xa9   : > { %436 = vst.msk [vmem:[#allocation2 + $0xc9] sm:$0xff] %vm364_vm0, %v7039_v19 }
  0xaa   : > { %9655 = vst [vmem:[#allocation18_spill] sm:$0xff] %v7054_v22 }
  0xab   : > { %421 = vst.msk [vmem:[#allocation2 + $0x19] sm:$0xff] %vm364_vm0, %v7044_v20 }
  0xac   : > { %9656 = vst [vmem:[#allocation19_spill] sm:$0xff] %v7059_v25 }
  0xad   : > { %437 = vst.msk [vmem:[#allocation2 + $0xd9] sm:$0xff] %vm364_vm0, %v7049_v21 }
  0xae   : > { %9657 = vst [vmem:[#allocation20_spill] sm:$0xff] %v7064_v26 }
  0xaf   : > { %422 = vst.msk [vmem:[#allocation2 + $0x21] sm:$0xff] %vm364_vm0, %v7054_v22 }
  0xb0   : > { %9658 = vst [vmem:[#allocation21_spill] sm:$0xff] %v7069_v27  ;;  %v7086_v31 = vld [vmem:[#allocation2 + $0xc9] sm:$0xff] }
  0xb1   : > { %438 = vst.msk [vmem:[#allocation2 + $0xe1] sm:$0xff] %vm364_vm0, %v7059_v25  ;;  %v7088_v32 = vld [vmem:[#allocation2 + $0xc8] sm:$0xff]  ;;  %5826 = vmatmul.msk.f32.gmra.mxu2 %vm364_vm0, %v7086_v31 }
  0xb2   : > { %9659 = vst [vmem:[#allocation22_spill] sm:$0xff] %v7074_v28  ;;  %5858 = vmatmul.msk.f32.gmra.mxu3 %vm364_vm0, %v7088_v32  ;;  %v7099_v34 = vld [vmem:[#allocation2 + $0x19] sm:$0xff] }
  0xb3   : > { %423 = vst.msk [vmem:[#allocation2 + $0x31] sm:$0xff] %vm364_vm0, %v7064_v26  ;;  %v7101_v35 = vld [vmem:[#allocation2 + $0x18] sm:$0xff]  ;;  %5811 = vmatmul.msk.f32.gmra.mxu0 %vm364_vm0, %v7099_v34 }
  0xb4   : > { %9660 = vst [vmem:[#allocation23_spill] sm:$0xff] %v7079_v29  ;;  %5843 = vmatmul.msk.f32.gmra.mxu1 %vm364_vm0, %v7101_v35  ;;  %v7113_v37 = vld [vmem:[#allocation2 + $0xd9] sm:$0xff] }
  0xb5   : > { %439 = vst.msk [vmem:[#allocation2 + $0xf1] sm:$0xff] %vm364_vm0, %v7069_v27  ;;  %v7115_v38 = vld [vmem:[#allocation2 + $0xd8] sm:$0xff] }
  0xb6   : > { %9661 = vst [vmem:[#allocation24_spill] sm:$0xff] %v7084_v30  ;;  %v7117_v39 = vld [vmem:[#allocation2 + $0x21] sm:$0xff] }
  0xb7   : > { %424 = vst.msk [vmem:[#allocation2 + $0x39] sm:$0xff] %vm364_vm0, %v7074_v28  ;;  %v7119_v40 = vld [vmem:[#allocation2 + $0x20] sm:$0xff] }
  0xb8   : > { %9662 = vst [vmem:[#allocation25_spill] sm:$0xff] %v7093_v33  ;;  %v7139_v43 = vld [vmem:[#allocation2 + $0xe1] sm:$0xff] }
  0xb9   : > { %440 = vst.msk [vmem:[#allocation2 + $0xf9] sm:$0xff] %vm364_vm0, %v7079_v29  ;;  %5827 = vmatmul.msk.f32.gmra.mxu2 %vm364_vm0, %v7113_v37  ;;  %v7141_v44 = vld [vmem:[#allocation2 + $0xe0] sm:$0xff] }
  0xba   : > { %425 = vst.msk [vmem:[#allocation2 + $0x49] sm:$0xff] %vm364_vm0, %v7084_v30  ;;  %5859 = vmatmul.msk.f32.gmra.mxu3 %vm364_vm0, %v7115_v38  ;;  %v7143_v45 = vld [vmem:[#allocation2 + $0x31] sm:$0xff]  ;;  %v1778_v22 = vld [vmem:[#allocation2 + $0x1a] sm:$0xff] }
  0xbb   : > { %441 = vst.msk [vmem:[#allocation2 + $0x109] sm:$0xff] %vm364_vm0, %v7093_v33  ;;  %5812 = vmatmul.msk.f32.gmra.mxu0 %vm364_vm0, %v7117_v39  ;;  %v7145_v46 = vld [vmem:[#allocation2 + $0x30] sm:$0xff]  ;;  %v7330_v33 = vld [vmem:[%s6799_s13 + $0x68] sm:$0xff] }
  0xbc   : > { %9663 = vst [vmem:[#allocation26_spill] sm:$0xff] %v7122_v41  ;;  %5844 = vmatmul.msk.f32.gmra.mxu1 %vm364_vm0, %v7119_v40  ;;  %v7165_v49 = vld [vmem:[#allocation2 + $0xf1] sm:$0xff] }
  0xbd   : > { %426 = vst.msk [vmem:[#allocation2 + $0x51] sm:$0xff] %vm364_vm0, %v7122_v41  ;;  %v7167_v50 = vld [vmem:[#allocation2 + $0xf0] sm:$0xff]  ;;  %v1812_v41 = vld [vmem:[#allocation7 + $0xa8] sm:$0xff] }
  0xbe   : > { %9664 = vst [vmem:[#allocation27_spill] sm:$0xff] %v7127_v42  ;;  %v7169_v51 = vld [vmem:[#allocation2 + $0x39] sm:$0xff] }
  0xbf   : > { %442 = vst.msk [vmem:[#allocation2 + $0x111] sm:$0xff] %vm364_vm0, %v7127_v42  ;;  %v7171_v52 = vld [vmem:[#allocation2 + $0x38] sm:$0xff] }
  0xc0   : > { %9665 = vst [vmem:[#allocation28_spill] sm:$0xff] %v7148_v47  ;;  %v7191_v57 = vld [vmem:[#allocation2 + $0xf9] sm:$0xff] }
  0xc1   : > { %427 = vst.msk [vmem:[#allocation2 + $0x61] sm:$0xff] %vm364_vm0, %v7148_v47  ;;  %5828 = vmatmul.msk.f32.gmra.mxu2 %vm364_vm0, %v7139_v43  ;;  %v7193_v58 = vld [vmem:[#allocation2 + $0xf8] sm:$0xff]  ;;  %v7195_v59 = vld [vmem:[#allocation2 + $0x49] sm:$0xff] }
  0xc2   : > { %9666 = vst [vmem:[#allocation29_spill] sm:$0xff] %v7153_v48  ;;  %5860 = vmatmul.msk.f32.gmra.mxu3 %vm364_vm0, %v7141_v44  ;;  %v7197_v60 = vld [vmem:[#allocation2 + $0x48] sm:$0xff] }
  0xc3   : > { %443 = vst.msk [vmem:[#allocation2 + $0x121] sm:$0xff] %vm364_vm0, %v7153_v48  ;;  %5813 = vmatmul.msk.f32.gmra.mxu0 %vm364_vm0, %v7143_v45  ;;  %v7217_v0 = vld [vmem:[#allocation2 + $0x109] sm:$0xff] }
  0xc4   : > { %5845 = vmatmul.msk.f32.gmra.mxu1 %vm364_vm0, %v7145_v46  ;;  %9667 = vst [vmem:[#allocation30_spill] sm:$0xff] %v7174_v53  ;;  %v7219_v1 = vld [vmem:[#allocation2 + $0x108] sm:$0xff]  ;;  %v7221_v2 = vld [vmem:[#allocation2 + $0x51] sm:$0xff] }
  0xc5   : > { %428 = vst.msk [vmem:[#allocation2 + $0x69] sm:$0xff] %vm364_vm0, %v7174_v53  ;;  %v7223_v3 = vld [vmem:[#allocation2 + $0x50] sm:$0xff] }
  0xc6   : > { %9668 = vst [vmem:[#allocation31_spill] sm:$0xff] %v7179_v54  ;;  %v7243_v6 = vld [vmem:[#allocation2 + $0x111] sm:$0xff] }
  0xc7   : > { %444 = vst.msk [vmem:[#allocation2 + $0x129] sm:$0xff] %vm364_vm0, %v7179_v54  ;;  %v7245_v7 = vld [vmem:[#allocation2 + $0x110] sm:$0xff] }
  0xc8   : > { %9669 = vst [vmem:[#allocation32_spill] sm:$0xff] %v7200_v61  ;;  %v7247_v8 = vld [vmem:[#allocation2 + $0x61] sm:$0xff] }
  0xc9   : > { %5829 = vmatmul.msk.f32.gmra.mxu2 %vm364_vm0, %v7165_v49  ;;  %429 = vst.msk [vmem:[#allocation2 + $0x79] sm:$0xff] %vm364_vm0, %v7200_v61  ;;  %v7249_v9 = vld [vmem:[#allocation2 + $0x60] sm:$0xff] }
  0xca   : > { %5861 = vmatmul.msk.f32.gmra.mxu3 %vm364_vm0, %v7167_v50  ;;  %9670 = vst [vmem:[#allocation33_spill] sm:$0xff] %v7205_v62  ;;  %v7269_v15 = vld [vmem:[#allocation2 + $0x121] sm:$0xff] }
  0xcb   : > { %5814 = vmatmul.msk.f32.gmra.mxu0 %vm364_vm0, %v7169_v51  ;;  %445 = vst.msk [vmem:[#allocation2 + $0x139] sm:$0xff] %vm364_vm0, %v7205_v62  ;;  %v7271_v16 = vld [vmem:[#allocation2 + $0x120] sm:$0xff] }
  0xcc   : > { %5846 = vmatmul.msk.f32.gmra.mxu1 %vm364_vm0, %v7171_v52  ;;  %9671 = vst [vmem:[#allocation34_spill] sm:$0xff] %v7226_v4  ;;  %v7273_v17 = vld [vmem:[#allocation2 + $0x69] sm:$0xff]  ;;  %v7304_v62 = vld [vmem:[%s6799_s13 + $0x60] sm:$0xff] }
  0xcd   : > { %430 = vst.msk [vmem:[#allocation2 + $0x81] sm:$0xff] %vm364_vm0, %v7226_v4  ;;  %v7275_v18 = vld [vmem:[#allocation2 + $0x68] sm:$0xff] }
  0xce   : > { %9672 = vst [vmem:[#allocation35_spill] sm:$0xff] %v7231_v5  ;;  %v7295_v56 = vld [vmem:[#allocation2 + $0x129] sm:$0xff] }
  0xcf   : > { %446 = vst.msk [vmem:[#allocation2 + $0x141] sm:$0xff] %vm364_vm0, %v7231_v5  ;;  %v7297_v63 = vld [vmem:[#allocation2 + $0x128] sm:$0xff] }
  0xd0   : > { %9673 = vst [vmem:[#allocation36_spill] sm:$0xff] %v7252_v10  ;;  %v7301_v5 = vld [vmem:[#allocation2 + $0x78] sm:$0xff] }
  0xd1   : > { %5830 = vmatmul.msk.f32.gmra.mxu2 %vm364_vm0, %v7191_v57  ;;  %431 = vst.msk [vmem:[#allocation2 + $0x91] sm:$0xff] %vm364_vm0, %v7252_v10  ;;  %v1813_v10 = vld [vmem:[#allocation7 + $0xb0] sm:$0xff] }
  0xd2   : > { %5862 = vmatmul.msk.f32.gmra.mxu3 %vm364_vm0, %v7193_v58  ;;  %9674 = vst [vmem:[#allocation37_spill] sm:$0xff] %v7257_v11  ;;  %v7321_v55 = vld [vmem:[#allocation2 + $0x139] sm:$0xff] }
  0xd3   : > { %5815 = vmatmul.msk.f32.gmra.mxu0 %vm364_vm0, %v7195_v59  ;;  %447 = vst.msk [vmem:[#allocation2 + $0x151] sm:$0xff] %vm364_vm0, %v7257_v11  ;;  %v7299_v11 = vld [vmem:[#allocation2 + $0x79] sm:$0xff] }
  0xd4   : > { %5847 = vmatmul.msk.f32.gmra.mxu1 %vm364_vm0, %v7197_v60  ;;  %9675 = vst [vmem:[#allocation38_spill] sm:$0xff] %v7278_v23  ;;  %v7323_v54 = vld [vmem:[#allocation2 + $0x138] sm:$0xff]  ;;  %v7325_v48 = vld [vmem:[#allocation2 + $0x81] sm:$0xff] }
  0xd5   : > { %432 = vst.msk [vmem:[#allocation2 + $0x99] sm:$0xff] %vm364_vm0, %v7278_v23  ;;  %v7327_v42 = vld [vmem:[#allocation2 + $0x80] sm:$0xff]  ;;  %v1814_v23 = vld [vmem:[#allocation7 + $0xb8] sm:$0xff] }
  0xd6   : > { %9676 = vst [vmem:[#allocation39_spill] sm:$0xff] %v7283_v24  ;;  %v7347_v36 = vld [vmem:[#allocation2 + $0x141] sm:$0xff]  ;;  %1923 = vmatpush.msrb.mxu1 %v1814_v23 }
  0xd7   : > { %448 = vst.msk [vmem:[#allocation2 + $0x159] sm:$0xff] %vm364_vm0, %v7283_v24  ;;  %v7309_v24 = vld [vmem:[%s6799_s13 + $0xe0] sm:$0xff] }
  0xd8   : > { %9677 = vst [vmem:[#allocation40_spill] sm:$0xff] %v7304_v62  ;;  %v7349_v29 = vld [vmem:[#allocation2 + $0x140] sm:$0xff]  ;;  %v7351_v27 = vld [vmem:[#allocation2 + $0x91] sm:$0xff]  ;;  %1924 = vmatpush.msrb.mxu1 %v1813_v10 }
  0xd9   : > { %5831 = vmatmul.msk.f32.gmra.mxu2 %vm364_vm0, %v7217_v0  ;;  %433 = vst.msk [vmem:[#allocation2 + $0xa9] sm:$0xff] %vm364_vm0, %v7304_v62  ;;  %v7353_v25 = vld [vmem:[#allocation2 + $0x90] sm:$0xff]  ;;  %v2371_v62 = vld [vmem:[#allocation7 + $0xf8] sm:$0xff] }
  0xda   : > { %5863 = vmatmul.msk.f32.gmra.mxu3 %vm364_vm0, %v7219_v1  ;;  %9678 = vst [vmem:[#allocation41_spill] sm:$0xff] %v7309_v24  ;;  %v7365_v21 = vld [vmem:[#allocation2 + $0x150] sm:$0xff]  ;;  %1925 = vmatpush.msrb.mxu1 %v1812_v41  ;;  %v7411_v41 = vpop.f32.mrf.mxu0 }
  0xdb   : > { %5816 = vmatmul.msk.f32.gmra.mxu0 %vm364_vm0, %v7221_v2  ;;  %449 = vst.msk [vmem:[#allocation2 + $0x169] sm:$0xff] %vm364_vm0, %v7309_v24  ;;  %v7335_v24 = vld [vmem:[%s6799_s13 + $0xe8] sm:$0xff]  ;;  %2480 = vmatpush.msra.mxu3 %v2371_v62  ;;  %v1811_v62 = vld [vmem:[#allocation7 + $0xa0] sm:$0xff] }
  0xdc   : > { %5848 = vmatmul.msk.f32.gmra.mxu1 %vm364_vm0, %v7223_v3  ;;  %9679 = vst [vmem:[#allocation42_spill] sm:$0xff] %v7330_v33  ;;  %v7367_v19 = vld [vmem:[#allocation2 + $0x99] sm:$0xff] }
  0xdd   : > { %434 = vst.msk [vmem:[#allocation2 + $0xb1] sm:$0xff] %vm364_vm0, %v7330_v33  ;;  %v7369_v12 = vld [vmem:[#allocation2 + $0x98] sm:$0xff]  ;;  %1926 = vmatpush.msrb.mxu1 %v1811_v62 }
  0xde   : > { %9680 = vst [vmem:[#allocation43_spill] sm:$0xff] %v7335_v24  ;;  %v2093_v33 = vld [vmem:[#allocation7 + $0xd8] sm:$0xff] }
  0xdf   : > { %450 = vst.msk [vmem:[#allocation2 + $0x171] sm:$0xff] %vm364_vm0, %v7335_v24  ;;  %v7363_v24 = vld [vmem:[#allocation2 + $0x151] sm:$0xff]  ;;  %2202 = vmatpush.msra.mxu2 %v2093_v33  ;;  %v7379_v4 = vld [vmem:[#allocation2 + $0x159] sm:$0xff] }
  0xe0   : > { %9681 = vst [vmem:[#allocation44_spill] sm:$0xff] %v7347_v36  ;;  %v7381_v61 = vld [vmem:[#allocation2 + $0x158] sm:$0xff]  ;;  %v7383_v53 = vld [vmem:[#allocation2 + $0xa9] sm:$0xff] }
  0xe1   : > { %5832 = vmatmul.msk.f32.gmra.mxu2 %vm364_vm0, %v7243_v6  ;;  %9682 = vst [vmem:[#allocation45_spill] sm:$0xff] %v7349_v29  ;;  %v7385_v47 = vld [vmem:[#allocation2 + $0xa8] sm:$0xff]  ;;  %v2649_v33 = vld [vmem:[#allocation7 + $0x118] sm:$0xff] }
  0xe2   : > { %5864 = vmatmul.msk.f32.gmra.mxu3 %vm364_vm0, %v7245_v7  ;;  %9683 = vst [vmem:[#allocation46_spill] sm:$0xff] %v7363_v24  ;;  %2758 = vmatpush.msra.mxu0 %v2649_v33  ;;  %v7395_v10 = vld [vmem:[#allocation2 + $0x169] sm:$0xff]  ;;  %v7413_v33 = vpop.f32.mrf.mxu1 }
  0xe3   : > { %5817 = vmatmul.msk.f32.gmra.mxu0 %vm364_vm0, %v7247_v8  ;;  %9684 = vst [vmem:[#allocation47_spill] sm:$0xff] %v7365_v21  ;;  %v7397_v23 = vld [vmem:[#allocation2 + $0x168] sm:$0xff] }
  0xe4   : > { %5849 = vmatmul.msk.f32.gmra.mxu1 %vm364_vm0, %v7249_v9  ;;  %9685 = vst [vmem:[#allocation48_spill] sm:$0xff] %v7379_v4  ;;  %v7399_v30 = vld [vmem:[#allocation2 + $0xb1] sm:$0xff] }
  0xe5   : > { %9686 = vst [vmem:[#allocation49_spill] sm:$0xff] %v7381_v61  ;;  %v7401_v28 = vld [vmem:[#allocation2 + $0xb0] sm:$0xff] }
  0xe6   : > { %9687 = vst [vmem:[#allocation50_spill] sm:$0xff] %v7395_v10  ;;  %v7415_v62 = vld [vmem:[#allocation2 + $0x171] sm:$0xff] }
  0xe7   : > { %9688 = vst [vmem:[#allocation51_spill] sm:$0xff] %v7397_v23  ;;  %v7417_v26 = vld [vmem:[#allocation2 + $0x170] sm:$0xff] }
  0xe8   : > { %9689 = vst [vmem:[#allocation52_spill] sm:$0xff] %v7415_v62 }
  0xe9   : > { %5833 = vmatmul.msk.f32.gmra.mxu2 %vm364_vm0, %v7269_v15  ;;  %9690 = vst [vmem:[#allocation53_spill] sm:$0xff] %v7417_v26 }
  0xea   : > { %5865 = vmatmul.msk.f32.gmra.mxu3 %vm364_vm0, %v7271_v16 }
  0xeb   : > { %5818 = vmatmul.msk.f32.gmra.mxu0 %vm364_vm0, %v7273_v17 }
  0xec   : > { %5850 = vmatmul.msk.f32.gmra.mxu1 %vm364_vm0, %v7275_v18 }
  0xf1   : > { %5834 = vmatmul.msk.f32.gmra.mxu2 %vm364_vm0, %v7295_v56 }
  0xf2   : > { %5866 = vmatmul.msk.f32.gmra.mxu3 %vm364_vm0, %v7297_v63 }
  0xf3   : > { %5819 = vmatmul.msk.f32.gmra.mxu0 %vm364_vm0, %v7299_v11 }
  0xf4   : > { %5851 = vmatmul.msk.f32.gmra.mxu1 %vm364_vm0, %v7301_v5 }
  0xf9   : > { %5835 = vmatmul.msk.f32.gmra.mxu2 %vm364_vm0, %v7321_v55 }
  0xfa   : > { %5867 = vmatmul.msk.f32.gmra.mxu3 %vm364_vm0, %v7323_v54 }
  0xfb   : > { %5820 = vmatmul.msk.f32.gmra.mxu0 %vm364_vm0, %v7325_v48 }
  0xfc   : > { %5852 = vmatmul.msk.f32.gmra.mxu1 %vm364_vm0, %v7327_v42 }
 0x101   : > { %5836 = vmatmul.msk.f32.gmra.mxu2 %vm364_vm0, %v7347_v36  ;;  %v7505_v36 = vld [vmem:[#allocation2 + $0x62] sm:$0xff] }
 0x102   : > { %5868 = vmatmul.msk.f32.gmra.mxu3 %vm364_vm0, %v7349_v29  ;;  %v7459_v29 = vld [vmem:[#allocation2 + $0x3a] sm:$0xff]  ;;  %9701 = vst [vmem:[#allocation64_spill] sm:$0xff] %v7505_v36 }
 0x103   : > { %5821 = vmatmul.msk.f32.gmra.mxu0 %vm364_vm0, %v7351_v27  ;;  %9695 = vst [vmem:[#allocation58_spill] sm:$0xff] %v7459_v29 }
 0x104   : > { %5853 = vmatmul.msk.f32.gmra.mxu1 %vm364_vm0, %v7353_v25 }
 0x107   : > { %v7426_v20 = vpop.f32.mrf.mxu0 }
 0x109   : > { %5837 = vmatmul.msk.f32.gmra.mxu2 %vm364_vm0, %v7363_v24  ;;  %v7444_v24 = vld [vmem:[#allocation2 + $0x32] sm:$0xff] }
 0x10a   : > { %5869 = vmatmul.msk.f32.gmra.mxu3 %vm364_vm0, %v7365_v21  ;;  %9693 = vst [vmem:[#allocation56_spill] sm:$0xff] %v7444_v24 }
 0x10b   : > { %5822 = vmatmul.msk.f32.gmra.mxu0 %vm364_vm0, %v7367_v19 }
 0x10c   : > { %5854 = vmatmul.msk.f32.gmra.mxu1 %vm364_vm0, %v7369_v12 }
 0x111   : > { %5838 = vmatmul.msk.f32.gmra.mxu2 %vm364_vm0, %v7379_v4  ;;  %v7435_v4 = vpop.f32.mrf.mxu3 }
 0x112   : > { %5870 = vmatmul.msk.f32.gmra.mxu3 %vm364_vm0, %v7381_v61  ;;  %v1779_v61 = vld [vmem:[#allocation2 + $0x22] sm:$0xff]  ;;  %9692 = vst [vmem:[#allocation55_spill] sm:$0xff] %v7435_v4 }
 0x113   : > { %5823 = vmatmul.msk.f32.gmra.mxu0 %vm364_vm0, %v7383_v53 }
 0x114   : > { %5855 = vmatmul.msk.f32.gmra.mxu1 %vm364_vm0, %v7385_v47 }
 0x119   : > { %5839 = vmatmul.msk.f32.gmra.mxu2 %vm364_vm0, %v7395_v10  ;;  %v944_v10 = vld [vmem:[#allocation2 + $0x2] sm:$0xff] }
 0x11a   : > { %5871 = vmatmul.msk.f32.gmra.mxu3 %vm364_vm0, %v7397_v23  ;;  %v7428_v23 = vpop.f32.mrf.mxu1 }
 0x11b   : > { %5824 = vmatmul.msk.f32.gmra.mxu0 %vm364_vm0, %v7399_v30 }
 0x11c   : > { %5856 = vmatmul.msk.f32.gmra.mxu1 %vm364_vm0, %v7401_v28 }
 0x121   : > { %5840 = vmatmul.msk.f32.gmra.mxu2 %vm364_vm0, %v7415_v62  ;;  %v7433_v62 = vpop.f32.mrf.mxu2 }
 0x122   : > { %5872 = vmatmul.msk.f32.gmra.mxu3 %vm364_vm0, %v7417_v26  ;;  %9691 = vst [vmem:[#allocation54_spill] sm:$0xff] %v7433_v62 }
 0x123   : > { %5937 = vmatmul.msk.f32.vlgmr.msrb.gmra.mxu0 %vm364_vm0, %v7099_v34  ;;  %v945_v34 = vld [vmem:[#allocation2 + $0xa] sm:$0xff] }
 0x124   : > { %5969 = vmatmul.msk.f32.vlgmr.msrb.gmra.mxu1 %vm364_vm0, %v1778_v22 }
 0x129   : > { %5873 = vmatmul.msk.f32.vlgmr.msrb.gmra.mxu2 %vm364_vm0, %v944_v10 }
 0x12a   : > { %5905 = vmatmul.msk.f32.vlgmr.msrb.gmra.mxu3 %vm364_vm0, %v7101_v35 }
 0x12b   : > { %5938 = vmatmul.msk.f32.gmra.mxu0 %vm364_vm0, %v7117_v39 }
 0x12c   : > { %5970 = vmatmul.msk.f32.gmra.mxu1 %vm364_vm0, %v1779_v61 }
 0x130   : > { %v7440_v26 = vpop.f32.mrf.mxu0 }
 0x131   : > { %v7442_v21 = vpop.f32.mrf.mxu1  ;;  %5874 = vmatmul.msk.f32.gmra.mxu2 %vm364_vm0, %v945_v34 }
 0x132   : > { %5906 = vmatmul.msk.f32.gmra.mxu3 %vm364_vm0, %v7119_v40 }
 0x133   : > { %5939 = vmatmul.msk.f32.gmra.mxu0 %vm364_vm0, %v7143_v45 }
 0x134   : > { %5971 = vmatmul.msk.f32.gmra.mxu1 %vm364_vm0, %v7444_v24  ;;  %v690_v35 = vpop.f32.mrf.mxu2 }
 0x135   : > { %v899_v39 = vpop.f32.mrf.mxu3 }
 0x136   : > { %v7453_v10 = vadd.f32 %v899_v39, %v690_v35 }
 0x138   : > { %9694 = vst [vmem:[#allocation57_spill] sm:$0xff] %v7453_v10  ;;  %v7455_v4 = vpop.f32.mrf.mxu0  ;;  %v7474_v10 = vld [vmem:[#allocation2 + $0x4a] sm:$0xff] }
 0x139   : > { %v7457_v62 = vpop.f32.mrf.mxu1  ;;  %5875 = vmatmul.msk.f32.gmra.mxu2 %vm364_vm0, %v1778_v22  ;;  %9697 = vst [vmem:[#allocation60_spill] sm:$0xff] %v7474_v10 }
 0x13a   : > { %5907 = vmatmul.msk.f32.gmra.mxu3 %vm364_vm0, %v7145_v46 }
 0x13b   : > { %5940 = vmatmul.msk.f32.gmra.mxu0 %vm364_vm0, %v7169_v51 }
 0x13c   : > { %5972 = vmatmul.msk.f32.gmra.mxu1 %vm364_vm0, %v7459_v29  ;;  %v693_v40 = vpop.f32.mrf.mxu2 }
 0x13d   : > { %v902_v45 = vpop.f32.mrf.mxu3 }
 0x13e   : > { %v7468_v34 = vadd.f32 %v902_v45, %v693_v40 }
 0x140   : > { %9696 = vst [vmem:[#allocation59_spill] sm:$0xff] %v7468_v34  ;;  %v7470_v35 = vpop.f32.mrf.mxu0  ;;  %v7489_v34 = vld [vmem:[#allocation2 + $0x52] sm:$0xff] }
 0x141   : > { %v7472_v39 = vpop.f32.mrf.mxu1  ;;  %5876 = vmatmul.msk.f32.gmra.mxu2 %vm364_vm0, %v1779_v61  ;;  %9699 = vst [vmem:[#allocation62_spill] sm:$0xff] %v7489_v34 }
 0x142   : > { %5908 = vmatmul.msk.f32.gmra.mxu3 %vm364_vm0, %v7171_v52  ;;  %v2092_v52 = vld [vmem:[#allocation7 + $0xd0] sm:$0xff] }
 0x143   : > { %5941 = vmatmul.msk.f32.gmra.mxu0 %vm364_vm0, %v7195_v59  ;;  %v2370_v59 = vld [vmem:[#allocation7 + $0xf0] sm:$0xff]  ;;  %2203 = vmatpush.msra.mxu2 %v2092_v52 }
 0x144   : > { %5973 = vmatmul.msk.f32.gmra.mxu1 %vm364_vm0, %v7474_v10  ;;  %v696_v22 = vpop.f32.mrf.mxu2  ;;  %2481 = vmatpush.msra.mxu3 %v2370_v59 }
 0x145   : > { %v905_v46 = vpop.f32.mrf.mxu3 }
 0x146   : > { %v7483_v51 = vadd.f32 %v905_v46, %v696_v22 }
 0x148   : > { %9698 = vst [vmem:[#allocation61_spill] sm:$0xff] %v7483_v51  ;;  %v7485_v40 = vpop.f32.mrf.mxu0 }
 0x149   : > { %v7487_v45 = vpop.f32.mrf.mxu1  ;;  %5877 = vmatmul.msk.f32.gmra.mxu2 %vm364_vm0, %v7444_v24 }
 0x14a   : > { %5909 = vmatmul.msk.f32.gmra.mxu3 %vm364_vm0, %v7197_v60  ;;  %v2648_v60 = vld [vmem:[#allocation7 + $0x110] sm:$0xff] }
 0x14b   : > { %5942 = vmatmul.msk.f32.gmra.mxu0 %vm364_vm0, %v7221_v2 }
 0x14c   : > { %5974 = vmatmul.msk.f32.gmra.mxu1 %vm364_vm0, %v7489_v34  ;;  %v699_v61 = vpop.f32.mrf.mxu2  ;;  %2759 = vmatpush.msra.mxu0 %v2648_v60 }
 0x14d   : > { %v908_v22 = vpop.f32.mrf.mxu3 }
 0x14e   : > { %v7499_v46 = vadd.f32 %v908_v22, %v699_v61 }
 0x150   : > { %9700 = vst [vmem:[#allocation63_spill] sm:$0xff] %v7499_v46  ;;  %v7501_v51 = vpop.f32.mrf.mxu0  ;;  %v7521_v46 = vld [vmem:[#allocation2 + $0x6a] sm:$0xff] }
 0x151   : > { %v7503_v24 = vpop.f32.mrf.mxu1  ;;  %5878 = vmatmul.msk.f32.gmra.mxu2 %vm364_vm0, %v7459_v29  ;;  %9703 = vst [vmem:[#allocation66_spill] sm:$0xff] %v7521_v46  ;;  %v7633_v29 = vld [vmem:[#allocation2 + $0xc2] sm:$0xff] }
 0x152   : > { %5910 = vmatmul.msk.f32.gmra.mxu3 %vm364_vm0, %v7223_v3  ;;  %9717 = vst [vmem:[#allocation80_spill] sm:$0xff] %v7633_v29 }
 0x153   : > { %5943 = vmatmul.msk.f32.gmra.mxu0 %vm364_vm0, %v7247_v8 }
 0x154   : > { %5975 = vmatmul.msk.f32.gmra.mxu1 %vm364_vm0, %v7505_v36  ;;  %v702_v2 = vpop.f32.mrf.mxu2 }
 0x155   : > { %v911_v52 = vpop.f32.mrf.mxu3 }
 0x156   : > { %v7515_v59 = vadd.f32 %v911_v52, %v702_v2 }
 0x158   : > { %9702 = vst [vmem:[#allocation65_spill] sm:$0xff] %v7515_v59  ;;  %v7517_v61 = vpop.f32.mrf.mxu0  ;;  %v7537_v59 = vld [vmem:[#allocation2 + $0x7a] sm:$0xff] }
 0x159   : > { %v7519_v22 = vpop.f32.mrf.mxu1  ;;  %5879 = vmatmul.msk.f32.gmra.mxu2 %vm364_vm0, %v7474_v10  ;;  %9705 = vst [vmem:[#allocation68_spill] sm:$0xff] %v7537_v59  ;;  %v7553_v10 = vld [vmem:[#allocation2 + $0x82] sm:$0xff] }
 0x15a   : > { %5911 = vmatmul.msk.f32.gmra.mxu3 %vm364_vm0, %v7249_v9  ;;  %9707 = vst [vmem:[#allocation70_spill] sm:$0xff] %v7553_v10 }
 0x15b   : > { %5944 = vmatmul.msk.f32.gmra.mxu0 %vm364_vm0, %v7273_v17 }
 0x15c   : > { %5976 = vmatmul.msk.f32.gmra.mxu1 %vm364_vm0, %v7521_v46  ;;  %v705_v3 = vpop.f32.mrf.mxu2 }
 0x15d   : > { %v914_v8 = vpop.f32.mrf.mxu3 }
 0x15e   : > { %v7531_v60 = vadd.f32 %v914_v8, %v705_v3 }
 0x160   : > { %9704 = vst [vmem:[#allocation67_spill] sm:$0xff] %v7531_v60  ;;  %v7533_v2 = vpop.f32.mrf.mxu0 }
 0x161   : > { %v7535_v52 = vpop.f32.mrf.mxu1  ;;  %5880 = vmatmul.msk.f32.gmra.mxu2 %vm364_vm0, %v7489_v34  ;;  %v7569_v34 = vld [vmem:[#allocation2 + $0x92] sm:$0xff] }
 0x162   : > { %5912 = vmatmul.msk.f32.gmra.mxu3 %vm364_vm0, %v7275_v18  ;;  %9709 = vst [vmem:[#allocation72_spill] sm:$0xff] %v7569_v34 }
 0x163   : > { %5945 = vmatmul.msk.f32.gmra.mxu0 %vm364_vm0, %v7299_v11 }
 0x164   : > { %5977 = vmatmul.msk.f32.gmra.mxu1 %vm364_vm0, %v7537_v59  ;;  %v708_v9 = vpop.f32.mrf.mxu2 }
 0x165   : > { %v917_v17 = vpop.f32.mrf.mxu3 }
 0x166   : > { %v7547_v3 = vadd.f32 %v917_v17, %v708_v9 }
 0x168   : > { %9706 = vst [vmem:[#allocation69_spill] sm:$0xff] %v7547_v3  ;;  %v7549_v8 = vpop.f32.mrf.mxu0 }
 0x169   : > { %v7551_v60 = vpop.f32.mrf.mxu1  ;;  %5881 = vmatmul.msk.f32.gmra.mxu2 %vm364_vm0, %v7505_v36  ;;  %v7585_v36 = vld [vmem:[#allocation2 + $0x9a] sm:$0xff] }
 0x16a   : > { %5913 = vmatmul.msk.f32.gmra.mxu3 %vm364_vm0, %v7301_v5  ;;  %9711 = vst [vmem:[#allocation74_spill] sm:$0xff] %v7585_v36 }
 0x16b   : > { %5946 = vmatmul.msk.f32.gmra.mxu0 %vm364_vm0, %v7325_v48 }
 0x16c   : > { %5978 = vmatmul.msk.f32.gmra.mxu1 %vm364_vm0, %v7553_v10  ;;  %v711_v11 = vpop.f32.mrf.mxu2 }
 0x16d   : > { %v920_v18 = vpop.f32.mrf.mxu3 }
 0x16e   : > { %v7563_v9 = vadd.f32 %v920_v18, %v711_v11 }
 0x170   : > { %9708 = vst [vmem:[#allocation71_spill] sm:$0xff] %v7563_v9  ;;  %v7565_v17 = vpop.f32.mrf.mxu0 }
 0x171   : > { %v7567_v3 = vpop.f32.mrf.mxu1  ;;  %5882 = vmatmul.msk.f32.gmra.mxu2 %vm364_vm0, %v7521_v46  ;;  %v7601_v46 = vld [vmem:[#allocation2 + $0xaa] sm:$0xff] }
 0x172   : > { %5914 = vmatmul.msk.f32.gmra.mxu3 %vm364_vm0, %v7327_v42  ;;  %9713 = vst [vmem:[#allocation76_spill] sm:$0xff] %v7601_v46 }
 0x173   : > { %5947 = vmatmul.msk.f32.gmra.mxu0 %vm364_vm0, %v7351_v27 }
 0x174   : > { %5979 = vmatmul.msk.f32.gmra.mxu1 %vm364_vm0, %v7569_v34  ;;  %v714_v48 = vpop.f32.mrf.mxu2 }
 0x175   : > { %v923_v5 = vpop.f32.mrf.mxu3 }
 0x176   : > { %v7579_v11 = vadd.f32 %v923_v5, %v714_v48 }
 0x178   : > { %9710 = vst [vmem:[#allocation73_spill] sm:$0xff] %v7579_v11  ;;  %v7581_v18 = vpop.f32.mrf.mxu0 }
 0x179   : > { %v7583_v9 = vpop.f32.mrf.mxu1  ;;  %5883 = vmatmul.msk.f32.gmra.mxu2 %vm364_vm0, %v7537_v59  ;;  %v7617_v59 = vld [vmem:[#allocation2 + $0xb2] sm:$0xff] }
 0x17a   : > { %5915 = vmatmul.msk.f32.gmra.mxu3 %vm364_vm0, %v7353_v25  ;;  %9715 = vst [vmem:[#allocation78_spill] sm:$0xff] %v7617_v59 }
 0x17b   : > { %5948 = vmatmul.msk.f32.gmra.mxu0 %vm364_vm0, %v7367_v19 }
 0x17c   : > { %5980 = vmatmul.msk.f32.gmra.mxu1 %vm364_vm0, %v7585_v36  ;;  %v717_v27 = vpop.f32.mrf.mxu2 }
 0x17d   : > { %v926_v42 = vpop.f32.mrf.mxu3 }
 0x17e   : > { %v7595_v48 = vadd.f32 %v926_v42, %v717_v27 }
 0x180   : > { %9712 = vst [vmem:[#allocation75_spill] sm:$0xff] %v7595_v48  ;;  %v7597_v5 = vpop.f32.mrf.mxu0 }
 0x181   : > { %v7599_v11 = vpop.f32.mrf.mxu1  ;;  %5884 = vmatmul.msk.f32.gmra.mxu2 %vm364_vm0, %v7553_v10 }
 0x182   : > { %5916 = vmatmul.msk.f32.gmra.mxu3 %vm364_vm0, %v7369_v12  ;;  %v2091_v12 = vld [vmem:[#allocation7 + $0xc8] sm:$0xff] }
 0x183   : > { %5949 = vmatmul.msk.f32.gmra.mxu0 %vm364_vm0, %v7383_v53  ;;  %v2369_v53 = vld [vmem:[#allocation7 + $0xe8] sm:$0xff]  ;;  %2204 = vmatpush.msra.mxu2 %v2091_v12 }
 0x184   : > { %5981 = vmatmul.msk.f32.gmra.mxu1 %vm364_vm0, %v7601_v46  ;;  %v720_v19 = vpop.f32.mrf.mxu2  ;;  %2482 = vmatpush.msra.mxu3 %v2369_v53 }
 0x185   : > { %v929_v25 = vpop.f32.mrf.mxu3 }
 0x186   : > { %v7611_v27 = vadd.f32 %v929_v25, %v720_v19 }
 0x188   : > { %9714 = vst [vmem:[#allocation77_spill] sm:$0xff] %v7611_v27  ;;  %v7613_v42 = vpop.f32.mrf.mxu0 }
 0x189   : > { %v7615_v48 = vpop.f32.mrf.mxu1  ;;  %5885 = vmatmul.msk.f32.gmra.mxu2 %vm364_vm0, %v7569_v34 }
 0x18a   : > { %5917 = vmatmul.msk.f32.gmra.mxu3 %vm364_vm0, %v7385_v47  ;;  %v2647_v47 = vld [vmem:[#allocation7 + $0x108] sm:$0xff] }
 0x18b   : > { %5950 = vmatmul.msk.f32.gmra.mxu0 %vm364_vm0, %v7399_v30  ;;  %v3154_v30 = vld [vmem:[#allocation9 + $0x38] sm:$0xff] }
 0x18c   : > { %5982 = vmatmul.msk.f32.gmra.mxu1 %vm364_vm0, %v7617_v59  ;;  %v723_v19 = vpop.f32.mrf.mxu2  ;;  %2760 = vmatpush.msra.mxu0 %v2647_v47 }
 0x18d   : > { %v932_v25 = vpop.f32.mrf.mxu3  ;;  %3263 = vmatpush.msra.mxu1 %v3154_v30 }
 0x18e   : > { %v7627_v27 = vadd.f32 %v932_v25, %v723_v19 }
 0x190   : > { %9716 = vst [vmem:[#allocation79_spill] sm:$0xff] %v7627_v27  ;;  %v7629_v10 = vpop.f32.mrf.mxu0  ;;  %v7647_v27 = vld [vmem:[#allocation2 + $0xca] sm:$0xff] }
 0x191   : > { %v7631_v34 = vpop.f32.mrf.mxu1  ;;  %5886 = vmatmul.msk.f32.gmra.mxu2 %vm364_vm0, %v7585_v36  ;;  %9719 = vst [vmem:[#allocation82_spill] sm:$0xff] %v7647_v27  ;;  %v7685_v36 = vld [vmem:[#allocation2 + $0xf2] sm:$0xff] }
 0x192   : > { %5918 = vmatmul.msk.f32.gmra.mxu3 %vm364_vm0, %v7401_v28 }
 0x193   : > { %5951 = vmatmul.msk.f32.gmra.mxu0 %vm364_vm0, %v6971_v13 }
 0x194   : > { %5983 = vmatmul.msk.f32.gmra.mxu1 %vm364_vm0, %v7633_v29  ;;  %v726_v12 = vpop.f32.mrf.mxu2 }
 0x195   : > { %v935_v53 = vpop.f32.mrf.mxu3 }
 0x196   : > { %v7643_v19 = vadd.f32 %v935_v53, %v726_v12  ;;  %v7661_v53 = vld [vmem:[#allocation2 + $0xda] sm:$0xff] }
 0x198   : > { %9718 = vst [vmem:[#allocation81_spill] sm:$0xff] %v7643_v19  ;;  %v7645_v25 = vpop.f32.mrf.mxu0 }
 0x199   : > { %5887 = vmatmul.msk.f32.gmra.mxu2 %vm364_vm0, %v7601_v46  ;;  %v7653_v13 = vpop.f32.mrf.mxu1 }
 0x19a   : > { %5919 = vmatmul.msk.f32.gmra.mxu3 %vm364_vm0, %v6973_v14 }
 0x19b   : > { %5952 = vmatmul.msk.f32.gmra.mxu0 %vm364_vm0, %v7086_v31 }
 0x19c   : > { %5984 = vmatmul.msk.f32.gmra.mxu1 %vm364_vm0, %v7647_v27  ;;  %v729_v28 = vpop.f32.mrf.mxu2 }
 0x19d   : > { %v938_v30 = vpop.f32.mrf.mxu3 }
 0x19e   : > { %v7659_v47 = vadd.f32 %v938_v30, %v729_v28 }
 0x1a0   : > { %9720 = vst [vmem:[#allocation83_spill] sm:$0xff] %v7659_v47  ;;  %v1650_v12 = vpop.f32.mrf.mxu0  ;;  %v7673_v47 = vld [vmem:[#allocation2 + $0xe2] sm:$0xff] }
 0x1a1   : > { %5888 = vmatmul.msk.f32.gmra.mxu2 %vm364_vm0, %v7617_v59  ;;  %v1928_v14 = vpop.f32.mrf.mxu1 }
 0x1a2   : > { %5920 = vmatmul.msk.f32.gmra.mxu3 %vm364_vm0, %v7088_v32  ;;  %v849_v32 = vadd.f32 %v7413_v33, %v7411_v41 }
 0x1a3   : > { %5953 = vmatmul.msk.f32.gmra.mxu0 %vm364_vm0, %v7113_v37 }
 0x1a4   : > { %5985 = vmatmul.msk.f32.gmra.mxu1 %vm364_vm0, %v7661_v53  ;;  %v732_v31 = vpop.f32.mrf.mxu2 }
 0x1a5   : > { %v941_v19 = vpop.f32.mrf.mxu3 }
 0x1a6   : > { %v7671_v28 = vadd.f32 %v941_v19, %v732_v31 }
 0x1a8   : > { %9721 = vst [vmem:[#allocation84_spill] sm:$0xff] %v7671_v28  ;;  %v1653_v30 = vpop.f32.mrf.mxu0 }
 0x1a9   : > { %5889 = vmatmul.msk.f32.gmra.mxu2 %vm364_vm0, %v7633_v29  ;;  %v1931_v37 = vpop.f32.mrf.mxu1  ;;  %v7699_v29 = vld [vmem:[#allocation2 + $0xfa] sm:$0xff] }
 0x1aa   : > { %5921 = vmatmul.msk.f32.gmra.mxu3 %vm364_vm0, %v7115_v38 }
 0x1ab   : > { %5954 = vmatmul.msk.f32.gmra.mxu0 %vm364_vm0, %v7139_v43  ;;  %v852_v43 = vadd.f32 %v7428_v23, %v7426_v20  ;;  %v855_v20 = vadd.f32 %v7442_v21, %v7440_v26  ;;  %v858_v21 = vadd.f32 %v7457_v62, %v7455_v4  ;;  %v861_v4 = vadd.f32 %v7472_v39, %v7470_v35  ;;  %v3153_v35 = vld [vmem:[#allocation9 + $0x30] sm:$0xff] }
 0x1ac   : > { %5986 = vmatmul.msk.f32.gmra.mxu1 %vm364_vm0, %v7673_v47  ;;  %v1094_v19 = vpop.f32.mrf.mxu2  ;;  %v864_v39 = vadd.f32 %v7487_v45, %v7485_v40  ;;  %v867_v40 = vadd.f32 %v7503_v24, %v7501_v51  ;;  %v870_v24 = vadd.f32 %v7519_v22, %v7517_v61  ;;  %v873_v61 = vadd.f32 %v7535_v52, %v7533_v2  ;;  %v9725_v52 = vld [vmem:[#allocation46_spill] sm:$0xff] }
 0x1ad   : > { %v1372_v31 = vpop.f32.mrf.mxu3  ;;  %v1190_v28 = vadd.f32 %v1094_v19, %v849_v32  ;;  %3264 = vmatpush.msra.mxu1 %v3153_v35 }
 0x1af   : > { %v1468_v59 = vadd.f32 %v1372_v31, %v1190_v28 }
 0x1b0   : > { %v1656_v46 = vpop.f32.mrf.mxu0 }
 0x1b1   : > { %5890 = vmatmul.msk.f32.gmra.mxu2 %vm364_vm0, %v7647_v27  ;;  %v1746_v38 = vadd.f32 %v1650_v12, %v1468_v59  ;;  %v1934_v19 = vpop.f32.mrf.mxu1 }
 0x1b2   : > { %5922 = vmatmul.msk.f32.gmra.mxu3 %vm364_vm0, %v7141_v44 }
 0x1b3   : > { %5955 = vmatmul.msk.f32.gmra.mxu0 %vm364_vm0, %v7165_v49  ;;  %v7697_v41 = vadd.f32 %v1928_v14, %v1746_v38 }
 0x1b4   : > { %5987 = vmatmul.msk.f32.gmra.mxu1 %vm364_vm0, %v7685_v36  ;;  %v1097_v33 = vpop.f32.mrf.mxu2 }
 0x1b5   : > { %v1375_v28 = vpop.f32.mrf.mxu3  ;;  %v1191_v32 = vadd.f32 %v1097_v33, %v852_v43  ;;  %v7713_v33 = vld [vmem:[#allocation2 + $0x10a] sm:$0xff] }
 0x1b7   : > { %v1469_v31 = vadd.f32 %v1375_v28, %v1191_v32 }
 0x1b8   : > { %v1659_v27 = vpop.f32.mrf.mxu0 }
 0x1b9   : > { %5891 = vmatmul.msk.f32.gmra.mxu2 %vm364_vm0, %v7661_v53  ;;  %v1747_v44 = vadd.f32 %v1653_v30, %v1469_v31  ;;  %v1937_v43 = vpop.f32.mrf.mxu1  ;;  %v7727_v31 = vld [vmem:[#allocation2 + $0x112] sm:$0xff] }
 0x1ba   : > { %5923 = vmatmul.msk.f32.gmra.mxu3 %vm364_vm0, %v7167_v50 }
 0x1bb   : > { %5956 = vmatmul.msk.f32.gmra.mxu0 %vm364_vm0, %v7191_v57  ;;  %v7711_v49 = vadd.f32 %v1931_v37, %v1747_v44 }
 0x1bc   : > { %5988 = vmatmul.msk.f32.gmra.mxu1 %vm364_vm0, %v7699_v29  ;;  %v1100_v23 = vpop.f32.mrf.mxu2 }
 0x1bd   : > { %v1378_v59 = vpop.f32.mrf.mxu3  ;;  %v1192_v12 = vadd.f32 %v1100_v23, %v855_v20 }
 0x1bf   : > { %v1470_v14 = vadd.f32 %v1378_v59, %v1192_v12  ;;  %v7741_v59 = vld [vmem:[#allocation2 + $0x122] sm:$0xff] }
 0x1c0   : > { %v1662_v38 = vpop.f32.mrf.mxu0 }
 0x1c1   : > { %5892 = vmatmul.msk.f32.gmra.mxu2 %vm364_vm0, %v7673_v47  ;;  %v1748_v50 = vadd.f32 %v1656_v46, %v1470_v14  ;;  %v2090_v46 = vld [vmem:[#allocation7 + $0xc0] sm:$0xff] }
 0x1c2   : > { %5924 = vmatmul.msk.f32.gmra.mxu3 %vm364_vm0, %v7193_v58  ;;  %2205 = vmatpush.msra.mxu2 %v2090_v46 }
 0x1c3   : > { %5957 = vmatmul.msk.f32.gmra.mxu0 %vm364_vm0, %v7217_v0  ;;  %v7725_v26 = vadd.f32 %v1934_v19, %v1748_v50  ;;  %v1940_v0 = vpop.f32.mrf.mxu1  ;;  %v2368_v19 = vld [vmem:[#allocation7 + $0xe0] sm:$0xff] }
 0x1c4   : > { %5989 = vmatmul.msk.f32.gmra.mxu1 %vm364_vm0, %v7713_v33  ;;  %v1103_v57 = vpop.f32.mrf.mxu2  ;;  %2483 = vmatpush.msra.mxu3 %v2368_v19  ;;  %v7769_v19 = vld [vmem:[#allocation2 + $0x13a] sm:$0xff] }
 0x1c5   : > { %v1381_v30 = vpop.f32.mrf.mxu3  ;;  %v1193_v37 = vadd.f32 %v1103_v57, %v858_v21 }
 0x1c7   : > { %v1471_v28 = vadd.f32 %v1381_v30, %v1193_v37  ;;  %v7755_v30 = vld [vmem:[#allocation2 + $0x12a] sm:$0xff] }
 0x1c8   : > { %v1665_v32 = vpop.f32.mrf.mxu0 }
 0x1c9   : > { %5893 = vmatmul.msk.f32.gmra.mxu2 %vm364_vm0, %v7685_v36  ;;  %v1749_v58 = vadd.f32 %v1659_v27, %v1471_v28 }
 0x1ca   : > { %5925 = vmatmul.msk.f32.gmra.mxu3 %vm364_vm0, %v7219_v1 }
 0x1cb   : > { %5958 = vmatmul.msk.f32.gmra.mxu0 %vm364_vm0, %v7243_v6  ;;  %v7739_v62 = vadd.f32 %v1937_v43, %v1749_v58  ;;  %v1943_v14 = vpop.f32.mrf.mxu1  ;;  %v2646_v43 = vld [vmem:[#allocation7 + $0x100] sm:$0xff] }
 0x1cc   : > { %5990 = vmatmul.msk.f32.gmra.mxu1 %vm364_vm0, %v7727_v31  ;;  %v1106_v44 = vpop.f32.mrf.mxu2  ;;  %2761 = vmatpush.msra.mxu0 %v2646_v43 }
 0x1cd   : > { %v1384_v20 = vpop.f32.mrf.mxu3  ;;  %v1194_v1 = vadd.f32 %v1106_v44, %v861_v4 }
 0x1cf   : > { %v1472_v27 = vadd.f32 %v1384_v20, %v1194_v1 }
 0x1d0   : > { %v1668_v23 = vpop.f32.mrf.mxu0 }
 0x1d1   : > { %5894 = vmatmul.msk.f32.gmra.mxu2 %vm364_vm0, %v7699_v29  ;;  %v1750_v6 = vadd.f32 %v1662_v38, %v1472_v27  ;;  %v7783_v27 = vld [vmem:[#allocation2 + $0x142] sm:$0xff] }
 0x1d2   : > { %5926 = vmatmul.msk.f32.gmra.mxu3 %vm364_vm0, %v7245_v7 }
 0x1d3   : > { %5959 = vmatmul.msk.f32.gmra.mxu0 %vm364_vm0, %v7269_v15  ;;  %v7753_v12 = vadd.f32 %v1940_v0, %v1750_v6  ;;  %v1946_v0 = vpop.f32.mrf.mxu1 }
 0x1d4   : > { %5991 = vmatmul.msk.f32.gmra.mxu1 %vm364_vm0, %v7741_v59  ;;  %v1109_v50 = vpop.f32.mrf.mxu2 }
 0x1d5   : > { %v1387_v21 = vpop.f32.mrf.mxu3  ;;  %v1195_v7 = vadd.f32 %v1109_v50, %v864_v39  ;;  %v7797_v50 = vld [vmem:[#allocation2 + $0x152] sm:$0xff] }
 0x1d7   : > { %v1473_v38 = vadd.f32 %v1387_v21, %v1195_v7  ;;  %v9724_v21 = vld [vmem:[#allocation45_spill] sm:$0xff]  ;;  %v876_v7 = vadd.f32 %v7551_v60, %v7549_v8  ;;  %v9728_v60 = vld [vmem:[#allocation48_spill] sm:$0xff]  ;;  %v879_v8 = vadd.f32 %v7567_v3, %v7565_v17  ;;  %v882_v3 = vadd.f32 %v7583_v9, %v7581_v18 }
 0x1d8   : > { %v1671_v57 = vpop.f32.mrf.mxu0  ;;  %v885_v9 = vadd.f32 %v7599_v11, %v7597_v5  ;;  %v888_v11 = vadd.f32 %v7615_v48, %v7613_v42  ;;  %v891_v48 = vadd.f32 %v7631_v34, %v7629_v10  ;;  %v894_v10 = vadd.f32 %v7653_v13, %v7645_v25 }
 0x1d9   : > { %5895 = vmatmul.msk.f32.gmra.mxu2 %vm364_vm0, %v7713_v33  ;;  %v1751_v15 = vadd.f32 %v1665_v32, %v1473_v38 }
 0x1da   : > { %5927 = vmatmul.msk.f32.gmra.mxu3 %vm364_vm0, %v7271_v16 }
 0x1db   : > { %5960 = vmatmul.msk.f32.gmra.mxu0 %vm364_vm0, %v7295_v56  ;;  %v7767_v45 = vadd.f32 %v1943_v14, %v1751_v15 }
 0x1dc   : > { %5992 = vmatmul.msk.f32.gmra.mxu1 %vm364_vm0, %v7755_v30  ;;  %v1112_v37 = vpop.f32.mrf.mxu2 }
 0x1dd   : > { %v1390_v28 = vpop.f32.mrf.mxu3  ;;  %v1196_v58 = vadd.f32 %v1112_v37, %v867_v40 }
 0x1df   : > { %v1474_v46 = vadd.f32 %v1390_v28, %v1196_v58  ;;  %v7816_v28 = vld [vmem:[#allocation2 + $0x15a] sm:$0xff] }
 0x1e0   : > { %v1674_v4 = vpop.f32.mrf.mxu0  ;;  %v7819_v58 = vld [vmem:[%s6799_s13 + $0xf8] sm:$0xff] }
 0x1e1   : > { %5896 = vmatmul.msk.f32.gmra.mxu2 %vm364_vm0, %v7727_v31  ;;  %v1752_v16 = vadd.f32 %v1668_v23, %v1474_v46  ;;  %v9722_v23 = vld [vmem:[#allocation44_spill] sm:$0xff]  ;;  %9726 = vst [vmem:[#allocation45_spill] sm:$0xff] %v7819_v58 }
 0x1e2   : > { %5928 = vmatmul.msk.f32.gmra.mxu3 %vm364_vm0, %v7297_v63  ;;  %v1949_v63 = vpop.f32.mrf.mxu1  ;;  %452 = vst.msk [vmem:[#allocation2 + $0x189] sm:$0xff] %vm364_vm0, %v7819_v58 }
 0x1e3   : > { %5961 = vmatmul.msk.f32.gmra.mxu0 %vm364_vm0, %v7321_v55  ;;  %v7781_v56 = vadd.f32 %v1946_v0, %v1752_v16  ;;  %v9727_v0 = vld [vmem:[#allocation47_spill] sm:$0xff] }
 0x1e4   : > { %5993 = vmatmul.msk.f32.gmra.mxu1 %vm364_vm0, %v7769_v19  ;;  %v1115_v51 = vpop.f32.mrf.mxu2 }
 0x1e5   : > { %v1393_v32 = vpop.f32.mrf.mxu3  ;;  %v1197_v44 = vadd.f32 %v1115_v51, %v870_v24 }
 0x1e7   : > { %v1475_v20 = vadd.f32 %v1393_v32, %v1197_v44  ;;  %v7835_v44 = vld [vmem:[#allocation2 + $0x16a] sm:$0xff] }
 0x1e8   : > { %v1677_v1 = vpop.f32.mrf.mxu0 }
 0x1e9   : > { %5897 = vmatmul.msk.f32.gmra.mxu2 %vm364_vm0, %v7741_v59  ;;  %v1753_v55 = vadd.f32 %v1671_v57, %v1475_v20  ;;  %v9729_v20 = vld [vmem:[#allocation49_spill] sm:$0xff] }
 0x1ea   : > { %5929 = vmatmul.msk.f32.gmra.mxu3 %vm364_vm0, %v7323_v54  ;;  %v7800_v54 = vld [vmem:[%s6799_s13 + $0xf0] sm:$0xff]  ;;  %s9208_s13 = scalar_lea.vmem [#allocation10], %s5805_s1  ;;  %s6391_s1 = sshll.u32 %s6709_s28, 8 }
 0x1eb   : > { %5962 = vmatmul.msk.f32.gmra.mxu0 %vm364_vm0, %v9722_v23  ;;  %v7795_v22 = vadd.f32 %v1949_v63, %v1753_v55  ;;  %9723 = vst [vmem:[#allocation44_spill] sm:$0xff] %v7800_v54  ;;  %v9730_v63 = vld [vmem:[#allocation50_spill] sm:$0xff]  ;;  %s5700_s18 = scalar_lea.hbm %s9543_s7, %s6391_s1  ;;  %s5701_s21 = sshll.u32 %s9208_s13, 4  ;;  %s5702_s21 = int_to_ptr.vmem [resolvable:$true] %s5701_s21 }
 0x1ec   : > { %5994 = vmatmul.msk.f32.gmra.mxu1 %vm364_vm0, %v7783_v27  ;;  %v1118_v6 = vpop.f32.mrf.mxu2  ;;  %451 = vst.msk [vmem:[#allocation2 + $0x181] sm:$0xff] %vm364_vm0, %v7800_v54  ;;  %s5703_s29 = sshll.u32 %s5700_s18, 4  ;;  %s5689_s28 = scalar_lea.sflag [#allocation6], %s6793_s14  ;;  %s5704_s29 = int_to_ptr.hbm [resolvable:$true] %s5703_s29 }
 0x1ed   : > { %v1396_v35 = vpop.f32.mrf.mxu3  ;;  %v1198_v39 = vadd.f32 %v1118_v6, %v873_v61  ;;  %s6583_s23 = sshra.s32 %s5704_s29, 4  ;;  %s6584_s23 = int_to_ptr.hbm [resolvable:$true] %s6583_s23 }
 0x1ee   : > { %s6585_s15 = scalar_lea.hbm %s6584_s23, 256  ;;  %p6590_p11 = scmp.lt.s32.totalorder %s6584_s23, %s9543_s7 }
 0x1ef   : > { %v1476_v14 = vadd.f32 %v1396_v35, %v1198_v39  ;;  %v7849_v35 = vld [vmem:[#allocation2 + $0x172] sm:$0xff]  ;;  %v9731_v39 = vld [vmem:[#allocation51_spill] sm:$0xff]  ;;  %p6586_p1 = scmp.ne.s32.totalorder %s6584_s23, %s6585_s15  ;;  %p6591_p2 = scmp.lt.s32.totalorder %s6589_s11, %s6585_s15 }
 0x1f0   : > { %v1680_v43 = vpop.f32.mrf.mxu0 }
 0x1f1   : > { %5898 = vmatmul.msk.f32.gmra.mxu2 %vm364_vm0, %v7755_v30  ;;  %v7808_v2 = vadd.f32 %v1674_v4, %v1476_v14  ;;  %p6587_p4 = pnand %p6586_p1, %p6760_p3  ;;  %p6592_p9 = por %p6591_p2, %p6590_p11 }
 0x1f2   : > { %5930 = vmatmul.msk.f32.gmra.mxu3 %vm364_vm0, %v9724_v21 }
 0x1f3   : > { %5963 = vmatmul.msk.f32.gmra.mxu0 %vm364_vm0, %v9725_v52  ;;  %p6588_p8 = pneg %p6587_p4 }
 0x1f4   : > { %5995 = vmatmul.msk.f32.gmra.mxu1 %vm364_vm0, %v7797_v50  ;;  %v1121_v38 = vpop.f32.mrf.mxu2 }
 0x1f5   : > { %v1399_v57 = vpop.f32.mrf.mxu3  ;;  %v1199_v15 = vadd.f32 %v1121_v38, %v876_v7  ;;  %p6593_p10 = pnand %p6592_p9, %p6588_p8 }
 0x1f7   : > { %v1477_v40 = vadd.f32 %v1399_v57, %v1199_v15  ;;  %v7863_v57 = vld [vmem:[#allocation2 + $0x181] sm:$0xff] }
 0x1f8   : > { %v1683_v37 = vpop.f32.mrf.mxu0  ;;  %v7865_v15 = vld [vmem:[#allocation2 + $0x182] sm:$0xff] }
 0x1f9   : > { %5899 = vmatmul.msk.f32.gmra.mxu2 %vm364_vm0, %v7769_v19  ;;  %v7827_v46 = vadd.f32 %v1677_v1, %v1477_v40  ;;  %v9733_v40 = vld [vmem:[#allocation53_spill] sm:$0xff] }
 0x1fa   : > { %5931 = vmatmul.msk.f32.gmra.mxu3 %vm364_vm0, %v9727_v0  ;;  %v3152_v0 = vld [vmem:[#allocation9 + $0x28] sm:$0xff] }
 0x1fb   : > { %5964 = vmatmul.msk.f32.gmra.mxu0 %vm364_vm0, %v9728_v60  ;;  %3265 = vmatpush.msra.mxu1 %v3152_v0  ;;  %v9737_v0 = vld [vmem:[#allocation55_spill] sm:$0xff] }
 0x1fc   : > { %5996 = vmatmul.msk.f32.gmra.mxu1 %vm364_vm0, %v7816_v28  ;;  %v1124_v4 = vpop.f32.mrf.mxu2 }
 0x1fd   : > { %v1402_v16 = vpop.f32.mrf.mxu3  ;;  %v1200_v24 = vadd.f32 %v1124_v4, %v879_v8  ;;  %v7879_v4 = vld [vmem:[#allocation2 + $0x180] sm:$0xff] }
 0x1ff   : > { %v1478_v51 = vadd.f32 %v1402_v16, %v1200_v24 }
 0x200   : > { %v1686_v32 = vpop.f32.mrf.mxu0 }
 0x201   : > { %5900 = vmatmul.msk.f32.gmra.mxu2 %vm364_vm0, %v7783_v27  ;;  %v7841_v1 = vadd.f32 %v1680_v43, %v1478_v51  ;;  %v9732_v43 = vld [vmem:[#allocation52_spill] sm:$0xff] }
 0x202   : > { %5932 = vmatmul.msk.f32.gmra.mxu3 %vm364_vm0, %v9729_v20  ;;  %v7881_v51 = vld [vmem:[#allocation2 + $0x189] sm:$0xff] }
 0x203   : > { %5965 = vmatmul.msk.f32.gmra.mxu0 %vm364_vm0, %v9730_v63 }
 0x204   : > { %5997 = vmatmul.msk.f32.gmra.mxu1 %vm364_vm0, %v7835_v44  ;;  %v1127_v17 = vpop.f32.mrf.mxu2 }
 0x205   : > { %v1405_v55 = vpop.f32.mrf.mxu3  ;;  %v1201_v23 = vadd.f32 %v1127_v17, %v882_v3  ;;  %v7897_v17 = vld [vmem:[#allocation2 + $0x188] sm:$0xff] }
 0x207   : > { %v1479_v61 = vadd.f32 %v1405_v55, %v1201_v23 }
 0x208   : > { %v1689_v6 = vpop.f32.mrf.mxu0 }
 0x209   : > { %5901 = vmatmul.msk.f32.gmra.mxu2 %vm364_vm0, %v7797_v50  ;;  %v7855_v14 = vadd.f32 %v1683_v37, %v1479_v61 }
 0x20a   : > { %5933 = vmatmul.msk.f32.gmra.mxu3 %vm364_vm0, %v9731_v39 }
 0x20b   : > { %5966 = vmatmul.msk.f32.gmra.mxu0 %vm364_vm0, %v9732_v43 }
 0x20c   : > { %5998 = vmatmul.msk.f32.gmra.mxu1 %vm364_vm0, %v7849_v35  ;;  %v1130_v18 = vpop.f32.mrf.mxu2 }
 0x20d   : > { %v1408_v21 = vpop.f32.mrf.mxu3  ;;  %v1202_v52 = vadd.f32 %v1130_v18, %v885_v9  ;;  %v2057_v9 = vld [vmem:[#allocation2 + $0x30] sm:$0xff] }
 0x20e   : > { %v2335_v18 = vld [vmem:[#allocation2 + $0x31] sm:$0xff] }
 0x20f   : > { %v1480_v7 = vadd.f32 %v1408_v21, %v1202_v52 }
 0x210   : > { %v1692_v38 = vpop.f32.mrf.mxu0 }
 0x211   : > { %5902 = vmatmul.msk.f32.gmra.mxu2 %vm364_vm0, %v7816_v28  ;;  %v7871_v37 = vadd.f32 %v1686_v32, %v1480_v7  ;;  %v7883_v32 = vld [vmem:[#allocation2 + $0x18a] sm:$0xff] }
 0x212   : > { %5934 = vmatmul.msk.f32.gmra.mxu3 %vm364_vm0, %v9733_v40  ;;  %v9736_v40 = vld [vmem:[#allocation54_spill] sm:$0xff] }
 0x213   : > { %5967 = vmatmul.msk.f32.gmra.mxu0 %vm364_vm0, %v7863_v57 }
 0x214   : > { %5999 = vmatmul.msk.f32.gmra.mxu1 %vm364_vm0, %v7865_v15  ;;  %v1133_v5 = vpop.f32.mrf.mxu2 }
 0x215   : > { %v1411_v60 = vpop.f32.mrf.mxu3  ;;  %v1203_v8 = vadd.f32 %v1133_v5, %v888_v11  ;;  %v897_v11 = vadd.f32 %v9737_v0, %v9736_v40  ;;  %v9741_v40 = vld [vmem:[#allocation59_spill] sm:$0xff] }
 0x217   : > { %v1481_v16 = vadd.f32 %v1411_v60, %v1203_v8  ;;  %v2058_v60 = vld [vmem:[#allocation2 + $0x38] sm:$0xff] }
 0x218   : > { %v1695_v24 = vpop.f32.mrf.mxu0  ;;  %v2336_v8 = vld [vmem:[#allocation2 + $0x39] sm:$0xff] }
 0x219   : > { %5903 = vmatmul.msk.f32.gmra.mxu2 %vm364_vm0, %v7835_v44  ;;  %v7889_v20 = vadd.f32 %v1689_v6, %v1481_v16  ;;  %v9734_v6 = vld [vmem:[#allocation56_spill] sm:$0xff] }
 0x21a   : > { %5935 = vmatmul.msk.f32.gmra.mxu3 %vm364_vm0, %v7879_v4 }
 0x21b   : > { %5968 = vmatmul.msk.f32.gmra.mxu0 %vm364_vm0, %v7881_v51 }
 0x21c   : > { %6000 = vmatmul.msk.f32.gmra.mxu1 %vm364_vm0, %v7883_v32  ;;  %v1136_v42 = vpop.f32.mrf.mxu2 }
 0x21d   : > { %v1414_v63 = vpop.f32.mrf.mxu3  ;;  %v1204_v3 = vadd.f32 %v1136_v42, %v891_v48 }
 0x21f   : > { %v1482_v55 = vadd.f32 %v1414_v63, %v1204_v3 }
 0x220   : > { %v1698_v23 = vpop.f32.mrf.mxu0 }
 0x221   : > { %5904 = vmatmul.msk.f32.gmra.mxu2 %vm364_vm0, %v7849_v35  ;;  %v7903_v61 = vadd.f32 %v1692_v38, %v1482_v55  ;;  %v9735_v38 = vld [vmem:[#allocation58_spill] sm:$0xff]  ;;  %v9739_v55 = vld [vmem:[#allocation57_spill] sm:$0xff] }
 0x222   : > { %5936 = vmatmul.msk.f32.gmra.mxu3 %vm364_vm0, %v7897_v17 }
 0x223   : > { %6065 = vmatmul.msk.f32.vlgmr.msra.gmra.mxu0 %vm364_vm0, %v9734_v6 }
 0x224   : > { %v1139_v34 = vpop.f32.mrf.mxu2 }
 0x225   : > { %v1417_v39 = vpop.f32.mrf.mxu3  ;;  %v1205_v43 = vadd.f32 %v1139_v34, %v894_v10  ;;  %v2059_v10 = vld [vmem:[#allocation2 + $0x48] sm:$0xff] }
 0x226   : > { %v2337_v34 = vld [vmem:[#allocation2 + $0x49] sm:$0xff] }
 0x227   : > { %v1483_v21 = vadd.f32 %v1417_v39, %v1205_v43 }
 0x228   : > { %v1701_v52 = vpop.f32.mrf.mxu0 }
 0x229   : > { %6001 = vmatmul.msk.f32.vlgmr.msra.gmra.mxu2 %vm364_vm0, %v2057_v9  ;;  %v7911_v7 = vadd.f32 %v1695_v24, %v1483_v21  ;;  %v9738_v24 = vld [vmem:[#allocation60_spill] sm:$0xff] }
 0x22a   : > { %6033 = vmatmul.msk.f32.vlgmr.msra.gmra.mxu3 %vm364_vm0, %v2335_v18  ;;  %v9740_v18 = vld [vmem:[#allocation62_spill] sm:$0xff] }
 0x22b   : > { %6066 = vmatmul.msk.f32.gmra.mxu0 %vm364_vm0, %v9735_v38  ;;  %v7930_v38 = vpop.f32.mrf.mxu1 }
 0x22c   : > { %v1142_v25 = vpop.f32.mrf.mxu2 }
 0x22d   : > { %v1420_v13 = vpop.f32.mrf.mxu3  ;;  %v1206_v5 = vadd.f32 %v1142_v25, %v897_v11  ;;  %v2060_v11 = vld [vmem:[#allocation2 + $0x50] sm:$0xff] }
 0x22e   : > { %v2338_v25 = vld [vmem:[#allocation2 + $0x51] sm:$0xff] }
 0x22f   : > { %v1484_v16 = vadd.f32 %v1420_v13, %v1206_v5 }
 0x230   : > { %v1704_v48 = vpop.f32.mrf.mxu0 }
 0x231   : > { %6002 = vmatmul.msk.f32.gmra.mxu2 %vm364_vm0, %v2058_v60  ;;  %v7919_v42 = vadd.f32 %v1698_v23, %v1484_v16 }
 0x232   : > { %6034 = vmatmul.msk.f32.gmra.mxu3 %vm364_vm0, %v2336_v8 }
 0x233   : > { %6067 = vmatmul.msk.f32.gmra.mxu0 %vm364_vm0, %v9738_v24  ;;  %v9744_v24 = vld [vmem:[#allocation61_spill] sm:$0xff] }
 0x234   : > { %v1145_v63 = vpop.f32.mrf.mxu2 }
 0x235   : > { %v1423_v3 = vpop.f32.mrf.mxu3  ;;  %v1207_v6 = vadd.f32 %v1145_v63, %v9739_v55  ;;  %v2339_v55 = vld [vmem:[#allocation2 + $0x61] sm:$0xff] }
 0x237   : > { %v1485_v39 = vadd.f32 %v1423_v3, %v1207_v6  ;;  %v2061_v3 = vld [vmem:[#allocation2 + $0x60] sm:$0xff]  ;;  %v7940_v6 = vpop.f32.mrf.mxu1 }
 0x238   : > { %v1707_v43 = vpop.f32.mrf.mxu0 }
 0x239   : > { %6003 = vmatmul.msk.f32.gmra.mxu2 %vm364_vm0, %v2059_v10  ;;  %v7926_v9 = vadd.f32 %v1701_v52, %v1485_v39  ;;  %v9743_v52 = vld [vmem:[#allocation64_spill] sm:$0xff] }
 0x23a   : > { %6035 = vmatmul.msk.f32.gmra.mxu3 %vm364_vm0, %v2337_v34 }
 0x23b   : > { %6068 = vmatmul.msk.f32.gmra.mxu0 %vm364_vm0, %v9740_v18 }
 0x23c   : > { %v1148_v23 = vpop.f32.mrf.mxu2 }
 0x23d   : > { %v1426_v21 = vpop.f32.mrf.mxu3  ;;  %v1208_v0 = vadd.f32 %v1148_v23, %v9741_v40 }
 0x23f   : > { %v1486_v13 = vadd.f32 %v1426_v21, %v1208_v0  ;;  %v9747_v21 = vld [vmem:[#allocation63_spill] sm:$0xff] }
 0x240   : > { %v1710_v5 = vpop.f32.mrf.mxu0  ;;  %v2062_v0 = vld [vmem:[#allocation2 + $0x68] sm:$0xff] }
 0x241   : > { %6004 = vmatmul.msk.f32.gmra.mxu2 %vm364_vm0, %v2060_v11  ;;  %v7935_v60 = vadd.f32 %v1704_v48, %v1486_v13  ;;  %v9746_v48 = vld [vmem:[#allocation66_spill] sm:$0xff]  ;;  %v2340_v11 = vld [vmem:[#allocation2 + $0x69] sm:$0xff] }
 0x242   : > { %6036 = vmatmul.msk.f32.gmra.mxu3 %vm364_vm0, %v2338_v25 }
 0x243   : > { %9742 = vst [vmem:[#allocation46_spill] sm:$0xff] %v7935_v60  ;;  %6069 = vmatmul.msk.f32.gmra.mxu0 %vm364_vm0, %v9743_v52  ;;  %v7949_v52 = vpop.f32.mrf.mxu1  ;;  %v3609_v60 = vld [vmem:[#allocation9 + $0x58] sm:$0xff] }
 0x244   : > { %v1151_v8 = vpop.f32.mrf.mxu2  ;;  %3718 = vmatpush.msrb.mxu3 %v3609_v60  ;;  %v3118_v60 = vld [vmem:[#allocation3 + $0x1] sm:$0xff] }
 0x245   : > { %v1429_v16 = vpop.f32.mrf.mxu3  ;;  %v1209_v63 = vadd.f32 %v1151_v8, %v9744_v24 }
 0x247   : > { %v1487_v10 = vadd.f32 %v1429_v16, %v1209_v63  ;;  %v9749_v16 = vld [vmem:[#allocation68_spill] sm:$0xff] }
 0x248   : > { %v1713_v34 = vpop.f32.mrf.mxu0 }
 0x249   : > { %6005 = vmatmul.msk.f32.gmra.mxu2 %vm364_vm0, %v2061_v3  ;;  %v7944_v39 = vadd.f32 %v1707_v43, %v1487_v10  ;;  %v3151_v43 = vld [vmem:[#allocation9 + $0x20] sm:$0xff]  ;;  %v9750_v3 = vld [vmem:[#allocation65_spill] sm:$0xff] }
 0x24a   : > { %6037 = vmatmul.msk.f32.gmra.mxu3 %vm364_vm0, %v2339_v55  ;;  %3266 = vmatpush.msra.mxu1 %v3151_v43  ;;  %v2063_v10 = vld [vmem:[#allocation2 + $0x78] sm:$0xff] }
 0x24b   : > { %9745 = vst [vmem:[#allocation47_spill] sm:$0xff] %v7944_v39  ;;  %6070 = vmatmul.msk.f32.gmra.mxu0 %vm364_vm0, %v9746_v48  ;;  %v2341_v48 = vld [vmem:[#allocation2 + $0x79] sm:$0xff]  ;;  %6097 = vmatmul.msk.f32.vlgmr.msra.gmra.mxu1 %vm364_vm0, %v3118_v60 }
 0x24c   : > { %v1154_v18 = vpop.f32.mrf.mxu2 }
 0x24d   : > { %v1432_v23 = vpop.f32.mrf.mxu3  ;;  %v1210_v40 = vadd.f32 %v1154_v18, %v9747_v21 }
 0x24f   : > { %v1488_v25 = vadd.f32 %v1432_v23, %v1210_v40  ;;  %v7964_v40 = vpop.f32.mrf.mxu1 }
 0x250   : > { %v1716_v13 = vpop.f32.mrf.mxu0 }
 0x251   : > { %6006 = vmatmul.msk.f32.gmra.mxu2 %vm364_vm0, %v2062_v0  ;;  %v7953_v8 = vadd.f32 %v1710_v5, %v1488_v25  ;;  %v9752_v5 = vld [vmem:[#allocation70_spill] sm:$0xff]  ;;  %v9753_v25 = vld [vmem:[#allocation67_spill] sm:$0xff] }
 0x252   : > { %6038 = vmatmul.msk.f32.gmra.mxu3 %vm364_vm0, %v2340_v11 }
 0x253   : > { %9748 = vst [vmem:[#allocation48_spill] sm:$0xff] %v7953_v8  ;;  %6071 = vmatmul.msk.f32.gmra.mxu0 %vm364_vm0, %v9749_v16  ;;  %v2064_v16 = vld [vmem:[#allocation2 + $0x80] sm:$0xff] }
 0x254   : > { %v1157_v24 = vpop.f32.mrf.mxu2 }
 0x255   : > { %v1435_v63 = vpop.f32.mrf.mxu3  ;;  %v1211_v55 = vadd.f32 %v1157_v24, %v9750_v3  ;;  %v2342_v24 = vld [vmem:[#allocation2 + $0x81] sm:$0xff] }
 0x257   : > { %v1489_v18 = vadd.f32 %v1435_v63, %v1211_v55 }
 0x258   : > { %v1719_v23 = vpop.f32.mrf.mxu0 }
 0x259   : > { %6007 = vmatmul.msk.f32.gmra.mxu2 %vm364_vm0, %v2063_v10  ;;  %v7960_v21 = vadd.f32 %v1713_v34, %v1489_v18  ;;  %v9755_v34 = vld [vmem:[#allocation72_spill] sm:$0xff]  ;;  %v7973_v18 = vpop.f32.mrf.mxu1 }
 0x25a   : > { %6039 = vmatmul.msk.f32.gmra.mxu3 %vm364_vm0, %v2341_v48 }
 0x25b   : > { %9751 = vst [vmem:[#allocation49_spill] sm:$0xff] %v7960_v21  ;;  %6072 = vmatmul.msk.f32.gmra.mxu0 %vm364_vm0, %v9752_v5  ;;  %v9756_v5 = vld [vmem:[#allocation69_spill] sm:$0xff] }
 0x25c   : > { %v1160_v0 = vpop.f32.mrf.mxu2  ;;  %v2344_v21 = vld [vmem:[#allocation2 + $0x99] sm:$0xff] }
 0x25d   : > { %v1438_v11 = vpop.f32.mrf.mxu3  ;;  %v1212_v43 = vadd.f32 %v1160_v0, %v9753_v25  ;;  %v2065_v0 = vld [vmem:[#allocation2 + $0x90] sm:$0xff] }
 0x25e   : > { %v2343_v25 = vld [vmem:[#allocation2 + $0x91] sm:$0xff] }
 0x25f   : > { %v1490_v3 = vadd.f32 %v1438_v11, %v1212_v43 }
 0x260   : > { %v1722_v63 = vpop.f32.mrf.mxu0 }
 0x261   : > { %6008 = vmatmul.msk.f32.gmra.mxu2 %vm364_vm0, %v2064_v16  ;;  %v7969_v55 = vadd.f32 %v1716_v13, %v1490_v3  ;;  %v9758_v13 = vld [vmem:[#allocation74_spill] sm:$0xff]  ;;  %v9759_v3 = vld [vmem:[#allocation71_spill] sm:$0xff] }
 0x262   : > { %6040 = vmatmul.msk.f32.gmra.mxu3 %vm364_vm0, %v2342_v24 }
 0x263   : > { %9754 = vst [vmem:[#allocation50_spill] sm:$0xff] %v7969_v55  ;;  %6073 = vmatmul.msk.f32.gmra.mxu0 %vm364_vm0, %v9755_v34  ;;  %v2066_v55 = vld [vmem:[#allocation2 + $0x98] sm:$0xff] }
 0x264   : > { %v1163_v10 = vpop.f32.mrf.mxu2 }
 0x265   : > { %v1441_v48 = vpop.f32.mrf.mxu3  ;;  %v1213_v58 = vadd.f32 %v1163_v10, %v9756_v5  ;;  %v7983_v10 = vpop.f32.mrf.mxu1 }
 0x267   : > { %v1491_v54 = vadd.f32 %v1441_v48, %v1213_v58 }
 0x268   : > { %v1725_v11 = vpop.f32.mrf.mxu0 }
 0x269   : > { %6009 = vmatmul.msk.f32.gmra.mxu2 %vm364_vm0, %v2065_v0  ;;  %v7978_v43 = vadd.f32 %v1719_v23, %v1491_v54  ;;  %v9761_v54 = vld [vmem:[#allocation76_spill] sm:$0xff] }
 0x26a   : > { %6041 = vmatmul.msk.f32.gmra.mxu3 %vm364_vm0, %v2343_v25  ;;  %v9762_v25 = vld [vmem:[#allocation73_spill] sm:$0xff] }
 0x26b   : > { %9757 = vst [vmem:[#allocation51_spill] sm:$0xff] %v7978_v43  ;;  %6074 = vmatmul.msk.f32.gmra.mxu0 %vm364_vm0, %v9758_v13 }
 0x26c   : > { %v1166_v16 = vpop.f32.mrf.mxu2 }
 0x26d   : > { %v1444_v24 = vpop.f32.mrf.mxu3  ;;  %v1214_v34 = vadd.f32 %v1166_v16, %v9759_v3  ;;  %v2067_v16 = vld [vmem:[#allocation2 + $0xa8] sm:$0xff]  ;;  %v7992_v39 = vpop.f32.mrf.mxu1 }
 0x26e   : > { %v2345_v3 = vld [vmem:[#allocation2 + $0xa9] sm:$0xff] }
 0x26f   : > { %v1492_v5 = vadd.f32 %v1444_v24, %v1214_v34  ;;  %v9765_v34 = vld [vmem:[#allocation75_spill] sm:$0xff] }
 0x270   : > { %v1728_v58 = vpop.f32.mrf.mxu0 }
 0x271   : > { %6010 = vmatmul.msk.f32.gmra.mxu2 %vm364_vm0, %v2066_v55  ;;  %v7987_v48 = vadd.f32 %v1722_v63, %v1492_v5  ;;  %v9764_v63 = vld [vmem:[#allocation78_spill] sm:$0xff] }
 0x272   : > { %6042 = vmatmul.msk.f32.gmra.mxu3 %vm364_vm0, %v2344_v21 }
 0x273   : > { %9760 = vst [vmem:[#allocation52_spill] sm:$0xff] %v7987_v48  ;;  %6075 = vmatmul.msk.f32.gmra.mxu0 %vm364_vm0, %v9761_v54  ;;  %v2068_v54 = vld [vmem:[#allocation2 + $0xb0] sm:$0xff] }
 0x274   : > { %v1169_v23 = vpop.f32.mrf.mxu2 }
 0x275   : > { %v1447_v0 = vpop.f32.mrf.mxu3  ;;  %v1215_v13 = vadd.f32 %v1169_v23, %v9762_v25  ;;  %v2346_v23 = vld [vmem:[#allocation2 + $0xb1] sm:$0xff] }
 0x277   : > { %v1493_v43 = vadd.f32 %v1447_v0, %v1215_v13 }
 0x278   : > { %v1731_v8 = vpop.f32.mrf.mxu0 }
 0x279   : > { %6011 = vmatmul.msk.f32.gmra.mxu2 %vm364_vm0, %v2067_v16  ;;  %v7996_v21 = vadd.f32 %v1725_v11, %v1493_v43  ;;  %v9767_v16 = vld [vmem:[#allocation80_spill] sm:$0xff]  ;;  %v8007_v11 = vpop.f32.mrf.mxu1 }
 0x27a   : > { %6043 = vmatmul.msk.f32.gmra.mxu3 %vm364_vm0, %v2345_v3 }
 0x27b   : > { %9763 = vst [vmem:[#allocation53_spill] sm:$0xff] %v7996_v21  ;;  %6076 = vmatmul.msk.f32.gmra.mxu0 %vm364_vm0, %v9764_v63  ;;  %v9768_v63 = vld [vmem:[#allocation77_spill] sm:$0xff] }
 0x27c   : > { %v1172_v55 = vpop.f32.mrf.mxu2 }
 0x27d   : > { %v1450_v24 = vpop.f32.mrf.mxu3  ;;  %v1216_v5 = vadd.f32 %v1172_v55, %v9765_v34  ;;  %v2069_v55 = vld [vmem:[#allocation2 + $0xc0] sm:$0xff] }
 0x27e   : > { %v2347_v34 = vld [vmem:[#allocation2 + $0xc1] sm:$0xff] }
 0x27f   : > { %v1494_v25 = vadd.f32 %v1450_v24, %v1216_v5  ;;  %v3117_v5 = vld [vmem:[#allocation9 + $0x18] sm:$0xff] }
 0x280   : > { %v1734_v0 = vpop.f32.mrf.mxu0  ;;  %3472 = vmatpush.msrb.mxu2 %v3117_v5 }
 0x281   : > { %6012 = vmatmul.msk.f32.gmra.mxu2 %vm364_vm0, %v2068_v54  ;;  %v8003_v13 = vadd.f32 %v1728_v58, %v1494_v25  ;;  %v9770_v54 = vld [vmem:[#allocation82_spill] sm:$0xff] }
 0x282   : > { %6044 = vmatmul.msk.f32.gmra.mxu3 %vm364_vm0, %v2346_v23 }
 0x283   : > { %9766 = vst [vmem:[#allocation56_spill] sm:$0xff] %v8003_v13  ;;  %6077 = vmatmul.msk.f32.gmra.mxu0 %vm364_vm0, %v9767_v16  ;;  %v8016_v16 = vpop.f32.mrf.mxu1 }
 0x284   : > { %v1175_v43 = vpop.f32.mrf.mxu2 }
 0x285   : > { %v1453_v3 = vpop.f32.mrf.mxu3  ;;  %v1217_v21 = vadd.f32 %v1175_v43, %v9768_v63  ;;  %v9771_v43 = vld [vmem:[#allocation79_spill] sm:$0xff] }
 0x286   : > { %v2348_v63 = vld [vmem:[#allocation2 + $0xc9] sm:$0xff] }
 0x287   : > { %v1495_v48 = vadd.f32 %v1453_v3, %v1217_v21  ;;  %v2070_v3 = vld [vmem:[#allocation2 + $0xc8] sm:$0xff] }
 0x288   : > { %v1737_v24 = vpop.f32.mrf.mxu0 }
 0x289   : > { %6013 = vmatmul.msk.f32.gmra.mxu2 %vm364_vm0, %v2069_v55  ;;  %v8012_v58 = vadd.f32 %v1731_v8, %v1495_v48 }
 0x28a   : > { %6045 = vmatmul.msk.f32.gmra.mxu3 %vm364_vm0, %v2347_v34  ;;  %v9773_v34 = vld [vmem:[#allocation81_spill] sm:$0xff] }
 0x28b   : > { %9769 = vst [vmem:[#allocation58_spill] sm:$0xff] %v8012_v58  ;;  %6078 = vmatmul.msk.f32.gmra.mxu0 %vm364_vm0, %v9770_v54 }
 0x28c   : > { %v1178_v23 = vpop.f32.mrf.mxu2 }
 0x28d   : > { %v1456_v25 = vpop.f32.mrf.mxu3  ;;  %v1218_v21 = vadd.f32 %v1178_v23, %v9771_v43  ;;  %v2071_v23 = vld [vmem:[#allocation2 + $0xd8] sm:$0xff] }
 0x28e   : > { %v2349_v43 = vld [vmem:[#allocation2 + $0xd9] sm:$0xff] }
 0x28f   : > { %v1496_v13 = vadd.f32 %v1456_v25, %v1218_v21  ;;  %v8027_v25 = vpop.f32.mrf.mxu1 }
 0x290   : > { %v1740_v5 = vpop.f32.mrf.mxu0 }
 0x291   : > { %6014 = vmatmul.msk.f32.gmra.mxu2 %vm364_vm0, %v2070_v3  ;;  %v8021_v8 = vadd.f32 %v1734_v0, %v1496_v13  ;;  %v3119_v3 = vld [vmem:[#allocation3 + $0x9] sm:$0xff] }
 0x292   : > { %6046 = vmatmul.msk.f32.gmra.mxu3 %vm364_vm0, %v2348_v63  ;;  %v4165_v13 = vld [vmem:[#allocation9 + $0x98] sm:$0xff]  ;;  %6098 = vmatmul.msk.f32.gmra.mxu1 %vm364_vm0, %v3119_v3  ;;  %v9775_v3 = vld [vmem:[#allocation84_spill] sm:$0xff] }
 0x293   : > { %9772 = vst [vmem:[#allocation54_spill] sm:$0xff] %v8021_v8  ;;  %6079 = vmatmul.msk.f32.gmra.mxu0 %vm364_vm0, %v7661_v53  ;;  %v3887_v53 = vld [vmem:[#allocation9 + $0x78] sm:$0xff]  ;;  %4274 = vmatpush.msrb.mxu1 %v4165_v13  ;;  %v2073_v13 = vld [vmem:[#allocation2 + $0xf0] sm:$0xff] }
 0x294   : > { %v1181_v48 = vpop.f32.mrf.mxu2  ;;  %3996 = vmatpush.msrb.mxu0 %v3887_v53 }
 0x295   : > { %v1459_v55 = vpop.f32.mrf.mxu3  ;;  %v1219_v54 = vadd.f32 %v1181_v48, %v9773_v34  ;;  %v9774_v48 = vld [vmem:[#allocation83_spill] sm:$0xff]  ;;  %v2072_v34 = vld [vmem:[#allocation2 + $0xe0] sm:$0xff] }
 0x297   : > { %v1497_v21 = vadd.f32 %v1459_v55, %v1219_v54  ;;  %v2350_v54 = vld [vmem:[#allocation2 + $0xe1] sm:$0xff] }
 0x298   : > { %v1743_v58 = vpop.f32.mrf.mxu0 }
 0x299   : > { %6015 = vmatmul.msk.f32.gmra.mxu2 %vm364_vm0, %v2071_v23  ;;  %v8031_v0 = vadd.f32 %v1737_v24, %v1497_v21 }
 0x29a   : > { %6047 = vmatmul.msk.f32.gmra.mxu3 %vm364_vm0, %v2349_v43  ;;  %v8037_v43 = vpop.f32.mrf.mxu1 }
 0x29b   : > { %6080 = vmatmul.msk.f32.gmra.mxu0 %vm364_vm0, %v7673_v47 }
 0x29c   : > { %v1184_v63 = vpop.f32.mrf.mxu2 }
 0x29d   : > { %v1462_v60 = vpop.f32.mrf.mxu3  ;;  %v1220_v55 = vadd.f32 %v1184_v63, %v9774_v48  ;;  %v2351_v63 = vld [vmem:[#allocation2 + $0xf1] sm:$0xff] }
 0x29f   : > { %v1498_v23 = vadd.f32 %v1462_v60, %v1220_v55 }
 0x2a0   : > { %v2763_v8 = vpop.f32.mrf.mxu0 }
 0x2a1   : > { %6016 = vmatmul.msk.f32.gmra.mxu2 %vm364_vm0, %v2072_v34  ;;  %v8041_v24 = vadd.f32 %v1740_v5, %v1498_v23  ;;  %v2074_v23 = vld [vmem:[#allocation2 + $0xf8] sm:$0xff] }
 0x2a2   : > { %6048 = vmatmul.msk.f32.gmra.mxu3 %vm364_vm0, %v2350_v54  ;;  %v8052_v5 = vpop.f32.mrf.mxu1 }
 0x2a3   : > { %6081 = vmatmul.msk.f32.gmra.mxu0 %vm364_vm0, %v7685_v36 }
 0x2a4   : > { %v1187_v47 = vpop.f32.mrf.mxu2 }
 0x2a5   : > { %v1465_v21 = vpop.f32.mrf.mxu3  ;;  %v1221_v53 = vadd.f32 %v1187_v47, %v9775_v3  ;;  %v2352_v47 = vld [vmem:[#allocation2 + $0xf9] sm:$0xff] }
 0x2a7   : > { %v1499_v48 = vadd.f32 %v1465_v21, %v1221_v53  ;;  %v8058_v21 = vld [vmem:[%s9538_s2] ss:$0 sm:$0xff] }
 0x2a8   : > { %v2766_v60 = vpop.f32.mrf.mxu0 }
 0x2a9   : > { %6017 = vmatmul.msk.f32.gmra.mxu2 %vm364_vm0, %v2073_v13  ;;  %v8048_v55 = vadd.f32 %v1743_v58, %v1499_v48 }
 0x2aa   : > { %6049 = vmatmul.msk.f32.gmra.mxu3 %vm364_vm0, %v2351_v63  ;;  %v8070_v48 = vpop.f32.mrf.mxu1 }
 0x2ab   : > { %9776 = vst [vmem:[#allocation55_spill] sm:$0xff] %v8048_v55  ;;  %6082 = vmatmul.msk.f32.gmra.mxu0 %vm364_vm0, %v7699_v29  ;;  %v8063_v29 = vld [vmem:[%s9539_s3] ss:$0 sm:$0xff] }
 0x2ac   : > { %v2207_v36 = vpop.f32.mrf.mxu2 }
 0x2ad   : > { %v2485_v34 = vpop.f32.mrf.mxu3  ;;  %v2303_v54 = vadd.f32 %v2207_v36, %v7697_v41 }
 0x2af   : > { %v2581_v3 = vadd.f32 %v2485_v34, %v2303_v54  ;;  %v2075_v34 = vld [vmem:[#allocation2 + $0x108] sm:$0xff] }
 0x2b0   : > { %v2769_v53 = vpop.f32.mrf.mxu0  ;;  %v2353_v54 = vld [vmem:[#allocation2 + $0x109] sm:$0xff] }
 0x2b1   : > { %v2859_v58 = vadd.f32 %v2763_v8, %v2581_v3  ;;  %6018 = vmatmul.msk.f32.gmra.mxu2 %vm364_vm0, %v2074_v23 }
 0x2b2   : > { %6050 = vmatmul.msk.f32.gmra.mxu3 %vm364_vm0, %v2352_v47 }
 0x2b3   : > { %6083 = vmatmul.msk.f32.gmra.mxu0 %vm364_vm0, %v7713_v33  ;;  %v2895_v41 = vmul.f32 %v8058_v21, %v2859_v58 }
 0x2b4   : > { %v2210_v13 = vpop.f32.mrf.mxu2 }
 0x2b5   : > { %v2488_v63 = vpop.f32.mrf.mxu3  ;;  %v2931_v8 = vadd.f32 %v8063_v29, %v2895_v41  ;;  %v2304_v36 = vadd.f32 %v2210_v13, %v7711_v49 }
 0x2b7   : > { %v2963_v3 = vmax.f32 %v2931_v8, 0.0  ;;  %v2582_v55 = vadd.f32 %v2488_v63, %v2304_v36  ;;  %v2076_v63 = vld [vmem:[#allocation2 + $0x110] sm:$0xff]  ;;  %v8082_v36 = vpop.f32.mrf.mxu1 }
 0x2b8   : > { %v2772_v23 = vpop.f32.mrf.mxu0  ;;  %v2354_v8 = vld [vmem:[#allocation2 + $0x111] sm:$0xff] }
 0x2b9   : > { %3050 = vst.msk [vmem:[#allocation3 + $0x19] sm:$0xff] %vm364_vm0, %v2963_v3  ;;  %v2860_v47 = vadd.f32 %v2766_v60, %v2582_v55  ;;  %6019 = vmatmul.msk.f32.gmra.mxu2 %vm364_vm0, %v2075_v34 }
 0x2ba   : > { %6051 = vmatmul.msk.f32.gmra.mxu3 %vm364_vm0, %v2353_v54 }
 0x2bb   : > { %6084 = vmatmul.msk.f32.gmra.mxu0 %vm364_vm0, %v7727_v31  ;;  %v2896_v33 = vmul.f32 %v8058_v21, %v2860_v47 }
 0x2bc   : > { %v2213_v58 = vpop.f32.mrf.mxu2 }
 0x2bd   : > { %v2491_v41 = vpop.f32.mrf.mxu3  ;;  %v2932_v49 = vadd.f32 %v8063_v29, %v2896_v33  ;;  %v2305_v13 = vadd.f32 %v2213_v58, %v7725_v26 }
 0x2bf   : > { %v2964_v60 = vmax.f32 %v2932_v49, 0.0  ;;  %v2583_v55 = vadd.f32 %v2491_v41, %v2305_v13  ;;  %v2077_v41 = vld [vmem:[#allocation2 + $0x120] sm:$0xff] }
 0x2c0   : > { %v2775_v34 = vpop.f32.mrf.mxu0  ;;  %v3120_v3 = vld [vmem:[#allocation3 + $0x19] sm:$0xff]  ;;  %v2355_v49 = vld [vmem:[#allocation2 + $0x121] sm:$0xff] }
 0x2c1   : > { %3051 = vst.msk [vmem:[#allocation3 + $0x21] sm:$0xff] %vm364_vm0, %v2964_v60  ;;  %v2861_v54 = vadd.f32 %v2769_v53, %v2583_v55  ;;  %6020 = vmatmul.msk.f32.gmra.mxu2 %vm364_vm0, %v2076_v63  ;;  %6099 = vmatmul.msk.f32.gmra.mxu1 %vm364_vm0, %v3120_v3 }
 0x2c2   : > { %6052 = vmatmul.msk.f32.gmra.mxu3 %vm364_vm0, %v2354_v8  ;;  %v8093_v8 = vpop.f32.mrf.mxu1 }
 0x2c3   : > { %6085 = vmatmul.msk.f32.gmra.mxu0 %vm364_vm0, %v7741_v59  ;;  %v2897_v26 = vmul.f32 %v8058_v21, %v2861_v54 }
 0x2c4   : > { %v2216_v31 = vpop.f32.mrf.mxu2 }
 0x2c5   : > { %v2494_v47 = vpop.f32.mrf.mxu3  ;;  %v2933_v33 = vadd.f32 %v8063_v29, %v2897_v26  ;;  %v2306_v58 = vadd.f32 %v2216_v31, %v7739_v62  ;;  %v2078_v31 = vld [vmem:[#allocation2 + $0x128] sm:$0xff] }
 0x2c7   : > { %v2965_v53 = vmax.f32 %v2933_v33, 0.0  ;;  %v2584_v13 = vadd.f32 %v2494_v47, %v2306_v58  ;;  %v2356_v47 = vld [vmem:[#allocation2 + $0x129] sm:$0xff] }
 0x2c8   : > { %v2778_v63 = vpop.f32.mrf.mxu0  ;;  %v3121_v60 = vld [vmem:[#allocation3 + $0x21] sm:$0xff] }
 0x2c9   : > { %3052 = vst.msk [vmem:[#allocation3 + $0x31] sm:$0xff] %vm364_vm0, %v2965_v53  ;;  %v2862_v55 = vadd.f32 %v2772_v23, %v2584_v13  ;;  %6021 = vmatmul.msk.f32.gmra.mxu2 %vm364_vm0, %v2077_v41  ;;  %6100 = vmatmul.msk.f32.gmra.mxu1 %vm364_vm0, %v3121_v60  ;;  %v3608_v53 = vld [vmem:[#allocation9 + $0x50] sm:$0xff] }
 0x2ca   : > { %6053 = vmatmul.msk.f32.gmra.mxu3 %vm364_vm0, %v2355_v49 }
 0x2cb   : > { %6086 = vmatmul.msk.f32.gmra.mxu0 %vm364_vm0, %v7755_v30  ;;  %v2898_v62 = vmul.f32 %v8058_v21, %v2862_v55  ;;  %v3116_v30 = vld [vmem:[#allocation9 + $0x10] sm:$0xff]  ;;  %3719 = vmatpush.msrb.mxu3 %v3608_v53 }
 0x2cc   : > { %v2219_v59 = vpop.f32.mrf.mxu2  ;;  %3473 = vmatpush.msrb.mxu2 %v3116_v30 }
 0x2cd   : > { %v2497_v3 = vpop.f32.mrf.mxu3  ;;  %v2934_v54 = vadd.f32 %v8063_v29, %v2898_v62  ;;  %v2307_v26 = vadd.f32 %v2219_v59, %v7753_v12  ;;  %v8110_v12 = vpop.f32.mrf.mxu1  ;;  %v2079_v59 = vld [vmem:[#allocation2 + $0x138] sm:$0xff] }
 0x2cf   : > { %v2966_v23 = vmax.f32 %v2934_v54, 0.0  ;;  %v2585_v33 = vadd.f32 %v2497_v3, %v2307_v26  ;;  %v2357_v3 = vld [vmem:[#allocation2 + $0x139] sm:$0xff] }
 0x2d0   : > { %v2781_v58 = vpop.f32.mrf.mxu0  ;;  %v3122_v41 = vld [vmem:[#allocation3 + $0x31] sm:$0xff] }
 0x2d1   : > { %3053 = vst.msk [vmem:[#allocation3 + $0x39] sm:$0xff] %vm364_vm0, %v2966_v23  ;;  %v2863_v49 = vadd.f32 %v2775_v34, %v2585_v33  ;;  %6022 = vmatmul.msk.f32.gmra.mxu2 %vm364_vm0, %v2078_v31  ;;  %6101 = vmatmul.msk.f32.gmra.mxu1 %vm364_vm0, %v3122_v41  ;;  %v3886_v23 = vld [vmem:[#allocation9 + $0x70] sm:$0xff] }
 0x2d2   : > { %6054 = vmatmul.msk.f32.gmra.mxu3 %vm364_vm0, %v2356_v47  ;;  %v4164_v33 = vld [vmem:[#allocation9 + $0x90] sm:$0xff]  ;;  %3997 = vmatpush.msrb.mxu0 %v3886_v23 }
 0x2d3   : > { %6087 = vmatmul.msk.f32.gmra.mxu0 %vm364_vm0, %v7769_v19  ;;  %v2899_v13 = vmul.f32 %v8058_v21, %v2863_v49  ;;  %4275 = vmatpush.msrb.mxu1 %v4164_v33  ;;  %v2359_v23 = vld [vmem:[#allocation2 + $0x151] sm:$0xff] }
 0x2d4   : > { %v2222_v60 = vpop.f32.mrf.mxu2 }
 0x2d5   : > { %v2500_v55 = vpop.f32.mrf.mxu3  ;;  %v2935_v34 = vadd.f32 %v8063_v29, %v2899_v13  ;;  %v2308_v62 = vadd.f32 %v2222_v60, %v7767_v45  ;;  %v8122_v30 = vpop.f32.mrf.mxu1  ;;  %v2080_v13 = vld [vmem:[#allocation2 + $0x140] sm:$0xff] }
 0x2d6   : > { %v2358_v60 = vld [vmem:[#allocation2 + $0x141] sm:$0xff] }
 0x2d7   : > { %v2967_v54 = vmax.f32 %v2935_v34, 0.0  ;;  %v2586_v26 = vadd.f32 %v2500_v55, %v2308_v62 }
 0x2d8   : > { %v2784_v31 = vpop.f32.mrf.mxu0  ;;  %v3123_v47 = vld [vmem:[#allocation3 + $0x39] sm:$0xff] }
 0x2d9   : > { %3054 = vst.msk [vmem:[#allocation3 + $0x49] sm:$0xff] %vm364_vm0, %v2967_v54  ;;  %v2864_v19 = vadd.f32 %v2778_v63, %v2586_v26  ;;  %6023 = vmatmul.msk.f32.gmra.mxu2 %vm364_vm0, %v2079_v59  ;;  %6102 = vmatmul.msk.f32.gmra.mxu1 %vm364_vm0, %v3123_v47 }
 0x2da   : > { %6055 = vmatmul.msk.f32.gmra.mxu3 %vm364_vm0, %v2357_v3 }
 0x2db   : > { %6088 = vmatmul.msk.f32.gmra.mxu0 %vm364_vm0, %v7783_v27  ;;  %v2900_v45 = vmul.f32 %v8058_v21, %v2864_v19  ;;  %v2081_v19 = vld [vmem:[#allocation2 + $0x150] sm:$0xff] }
 0x2dc   : > { %v2225_v41 = vpop.f32.mrf.mxu2 }
 0x2dd   : > { %v2503_v49 = vpop.f32.mrf.mxu3  ;;  %v2936_v63 = vadd.f32 %v8063_v29, %v2900_v45  ;;  %v2309_v53 = vadd.f32 %v2225_v41, %v7781_v56 }
 0x2df   : > { %v2968_v55 = vmax.f32 %v2936_v63, 0.0  ;;  %v2587_v34 = vadd.f32 %v2503_v49, %v2309_v53 }
 0x2e0   : > { %v2787_v62 = vpop.f32.mrf.mxu0  ;;  %v3124_v59 = vld [vmem:[#allocation3 + $0x49] sm:$0xff] }
 0x2e1   : > { %3055 = vst.msk [vmem:[#allocation3 + $0x51] sm:$0xff] %vm364_vm0, %v2968_v55  ;;  %v2865_v27 = vadd.f32 %v2781_v58, %v2587_v34  ;;  %6024 = vmatmul.msk.f32.gmra.mxu2 %vm364_vm0, %v2080_v13  ;;  %6103 = vmatmul.msk.f32.gmra.mxu1 %vm364_vm0, %v3124_v59  ;;  %v8135_v58 = vpop.f32.mrf.mxu1  ;;  %v2360_v34 = vld [vmem:[#allocation2 + $0x159] sm:$0xff] }
 0x2e2   : > { %6056 = vmatmul.msk.f32.gmra.mxu3 %vm364_vm0, %v2358_v60 }
 0x2e3   : > { %6089 = vmatmul.msk.f32.gmra.mxu0 %vm364_vm0, %v7797_v50  ;;  %v2901_v56 = vmul.f32 %v8058_v21, %v2865_v27 }
 0x2e4   : > { %v2228_v3 = vpop.f32.mrf.mxu2 }
 0x2e5   : > { %v2506_v54 = vpop.f32.mrf.mxu3  ;;  %v2937_v26 = vadd.f32 %v8063_v29, %v2901_v56  ;;  %v2310_v47 = vadd.f32 %v2228_v3, %v7795_v22  ;;  %v2032_v22 = vadd.f32 %v7930_v38, %v7808_v2  ;;  %v2033_v2 = vadd.f32 %v7940_v6, %v7827_v46 }
 0x2e6   : > { %v2034_v46 = vadd.f32 %v7949_v52, %v7841_v1  ;;  %v2035_v1 = vadd.f32 %v7964_v40, %v7855_v14  ;;  %v3114_v40 = vld [vmem:[#allocation9] sm:$0xff] }
 0x2e7   : > { %v2969_v33 = vmax.f32 %v2937_v26, 0.0  ;;  %v2588_v45 = vadd.f32 %v2506_v54, %v2310_v47 }
 0x2e8   : > { %v2790_v41 = vpop.f32.mrf.mxu0  ;;  %v3125_v49 = vld [vmem:[#allocation3 + $0x51] sm:$0xff] }
 0x2e9   : > { %3056 = vst.msk [vmem:[#allocation3 + $0x61] sm:$0xff] %vm364_vm0, %v2969_v33  ;;  %v2866_v63 = vadd.f32 %v2784_v31, %v2588_v45  ;;  %6025 = vmatmul.msk.f32.gmra.mxu2 %vm364_vm0, %v2081_v19  ;;  %6104 = vmatmul.msk.f32.gmra.mxu1 %vm364_vm0, %v3125_v49  ;;  %v2082_v31 = vld [vmem:[#allocation2 + $0x158] sm:$0xff]  ;;  %v8147_v54 = vpop.f32.mrf.mxu1  ;;  %v2361_v33 = vld [vmem:[#allocation2 + $0x169] sm:$0xff] }
 0x2ea   : > { %6057 = vmatmul.msk.f32.gmra.mxu3 %vm364_vm0, %v2359_v23 }
 0x2eb   : > { %6090 = vmatmul.msk.f32.gmra.mxu0 %vm364_vm0, %v7816_v28  ;;  %v2902_v50 = vmul.f32 %v8058_v21, %v2866_v63 }
 0x2ec   : > { %v2231_v53 = vpop.f32.mrf.mxu2 }
 0x2ed   : > { %v2509_v13 = vpop.f32.mrf.mxu3  ;;  %v2938_v60 = vadd.f32 %v8063_v29, %v2902_v50  ;;  %v2311_v55 = vadd.f32 %v2231_v53, %v2032_v22 }
 0x2ef   : > { %v2970_v59 = vmax.f32 %v2938_v60, 0.0  ;;  %v2589_v27 = vadd.f32 %v2509_v13, %v2311_v55  ;;  %v2084_v55 = vld [vmem:[#allocation2 + $0x170] sm:$0xff] }
 0x2f0   : > { %v2793_v56 = vpop.f32.mrf.mxu0  ;;  %v3126_v3 = vld [vmem:[#allocation3 + $0x61] sm:$0xff] }
 0x2f1   : > { %3057 = vst.msk [vmem:[#allocation3 + $0x69] sm:$0xff] %vm364_vm0, %v2970_v59  ;;  %v2867_v28 = vadd.f32 %v2787_v62, %v2589_v27  ;;  %6026 = vmatmul.msk.f32.gmra.mxu2 %vm364_vm0, %v2082_v31  ;;  %6105 = vmatmul.msk.f32.gmra.mxu1 %vm364_vm0, %v3126_v3  ;;  %v2083_v62 = vld [vmem:[#allocation2 + $0x168] sm:$0xff]  ;;  %v2362_v31 = vld [vmem:[#allocation2 + $0x171] sm:$0xff] }
 0x2f2   : > { %6058 = vmatmul.msk.f32.gmra.mxu3 %vm364_vm0, %v2360_v34 }
 0x2f3   : > { %6091 = vmatmul.msk.f32.gmra.mxu0 %vm364_vm0, %v7835_v44  ;;  %v2903_v38 = vmul.f32 %v8058_v21, %v2867_v28  ;;  %v8167_v44 = vpop.f32.mrf.mxu1 }
 0x2f4   : > { %v2234_v26 = vpop.f32.mrf.mxu2 }
 0x2f5   : > { %v2512_v47 = vpop.f32.mrf.mxu3  ;;  %v2939_v19 = vadd.f32 %v8063_v29, %v2903_v38  ;;  %v2312_v23 = vadd.f32 %v2234_v26, %v2033_v2 }
 0x2f7   : > { %v2971_v45 = vmax.f32 %v2939_v19, 0.0  ;;  %v2590_v49 = vadd.f32 %v2512_v47, %v2312_v23  ;;  %v3885_v47 = vld [vmem:[#allocation9 + $0x68] sm:$0xff] }
 0x2f8   : > { %v2796_v63 = vpop.f32.mrf.mxu0  ;;  %v3127_v22 = vld [vmem:[#allocation3 + $0x69] sm:$0xff]  ;;  %v3115_v19 = vld [vmem:[#allocation9 + $0x8] sm:$0xff]  ;;  %3998 = vmatpush.msrb.mxu0 %v3885_v47 }
 0x2f9   : > { %3058 = vst.msk [vmem:[#allocation3 + $0x79] sm:$0xff] %vm364_vm0, %v2971_v45  ;;  %v2868_v50 = vadd.f32 %v2790_v41, %v2590_v49  ;;  %6027 = vmatmul.msk.f32.gmra.mxu2 %vm364_vm0, %v2083_v62  ;;  %6106 = vmatmul.msk.f32.gmra.mxu1 %vm364_vm0, %v3127_v22  ;;  %v3607_v23 = vld [vmem:[#allocation9 + $0x48] sm:$0xff]  ;;  %v3606_v49 = vld [vmem:[#allocation9 + $0x40] sm:$0xff] }
 0x2fa   : > { %6059 = vmatmul.msk.f32.gmra.mxu3 %vm364_vm0, %v2361_v33  ;;  %3474 = vmatpush.msrb.mxu2 %v3115_v19 }
 0x2fb   : > { %6092 = vmatmul.msk.f32.gmra.mxu0 %vm364_vm0, %v7849_v35  ;;  %v2904_v6 = vmul.f32 %v8058_v21, %v2868_v50  ;;  %v8180_v38 = vpop.f32.mrf.mxu1  ;;  %3720 = vmatpush.msrb.mxu3 %v3607_v23  ;;  %v2036_v50 = vadd.f32 %v7973_v18, %v7871_v37  ;;  %v2037_v37 = vadd.f32 %v7983_v10, %v7889_v20  ;;  %v4163_v20 = vld [vmem:[#allocation9 + $0x88] sm:$0xff] }
 0x2fc   : > { %v2237_v53 = vpop.f32.mrf.mxu2  ;;  %3475 = vmatpush.msrb.mxu2 %v3114_v40  ;;  %v2038_v10 = vadd.f32 %v7992_v39, %v7903_v61  ;;  %4276 = vmatpush.msrb.mxu1 %v4163_v20  ;;  %v3851_v61 = vld [vmem:[#allocation3 + $0x18] sm:$0xff]  ;;  %v2039_v39 = vadd.f32 %v8007_v11, %v7911_v7  ;;  %v3852_v7 = vld [vmem:[#allocation3 + $0x20] sm:$0xff]  ;;  %v2040_v11 = vadd.f32 %v8016_v16, %v7919_v42  ;;  %v3853_v42 = vld [vmem:[#allocation3 + $0x30] sm:$0xff] }
 0x2fd   : > { %v2515_v13 = vpop.f32.mrf.mxu3  ;;  %v2940_v41 = vadd.f32 %v8063_v29, %v2904_v6  ;;  %v2313_v60 = vadd.f32 %v2237_v53, %v2034_v46  ;;  %3721 = vmatpush.msrb.mxu3 %v3606_v49  ;;  %v2041_v16 = vadd.f32 %v8027_v25, %v7926_v9  ;;  %v3854_v9 = vld [vmem:[#allocation3 + $0x38] sm:$0xff]  ;;  %v9777_v25 = vld [vmem:[#allocation46_spill] sm:$0xff] }
 0x2ff   : > { %v2972_v34 = vmax.f32 %v2940_v41, 0.0  ;;  %v2591_v59 = vadd.f32 %v2515_v13, %v2313_v60 }
 0x300   : > { %v2799_v27 = vpop.f32.mrf.mxu0  ;;  %v3128_v3 = vld [vmem:[#allocation3 + $0x79] sm:$0xff] }
 0x301   : > { %3059 = vst.msk [vmem:[#allocation3 + $0x81] sm:$0xff] %vm364_vm0, %v2972_v34  ;;  %v2869_v35 = vadd.f32 %v2793_v56, %v2591_v59  ;;  %6028 = vmatmul.msk.f32.gmra.mxu2 %vm364_vm0, %v2084_v55  ;;  %6107 = vmatmul.msk.f32.gmra.mxu1 %vm364_vm0, %v3128_v3  ;;  %v2643_v55 = vld [vmem:[#allocation2 + $0x19a] sm:$0xff] }
 0x302   : > { %6060 = vmatmul.msk.f32.gmra.mxu3 %vm364_vm0, %v2362_v31 }
 0x303   : > { %6093 = vmatmul.msk.f32.gmra.mxu0 %vm364_vm0, %v7865_v15  ;;  %v2905_v52 = vmul.f32 %v8058_v21, %v2869_v35  ;;  %v3884_v15 = vld [vmem:[#allocation9 + $0x60] sm:$0xff]  ;;  %v8195_v13 = vpop.f32.mrf.mxu1  ;;  %v2087_v35 = vld [vmem:[#allocation2 + $0x198] sm:$0xff] }
 0x304   : > { %v2240_v28 = vpop.f32.mrf.mxu2  ;;  %3999 = vmatpush.msrb.mxu0 %v3884_v15  ;;  %v2366_v15 = vld [vmem:[#allocation2 + $0x1a1] sm:$0xff] }
 0x305   : > { %v2518_v2 = vpop.f32.mrf.mxu3  ;;  %v2941_v56 = vadd.f32 %v8063_v29, %v2905_v52  ;;  %v2314_v26 = vadd.f32 %v2240_v28, %v2035_v1  ;;  %v2365_v1 = vld [vmem:[#allocation2 + $0x199] sm:$0xff] }
 0x307   : > { %v2973_v62 = vmax.f32 %v2941_v56, 0.0  ;;  %v2592_v33 = vadd.f32 %v2518_v2, %v2314_v26 }
 0x308   : > { %v2802_v45 = vpop.f32.mrf.mxu0  ;;  %v3129_v14 = vld [vmem:[#allocation3 + $0x81] sm:$0xff] }
 0x309   : > { %3060 = vst.msk [vmem:[#allocation3 + $0x91] sm:$0xff] %vm364_vm0, %v2973_v62  ;;  %v2870_v22 = vadd.f32 %v2796_v63, %v2592_v33  ;;  %6029 = vmatmul.msk.f32.gmra.mxu2 %vm364_vm0, %v7879_v4  ;;  %6108 = vmatmul.msk.f32.gmra.mxu1 %vm364_vm0, %v3129_v14 }
 0x30a   : > { %6061 = vmatmul.msk.f32.gmra.mxu3 %vm364_vm0, %v7863_v57 }
 0x30b   : > { %6094 = vmatmul.msk.f32.gmra.mxu0 %vm364_vm0, %v7883_v32  ;;  %v2906_v46 = vmul.f32 %v8058_v21, %v2870_v22  ;;  %v8208_v56 = vpop.f32.mrf.mxu1 }
 0x30c   : > { %v2243_v6 = vpop.f32.mrf.mxu2 }
 0x30d   : > { %v2521_v63 = vpop.f32.mrf.mxu3  ;;  %v2942_v53 = vadd.f32 %v8063_v29, %v2906_v46  ;;  %v2315_v4 = vadd.f32 %v2243_v6, %v2036_v50 }
 0x30f   : > { %v2974_v57 = vmax.f32 %v2942_v53, 0.0  ;;  %v2593_v41 = vadd.f32 %v2521_v63, %v2315_v4 }
 0x310   : > { %v2805_v60 = vpop.f32.mrf.mxu0  ;;  %v3130_v31 = vld [vmem:[#allocation3 + $0x91] sm:$0xff] }
 0x311   : > { %3061 = vst.msk [vmem:[#allocation3 + $0x99] sm:$0xff] %vm364_vm0, %v2974_v57  ;;  %v2871_v32 = vadd.f32 %v2799_v27, %v2593_v41  ;;  %6030 = vmatmul.msk.f32.gmra.mxu2 %vm364_vm0, %v7897_v17  ;;  %6109 = vmatmul.msk.f32.gmra.mxu1 %vm364_vm0, %v3130_v31  ;;  %v3082_v41 = vld [vmem:[#allocation3] sm:$0xff] }
 0x312   : > { %6062 = vmatmul.msk.f32.gmra.mxu3 %vm364_vm0, %v7881_v51  ;;  %v2644_v51 = vld [vmem:[#allocation2 + $0x1a2] sm:$0xff] }
 0x313   : > { %6095 = vmatmul.msk.f32.gmra.mxu0 %vm364_vm0, %v2643_v55  ;;  %v2907_v18 = vmul.f32 %v8058_v21, %v2871_v32  ;;  %v8226_v46 = vpop.f32.mrf.mxu1 }
 0x314   : > { %v2246_v34 = vpop.f32.mrf.mxu2 }
 0x315   : > { %v2524_v59 = vpop.f32.mrf.mxu3  ;;  %v2943_v3 = vadd.f32 %v8063_v29, %v2907_v18  ;;  %v2316_v27 = vadd.f32 %v2246_v34, %v2037_v37 }
 0x317   : > { %v2975_v17 = vmax.f32 %v2943_v3, 0.0  ;;  %v2594_v52 = vadd.f32 %v2524_v59, %v2316_v27 }
 0x318   : > { %v2808_v28 = vpop.f32.mrf.mxu0  ;;  %v3131_v2 = vld [vmem:[#allocation3 + $0x99] sm:$0xff] }
 0x319   : > { %3062 = vst.msk [vmem:[#allocation3 + $0xa9] sm:$0xff] %vm364_vm0, %v2975_v17  ;;  %v2872_v26 = vadd.f32 %v2802_v45, %v2594_v52  ;;  %6031 = vmatmul.msk.f32.gmra.mxu2 %vm364_vm0, %v2087_v35  ;;  %6110 = vmatmul.msk.f32.gmra.mxu1 %vm364_vm0, %v3131_v2  ;;  %v2088_v45 = vld [vmem:[#allocation2 + $0x1a0] sm:$0xff]  ;;  %v3083_v17 = vld [vmem:[#allocation3 + $0x8] sm:$0xff] }
 0x31a   : > { %6063 = vmatmul.msk.f32.gmra.mxu3 %vm364_vm0, %v2365_v1  ;;  %v3574_v52 = vld [vmem:[#allocation3 + $0xa] sm:$0xff] }
 0x31b   : > { %6096 = vmatmul.msk.f32.gmra.mxu0 %vm364_vm0, %v2644_v51  ;;  %v2908_v47 = vmul.f32 %v8058_v21, %v2872_v26  ;;  %v8238_v59 = vpop.f32.mrf.mxu1 }
 0x31c   : > { %v2249_v19 = vpop.f32.mrf.mxu2 }
 0x31d   : > { %v2527_v23 = vpop.f32.mrf.mxu3  ;;  %v2944_v62 = vadd.f32 %v8063_v29, %v2908_v47  ;;  %v2317_v33 = vadd.f32 %v2249_v19, %v2038_v10 }
 0x31f   : > { %v2976_v14 = vmax.f32 %v2944_v62, 0.0  ;;  %v2595_v40 = vadd.f32 %v2527_v23, %v2317_v33 }
 0x320   : > { %v2811_v49 = vpop.f32.mrf.mxu0  ;;  %v3132_v22 = vld [vmem:[#allocation3 + $0xa9] sm:$0xff] }
 0x321   : > { %3063 = vst.msk [vmem:[#allocation3 + $0xb1] sm:$0xff] %vm364_vm0, %v2976_v14  ;;  %v2873_v50 = vadd.f32 %v2805_v60, %v2595_v40  ;;  %6032 = vmatmul.msk.f32.gmra.mxu2 %vm364_vm0, %v2088_v45  ;;  %6111 = vmatmul.msk.f32.gmra.mxu1 %vm364_vm0, %v3132_v22  ;;  %v3573_v60 = vld [vmem:[#allocation3 + $0x2] sm:$0xff] }
 0x322   : > { %6064 = vmatmul.msk.f32.gmra.mxu3 %vm364_vm0, %v2366_v15 }
 0x323   : > { %6193 = vmatmul.msk.f32.vlgmr.msrb.gmra.mxu0 %vm364_vm0, %v3851_v61  ;;  %v2909_v6 = vmul.f32 %v8058_v21, %v2873_v50  ;;  %v8250_v33 = vpop.f32.mrf.mxu1  ;;  %v2042_v50 = vadd.f32 %v8037_v43, %v9777_v25  ;;  %v3855_v43 = vld [vmem:[#allocation3 + $0x48] sm:$0xff] }
 0x324   : > { %v2252_v63 = vpop.f32.mrf.mxu2 }
 0x325   : > { %v2530_v53 = vpop.f32.mrf.mxu3  ;;  %v2945_v4 = vadd.f32 %v8063_v29, %v2909_v6  ;;  %v2318_v57 = vadd.f32 %v2252_v63, %v2039_v39 }
 0x327   : > { %v2977_v55 = vmax.f32 %v2945_v4, 0.0  ;;  %v2596_v31 = vadd.f32 %v2530_v53, %v2318_v57 }
 0x328   : > { %v2814_v32 = vpop.f32.mrf.mxu0  ;;  %v3133_v37 = vld [vmem:[#allocation3 + $0xb1] sm:$0xff] }
 0x329   : > { %3064 = vst.msk [vmem:[#allocation3 + $0xc1] sm:$0xff] %vm364_vm0, %v2977_v55  ;;  %v2874_v18 = vadd.f32 %v2808_v28, %v2596_v31  ;;  %6129 = vmatmul.msk.f32.vlgmr.msrb.gmra.mxu2 %vm364_vm0, %v3082_v41  ;;  %6112 = vmatmul.msk.f32.gmra.mxu1 %vm364_vm0, %v3133_v37  ;;  %v3576_v31 = vld [vmem:[#allocation3 + $0x22] sm:$0xff]  ;;  %v9778_v37 = vld [vmem:[#allocation47_spill] sm:$0xff] }
 0x32a   : > { %6161 = vmatmul.msk.f32.vlgmr.msrb.gmra.mxu3 %vm364_vm0, %v3573_v60 }
 0x32b   : > { %6194 = vmatmul.msk.f32.gmra.mxu0 %vm364_vm0, %v3852_v7  ;;  %v2910_v34 = vmul.f32 %v8058_v21, %v2874_v18  ;;  %v2043_v18 = vadd.f32 %v8052_v5, %v9778_v37  ;;  %v3856_v5 = vld [vmem:[#allocation3 + $0x50] sm:$0xff] }
 0x32c   : > { %v2255_v3 = vpop.f32.mrf.mxu2  ;;  %v9781_v37 = vld [vmem:[#allocation50_spill] sm:$0xff] }
 0x32d   : > { %v2533_v27 = vpop.f32.mrf.mxu3  ;;  %v2946_v35 = vadd.f32 %v8063_v29, %v2910_v34  ;;  %v2319_v1 = vadd.f32 %v2255_v3, %v2040_v11 }
 0x32f   : > { %v2978_v28 = vmax.f32 %v2946_v35, 0.0  ;;  %v2597_v51 = vadd.f32 %v2533_v27, %v2319_v1 }
 0x330   : > { %v2817_v2 = vpop.f32.mrf.mxu0  ;;  %v3134_v26 = vld [vmem:[#allocation3 + $0xc1] sm:$0xff] }
 0x331   : > { %3065 = vst.msk [vmem:[#allocation3 + $0xc9] sm:$0xff] %vm364_vm0, %v2978_v28  ;;  %v2875_v20 = vadd.f32 %v2811_v49, %v2597_v51  ;;  %6130 = vmatmul.msk.f32.gmra.mxu2 %vm364_vm0, %v3083_v17  ;;  %6113 = vmatmul.msk.f32.gmra.mxu1 %vm364_vm0, %v3134_v26  ;;  %v3575_v49 = vld [vmem:[#allocation3 + $0x1a] sm:$0xff]  ;;  %v3577_v51 = vld [vmem:[#allocation3 + $0x32] sm:$0xff] }
 0x332   : > { %6162 = vmatmul.msk.f32.gmra.mxu3 %vm364_vm0, %v3574_v52  ;;  %v9779_v26 = vld [vmem:[#allocation48_spill] sm:$0xff] }
 0x333   : > { %6195 = vmatmul.msk.f32.gmra.mxu0 %vm364_vm0, %v3853_v42  ;;  %v2911_v10 = vmul.f32 %v8058_v21, %v2875_v20  ;;  %v2044_v20 = vadd.f32 %v8070_v48, %v9779_v26  ;;  %v3857_v48 = vld [vmem:[#allocation3 + $0x60] sm:$0xff]  ;;  %v9782_v26 = vld [vmem:[#allocation51_spill] sm:$0xff] }
 0x334   : > { %v2258_v47 = vpop.f32.mrf.mxu2 }
 0x335   : > { %v2536_v19 = vpop.f32.mrf.mxu3  ;;  %v2947_v23 = vadd.f32 %v8063_v29, %v2911_v10  ;;  %v2320_v62 = vadd.f32 %v2258_v47, %v2041_v16 }
 0x337   : > { %v2979_v45 = vmax.f32 %v2947_v23, 0.0  ;;  %v2598_v15 = vadd.f32 %v2536_v19, %v2320_v62 }
 0x338   : > { %v2820_v14 = vpop.f32.mrf.mxu0  ;;  %v3135_v40 = vld [vmem:[#allocation3 + $0xc9] sm:$0xff] }
 0x339   : > { %3066 = vst.msk [vmem:[#allocation3 + $0xd9] sm:$0xff] %vm364_vm0, %v2979_v45  ;;  %v2876_v22 = vadd.f32 %v2814_v32, %v2598_v15  ;;  %6131 = vmatmul.msk.f32.gmra.mxu2 %vm364_vm0, %v3851_v61  ;;  %6114 = vmatmul.msk.f32.gmra.mxu1 %vm364_vm0, %v3135_v40  ;;  %v3578_v40 = vld [vmem:[#allocation3 + $0x3a] sm:$0xff] }
 0x33a   : > { %6163 = vmatmul.msk.f32.gmra.mxu3 %vm364_vm0, %v3575_v49 }
 0x33b   : > { %6196 = vmatmul.msk.f32.gmra.mxu0 %vm364_vm0, %v3854_v9  ;;  %v2912_v39 = vmul.f32 %v8058_v21, %v2876_v22  ;;  %v9780_v22 = vld [vmem:[#allocation49_spill] sm:$0xff] }
 0x33c   : > { %v2261_v6 = vpop.f32.mrf.mxu2  ;;  %v2045_v25 = vadd.f32 %v8082_v36, %v9780_v22  ;;  %v3858_v36 = vld [vmem:[#allocation3 + $0x68] sm:$0xff]  ;;  %v9783_v22 = vld [vmem:[#allocation52_spill] sm:$0xff] }
 0x33d   : > { %v2539_v63 = vpop.f32.mrf.mxu3  ;;  %v2948_v53 = vadd.f32 %v8063_v29, %v2912_v39  ;;  %v2321_v4 = vadd.f32 %v2261_v6, %v2042_v50 }
 0x33e   : > { %v8261_v61 = vpop.f32.mrf.mxu1 }
 0x33f   : > { %v2980_v57 = vmax.f32 %v2948_v53, 0.0  ;;  %v2599_v41 = vadd.f32 %v2539_v63, %v2321_v4 }
 0x340   : > { %v2823_v60 = vpop.f32.mrf.mxu0  ;;  %v3136_v55 = vld [vmem:[#allocation3 + $0xd9] sm:$0xff] }
 0x341   : > { %3067 = vst.msk [vmem:[#allocation3 + $0xe1] sm:$0xff] %vm364_vm0, %v2980_v57  ;;  %v2877_v32 = vadd.f32 %v2817_v2, %v2599_v41  ;;  %6132 = vmatmul.msk.f32.gmra.mxu2 %vm364_vm0, %v3852_v7  ;;  %6115 = vmatmul.msk.f32.gmra.mxu1 %vm364_vm0, %v3136_v55  ;;  %v8298_v55 = vld [vmem:[#allocation3 + $0x4a] sm:$0xff] }
 0x342   : > { %6164 = vmatmul.msk.f32.gmra.mxu3 %vm364_vm0, %v3576_v31 }
 0x343   : > { %6197 = vmatmul.msk.f32.gmra.mxu0 %vm364_vm0, %v3855_v43  ;;  %v2913_v11 = vmul.f32 %v8058_v21, %v2877_v32  ;;  %v4162_v32 = vld [vmem:[#allocation9 + $0x80] sm:$0xff] }
 0x344   : > { %v2264_v34 = vpop.f32.mrf.mxu2  ;;  %4277 = vmatpush.msrb.mxu1 %v4162_v32  ;;  %v8355_v32 = vld [vmem:[#allocation3 + $0x6a] sm:$0xff] }
 0x345   : > { %v2542_v3 = vpop.f32.mrf.mxu3  ;;  %v2949_v27 = vadd.f32 %v8063_v29, %v2913_v11  ;;  %v2322_v35 = vadd.f32 %v2264_v34, %v2043_v18  ;;  %v2046_v18 = vadd.f32 %v8093_v8, %v9781_v37 }
 0x346   : > { %v8272_v7 = vpop.f32.mrf.mxu1 }
 0x347   : > { %v2981_v1 = vmax.f32 %v2949_v27, 0.0  ;;  %v2600_v17 = vadd.f32 %v2542_v3, %v2322_v35 }
 0x348   : > { %v2826_v52 = vpop.f32.mrf.mxu0  ;;  %v3137_v28 = vld [vmem:[#allocation3 + $0xe1] sm:$0xff] }
 0x349   : > { %3068 = vst.msk [vmem:[#allocation3 + $0xf1] sm:$0xff] %vm364_vm0, %v2981_v1  ;;  %v2878_v2 = vadd.f32 %v2820_v14, %v2600_v17  ;;  %6133 = vmatmul.msk.f32.gmra.mxu2 %vm364_vm0, %v3853_v42  ;;  %6116 = vmatmul.msk.f32.gmra.mxu1 %vm364_vm0, %v3137_v28 }
 0x34a   : > { %6165 = vmatmul.msk.f32.gmra.mxu3 %vm364_vm0, %v3577_v51  ;;  %v8315_v51 = vld [vmem:[#allocation3 + $0x52] sm:$0xff] }
 0x34b   : > { %6198 = vmatmul.msk.f32.gmra.mxu0 %vm364_vm0, %v3856_v5  ;;  %v2914_v16 = vmul.f32 %v8058_v21, %v2878_v2  ;;  %v8321_v2 = vld [vmem:[#allocation3 + $0x78] sm:$0xff] }
 0x34c   : > { %v2267_v10 = vpop.f32.mrf.mxu2 }
 0x34d   : > { %v2545_v47 = vpop.f32.mrf.mxu3  ;;  %v2950_v19 = vadd.f32 %v8063_v29, %v2914_v16  ;;  %v2323_v23 = vadd.f32 %v2267_v10, %v2044_v20  ;;  %v2047_v20 = vadd.f32 %v8110_v12, %v9782_v26  ;;  %v8341_v12 = vld [vmem:[#allocation3 + $0x80] sm:$0xff] }
 0x34e   : > { %v8283_v42 = vpop.f32.mrf.mxu1 }
 0x34f   : > { %v2982_v62 = vmax.f32 %v2950_v19, 0.0  ;;  %v2601_v45 = vadd.f32 %v2545_v47, %v2323_v23 }
 0x350   : > { %v2829_v15 = vpop.f32.mrf.mxu0  ;;  %v3138_v14 = vld [vmem:[#allocation3 + $0xf1] sm:$0xff] }
 0x351   : > { %3069 = vst.msk [vmem:[#allocation3 + $0xf9] sm:$0xff] %vm364_vm0, %v2982_v62  ;;  %v2879_v49 = vadd.f32 %v2823_v60, %v2601_v45  ;;  %6134 = vmatmul.msk.f32.gmra.mxu2 %vm364_vm0, %v3854_v9  ;;  %6117 = vmatmul.msk.f32.gmra.mxu1 %vm364_vm0, %v3138_v14 }
 0x352   : > { %6166 = vmatmul.msk.f32.gmra.mxu3 %vm364_vm0, %v3578_v40  ;;  %v8335_v40 = vld [vmem:[#allocation3 + $0x62] sm:$0xff] }
 0x353   : > { %6199 = vmatmul.msk.f32.gmra.mxu0 %vm364_vm0, %v3857_v48  ;;  %v2915_v50 = vmul.f32 %v8058_v21, %v2879_v49 }
 0x354   : > { %v2270_v39 = vpop.f32.mrf.mxu2 }
 0x355   : > { %v2548_v6 = vpop.f32.mrf.mxu3  ;;  %v2951_v63 = vadd.f32 %v8063_v29, %v2915_v50  ;;  %v2324_v53 = vadd.f32 %v2270_v39, %v2045_v25  ;;  %v2048_v25 = vadd.f32 %v8122_v30, %v9783_v22  ;;  %v8361_v30 = vld [vmem:[#allocation3 + $0x90] sm:$0xff] }
 0x356   : > { %v8294_v9 = vpop.f32.mrf.mxu1 }
 0x357   : > { %v2983_v4 = vmax.f32 %v2951_v63, 0.0  ;;  %v2602_v57 = vadd.f32 %v2548_v6, %v2324_v53 }
 0x358   : > { %v2832_v41 = vpop.f32.mrf.mxu0  ;;  %v8296_v60 = vld [vmem:[#allocation3 + $0xf9] sm:$0xff] }
 0x359   : > { %3070 = vst.msk [vmem:[#allocation3 + $0x109] sm:$0xff] %vm364_vm0, %v2983_v4  ;;  %v2880_v31 = vadd.f32 %v2826_v52, %v2602_v57  ;;  %6135 = vmatmul.msk.f32.gmra.mxu2 %vm364_vm0, %v3855_v43  ;;  %6118 = vmatmul.msk.f32.gmra.mxu1 %vm364_vm0, %v8296_v60 }
 0x35a   : > { %6167 = vmatmul.msk.f32.gmra.mxu3 %vm364_vm0, %v8298_v55 }
 0x35b   : > { %6200 = vmatmul.msk.f32.gmra.mxu0 %vm364_vm0, %v3858_v36  ;;  %v2916_v11 = vmul.f32 %v8058_v21, %v2880_v31 }
 0x35c   : > { %v2273_v34 = vpop.f32.mrf.mxu2 }
 0x35d   : > { %v2551_v3 = vpop.f32.mrf.mxu3  ;;  %v2952_v43 = vadd.f32 %v8063_v29, %v2916_v11  ;;  %v2325_v27 = vadd.f32 %v2273_v34, %v2046_v18  ;;  %v9784_v18 = vld [vmem:[#allocation53_spill] sm:$0xff] }
 0x35e   : > { %v8311_v17 = vpop.f32.mrf.mxu1  ;;  %v2049_v11 = vadd.f32 %v8135_v58, %v9784_v18  ;;  %v8382_v58 = vld [vmem:[#allocation3 + $0x98] sm:$0xff] }
 0x35f   : > { %v2984_v35 = vmax.f32 %v2952_v43, 0.0  ;;  %v2603_v1 = vadd.f32 %v2551_v3, %v2325_v27 }
 0x360   : > { %v2835_v52 = vpop.f32.mrf.mxu0  ;;  %v8313_v28 = vld [vmem:[#allocation3 + $0x109] sm:$0xff] }
 0x361   : > { %3071 = vst.msk [vmem:[#allocation3 + $0x111] sm:$0xff] %vm364_vm0, %v2984_v35  ;;  %v2881_v8 = vadd.f32 %v2829_v15, %v2603_v1  ;;  %6136 = vmatmul.msk.f32.gmra.mxu2 %vm364_vm0, %v3856_v5  ;;  %6119 = vmatmul.msk.f32.gmra.mxu1 %vm364_vm0, %v8313_v28 }
 0x362   : > { %6168 = vmatmul.msk.f32.gmra.mxu3 %vm364_vm0, %v8315_v51 }
 0x363   : > { %6201 = vmatmul.msk.f32.gmra.mxu0 %vm364_vm0, %v8321_v2  ;;  %v2917_v16 = vmul.f32 %v8058_v21, %v2881_v8 }
 0x364   : > { %v2276_v10 = vpop.f32.mrf.mxu2 }
 0x365   : > { %v2554_v47 = vpop.f32.mrf.mxu3  ;;  %v2953_v5 = vadd.f32 %v8063_v29, %v2917_v16  ;;  %v2326_v19 = vadd.f32 %v2276_v10, %v2047_v20  ;;  %v8375_v20 = vld [vmem:[#allocation3 + $0x7a] sm:$0xff] }
 0x366   : > { %v8331_v45 = vpop.f32.mrf.mxu1  ;;  %v9785_v10 = vld [vmem:[#allocation56_spill] sm:$0xff] }
 0x367   : > { %v2985_v23 = vmax.f32 %v2953_v5, 0.0  ;;  %v2604_v62 = vadd.f32 %v2554_v47, %v2326_v19  ;;  %v2050_v47 = vadd.f32 %v8147_v54, %v9785_v10 }
 0x368   : > { %v2838_v15 = vpop.f32.mrf.mxu0  ;;  %v8333_v14 = vld [vmem:[#allocation3 + $0x111] sm:$0xff] }
 0x369   : > { %3072 = vst.msk [vmem:[#allocation3 + $0x121] sm:$0xff] %vm364_vm0, %v2985_v23  ;;  %v2882_v49 = vadd.f32 %v2832_v41, %v2604_v62  ;;  %6137 = vmatmul.msk.f32.gmra.mxu2 %vm364_vm0, %v3857_v48  ;;  %6120 = vmatmul.msk.f32.gmra.mxu1 %vm364_vm0, %v8333_v14 }
 0x36a   : > { %6169 = vmatmul.msk.f32.gmra.mxu3 %vm364_vm0, %v8335_v40 }
 0x36b   : > { %6202 = vmatmul.msk.f32.gmra.mxu0 %vm364_vm0, %v8341_v12  ;;  %v2918_v50 = vmul.f32 %v8058_v21, %v2882_v49 }
 0x36c   : > { %v2279_v39 = vpop.f32.mrf.mxu2 }
 0x36d   : > { %v2557_v6 = vpop.f32.mrf.mxu3  ;;  %v2954_v48 = vadd.f32 %v8063_v29, %v2918_v50  ;;  %v2327_v63 = vadd.f32 %v2279_v39, %v2048_v25 }
 0x36e   : > { %v8351_v57 = vpop.f32.mrf.mxu1 }
 0x36f   : > { %v2986_v53 = vmax.f32 %v2954_v48, 0.0  ;;  %v2605_v4 = vadd.f32 %v2557_v6, %v2327_v63  ;;  %v8396_v6 = vld [vmem:[#allocation3 + $0x82] sm:$0xff]  ;;  %v8414_v63 = vld [vmem:[%s9538_s2] ss:$0 sm:$0xff] }
 0x370   : > { %v2841_v41 = vpop.f32.mrf.mxu0  ;;  %v8353_v31 = vld [vmem:[#allocation3 + $0x121] sm:$0xff] }
 0x371   : > { %3073 = vst.msk [vmem:[#allocation3 + $0x129] sm:$0xff] %vm364_vm0, %v2986_v53  ;;  %v2883_v37 = vadd.f32 %v2835_v52, %v2605_v4  ;;  %6138 = vmatmul.msk.f32.gmra.mxu2 %vm364_vm0, %v3858_v36  ;;  %6121 = vmatmul.msk.f32.gmra.mxu1 %vm364_vm0, %v8353_v31 }
 0x372   : > { %6170 = vmatmul.msk.f32.gmra.mxu3 %vm364_vm0, %v8355_v32 }
 0x373   : > { %6203 = vmatmul.msk.f32.gmra.mxu0 %vm364_vm0, %v8361_v30  ;;  %v2919_v34 = vmul.f32 %v8058_v21, %v2883_v37  ;;  %v8420_v37 = vld [vmem:[%s9539_s3] ss:$0 sm:$0xff] }
 0x374   : > { %v2282_v3 = vpop.f32.mrf.mxu2 }
 0x375   : > { %v2560_v43 = vpop.f32.mrf.mxu3  ;;  %v2955_v36 = vadd.f32 %v8063_v29, %v2919_v34  ;;  %v2328_v27 = vadd.f32 %v2282_v3, %v2049_v11 }
 0x376   : > { %v8371_v52 = vpop.f32.mrf.mxu1 }
 0x377   : > { %v2987_v35 = vmax.f32 %v2955_v36, 0.0  ;;  %v2606_v1 = vadd.f32 %v2560_v43, %v2328_v27  ;;  %v8427_v27 = vld [vmem:[#allocation3 + $0x92] sm:$0xff] }
 0x378   : > { %v2844_v8 = vpop.f32.mrf.mxu0  ;;  %v8373_v26 = vld [vmem:[#allocation3 + $0x129] sm:$0xff] }
 0x379   : > { %3074 = vst.msk [vmem:[#allocation3 + $0x139] sm:$0xff] %vm364_vm0, %v2987_v35  ;;  %v2884_v16 = vadd.f32 %v2838_v15, %v2606_v1  ;;  %6139 = vmatmul.msk.f32.gmra.mxu2 %vm364_vm0, %v8321_v2  ;;  %6122 = vmatmul.msk.f32.gmra.mxu1 %vm364_vm0, %v8373_v26  ;;  %v8434_v1 = vld [vmem:[#allocation3 + $0xb0] sm:$0xff] }
 0x37a   : > { %6171 = vmatmul.msk.f32.gmra.mxu3 %vm364_vm0, %v8375_v20 }
 0x37b   : > { %6204 = vmatmul.msk.f32.gmra.mxu0 %vm364_vm0, %v8382_v58  ;;  %v2920_v5 = vmul.f32 %v8058_v21, %v2884_v16  ;;  %v8403_v21 = vld [vmem:[#allocation3 + $0xa8] sm:$0xff]  ;;  %v9787_v16 = vld [vmem:[#allocation54_spill] sm:$0xff] }
 0x37c   : > { %v2285_v19 = vpop.f32.mrf.mxu2  ;;  %v2052_v10 = vadd.f32 %v8180_v38, %v9787_v16 }
 0x37d   : > { %v2563_v23 = vpop.f32.mrf.mxu3  ;;  %v2956_v62 = vadd.f32 %v8063_v29, %v2920_v5  ;;  %v2329_v15 = vadd.f32 %v2285_v19, %v2050_v47  ;;  %v9786_v29 = vld [vmem:[#allocation58_spill] sm:$0xff] }
 0x37e   : > { %v8392_v25 = vpop.f32.mrf.mxu1  ;;  %v2051_v54 = vadd.f32 %v8167_v44, %v9786_v29  ;;  %v8448_v29 = vld [vmem:[#allocation3 + $0x9a] sm:$0xff] }
 0x37f   : > { %v2988_v49 = vmax.f32 %v2956_v62, 0.0  ;;  %v2607_v22 = vadd.f32 %v2563_v23, %v2329_v15 }
 0x380   : > { %v2847_v50 = vpop.f32.mrf.mxu0  ;;  %v8394_v39 = vld [vmem:[#allocation3 + $0x139] sm:$0xff] }
 0x381   : > { %3075 = vst.msk [vmem:[#allocation3 + $0x141] sm:$0xff] %vm364_vm0, %v2988_v49  ;;  %v2885_v48 = vadd.f32 %v2841_v41, %v2607_v22  ;;  %6140 = vmatmul.msk.f32.gmra.mxu2 %vm364_vm0, %v8341_v12  ;;  %6123 = vmatmul.msk.f32.gmra.mxu1 %vm364_vm0, %v8394_v39 }
 0x382   : > { %6172 = vmatmul.msk.f32.gmra.mxu3 %vm364_vm0, %v8396_v6 }
 0x383   : > { %6205 = vmatmul.msk.f32.gmra.mxu0 %vm364_vm0, %v8403_v21  ;;  %v2921_v53 = vmul.f32 %v8414_v63, %v2885_v48 }
 0x384   : > { %v2288_v4 = vpop.f32.mrf.mxu2 }
 0x385   : > { %v2566_v41 = vpop.f32.mrf.mxu3  ;;  %v2957_v18 = vadd.f32 %v8420_v37, %v2921_v53  ;;  %v2330_v11 = vadd.f32 %v2288_v4, %v2051_v54  ;;  %v8450_v54 = vld [vmem:[#allocation3 + $0xc0] sm:$0xff]  ;;  %v4443_v53 = vld [vmem:[#allocation9 + $0xb8] sm:$0xff] }
 0x386   : > { %v8423_v44 = vpop.f32.mrf.mxu1  ;;  %9789 = vst [vmem:[#allocation57_spill] sm:$0xff] %v8450_v54  ;;  %v4722_v4 = vld [vmem:[#allocation9 + $0xd8] sm:$0xff]  ;;  %4552 = vmatpush.msra.mxu2 %v4443_v53 }
 0x387   : > { %v2989_v34 = vmax.f32 %v2957_v18, 0.0  ;;  %v2608_v3 = vadd.f32 %v2566_v41, %v2330_v11  ;;  %v5000_v41 = vld [vmem:[#allocation9 + $0xf8] sm:$0xff]  ;;  %v2053_v11 = vadd.f32 %v8195_v13, %v8031_v0  ;;  %4831 = vmatpush.msra.mxu3 %v4722_v4 }
 0x388   : > { %v2850_v43 = vpop.f32.mrf.mxu0  ;;  %v8425_v36 = vld [vmem:[#allocation3 + $0x141] sm:$0xff]  ;;  %5109 = vmatpush.msra.mxu0 %v5000_v41 }
 0x389   : > { %3076 = vst.msk [vmem:[#allocation3 + $0x151] sm:$0xff] %vm364_vm0, %v2989_v34  ;;  %v2886_v35 = vadd.f32 %v2844_v8, %v2608_v3  ;;  %6141 = vmatmul.msk.f32.gmra.mxu2 %vm364_vm0, %v8361_v30  ;;  %6124 = vmatmul.msk.f32.gmra.mxu1 %vm364_vm0, %v8425_v36  ;;  %v5278_v18 = vld [vmem:[#allocation9 + $0x118] sm:$0xff] }
 0x38a   : > { %6173 = vmatmul.msk.f32.gmra.mxu3 %vm364_vm0, %v8427_v27  ;;  %5387 = vmatpush.msra.mxu1 %v5278_v18  ;;  %v8476_v13 = vld [vmem:[#allocation3 + $0xc8] sm:$0xff] }
 0x38b   : > { %6206 = vmatmul.msk.f32.gmra.mxu0 %vm364_vm0, %v8434_v1  ;;  %v2922_v47 = vmul.f32 %v8414_v63, %v2886_v35  ;;  %9792 = vst [vmem:[#allocation64_spill] sm:$0xff] %v8476_v13 }
 0x38c   : > { %v2291_v8 = vpop.f32.mrf.mxu2 }
 0x38d   : > { %v2569_v5 = vpop.f32.mrf.mxu3  ;;  %v2958_v19 = vadd.f32 %v8420_v37, %v2922_v47  ;;  %v2331_v23 = vadd.f32 %v2291_v8, %v2052_v10 }
 0x38e   : > { %v8444_v49 = vpop.f32.mrf.mxu1 }
 0x38f   : > { %v2990_v62 = vmax.f32 %v2958_v19, 0.0  ;;  %v2609_v15 = vadd.f32 %v2569_v5, %v2331_v23  ;;  %v8469_v23 = vld [vmem:[#allocation3 + $0xaa] sm:$0xff] }
 0x390   : > { %v2853_v22 = vpop.f32.mrf.mxu0  ;;  %v8446_v48 = vld [vmem:[#allocation3 + $0x151] sm:$0xff]  ;;  %9791 = vst [vmem:[#allocation59_spill] sm:$0xff] %v8469_v23 }
 0x391   : > { %9788 = vst [vmem:[#allocation60_spill] sm:$0xff] %v8446_v48  ;;  %v2887_v38 = vadd.f32 %v2847_v50, %v2609_v15  ;;  %6142 = vmatmul.msk.f32.gmra.mxu2 %vm364_vm0, %v8382_v58  ;;  %6125 = vmatmul.msk.f32.gmra.mxu1 %vm364_vm0, %v8446_v48 }
 0x392   : > { %3077 = vst.msk [vmem:[#allocation3 + $0x159] sm:$0xff] %vm364_vm0, %v2990_v62  ;;  %6174 = vmatmul.msk.f32.gmra.mxu3 %vm364_vm0, %v8448_v29  ;;  %v2054_v62 = vadd.f32 %v8208_v56, %v8041_v24  ;;  %v8497_v24 = vld [vmem:[#allocation3 + $0xd8] sm:$0xff] }
 0x393   : > { %6207 = vmatmul.msk.f32.gmra.mxu0 %vm364_vm0, %v8450_v54  ;;  %v2923_v50 = vmul.f32 %v8414_v63, %v2887_v38  ;;  %9795 = vst [vmem:[#allocation63_spill] sm:$0xff] %v8497_v24  ;;  %v9796_v56 = vld [vmem:[#allocation55_spill] sm:$0xff] }
 0x394   : > { %v2294_v34 = vpop.f32.mrf.mxu2 }
 0x395   : > { %v2572_v3 = vpop.f32.mrf.mxu3  ;;  %v2959_v35 = vadd.f32 %v8420_v37, %v2923_v50  ;;  %v2332_v16 = vadd.f32 %v2294_v34, %v2053_v11 }
 0x396   : > { %v8465_v8 = vpop.f32.mrf.mxu1 }
 0x397   : > { %v2991_v10 = vmax.f32 %v2959_v35, 0.0  ;;  %v2610_v47 = vadd.f32 %v2572_v3, %v2332_v16  ;;  %v8490_v3 = vld [vmem:[#allocation3 + $0xb2] sm:$0xff]  ;;  %v2055_v16 = vadd.f32 %v8226_v46, %v9796_v56  ;;  %v8518_v46 = vld [vmem:[#allocation3 + $0xe0] sm:$0xff] }
 0x398   : > { %v2856_v5 = vpop.f32.mrf.mxu0  ;;  %9794 = vst [vmem:[#allocation66_spill] sm:$0xff] %v8490_v3 }
 0x399   : > { %v8467_v19 = vld [vmem:[#allocation3 + $0x159] sm:$0xff]  ;;  %3078 = vst.msk [vmem:[#allocation3 + $0x169] sm:$0xff] %vm364_vm0, %v2991_v10  ;;  %v2888_v0 = vadd.f32 %v2850_v43, %v2610_v47  ;;  %6143 = vmatmul.msk.f32.gmra.mxu2 %vm364_vm0, %v8403_v21 }
 0x39a   : > { %9790 = vst [vmem:[#allocation62_spill] sm:$0xff] %v8467_v19  ;;  %6175 = vmatmul.msk.f32.gmra.mxu3 %vm364_vm0, %v8469_v23  ;;  %6126 = vmatmul.msk.f32.gmra.mxu1 %vm364_vm0, %v8467_v19  ;;  %v4720_v23 = vld [vmem:[#allocation9 + $0xc8] sm:$0xff] }
 0x39b   : > { %6208 = vmatmul.msk.f32.gmra.mxu0 %vm364_vm0, %v8476_v13  ;;  %v2924_v15 = vmul.f32 %v8414_v63, %v2888_v0  ;;  %9799 = vst [vmem:[#allocation70_spill] sm:$0xff] %v8518_v46  ;;  %v8752_v48 = vld [vmem:[#allocation3 + $0x15a] sm:$0xff] }
 0x39c   : > { %v2297_v43 = vpop.f32.mrf.mxu2  ;;  %9837 = vst [vmem:[#allocation94_spill] sm:$0xff] %v8752_v48 }
 0x39d   : > { %v2575_v38 = vpop.f32.mrf.mxu3  ;;  %v2960_v53 = vadd.f32 %v8420_v37, %v2924_v15  ;;  %v2333_v4 = vadd.f32 %v2297_v43, %v2054_v62 }
 0x39e   : > { %v8486_v11 = vpop.f32.mrf.mxu1 }
 0x39f   : > { %v2992_v41 = vmax.f32 %v2960_v53, 0.0  ;;  %v2611_v18 = vadd.f32 %v2575_v38, %v2333_v4 }
 0x3a0   : > { %v4001_v50 = vpop.f32.mrf.mxu0  ;;  %v8488_v34 = vld [vmem:[#allocation3 + $0x169] sm:$0xff] }
 0x3a1   : > { %9793 = vst [vmem:[#allocation61_spill] sm:$0xff] %v8488_v34  ;;  %v2889_v35 = vadd.f32 %v2853_v22, %v2611_v18  ;;  %6144 = vmatmul.msk.f32.gmra.mxu2 %vm364_vm0, %v8434_v1 }
 0x3a2   : > { %3079 = vst.msk [vmem:[#allocation3 + $0x171] sm:$0xff] %vm364_vm0, %v2992_v41  ;;  %6176 = vmatmul.msk.f32.gmra.mxu3 %vm364_vm0, %v8490_v3  ;;  %6127 = vmatmul.msk.f32.gmra.mxu1 %vm364_vm0, %v8488_v34  ;;  %v8511_v41 = vld [vmem:[#allocation3 + $0xc2] sm:$0xff]  ;;  %v8676_v34 = vld [vmem:[#allocation3 + $0x12a] sm:$0xff] }
 0x3a3   : > { %6209 = vmatmul.msk.f32.gmra.mxu0 %vm364_vm0, %v8497_v24  ;;  %v2925_v10 = vmul.f32 %v8414_v63, %v2889_v35  ;;  %9798 = vst [vmem:[#allocation65_spill] sm:$0xff] %v8511_v41  ;;  %v8714_v3 = vld [vmem:[#allocation3 + $0x142] sm:$0xff] }
 0x3a4   : > { %v2300_v22 = vpop.f32.mrf.mxu2  ;;  %9824 = vst [vmem:[#allocation56_spill] sm:$0xff] %v8676_v34 }
 0x3a5   : > { %v2578_v47 = vpop.f32.mrf.mxu3  ;;  %v2961_v0 = vadd.f32 %v8420_v37, %v2925_v10  ;;  %v2334_v62 = vadd.f32 %v2300_v22, %v2055_v16  ;;  %9830 = vst [vmem:[#allocation87_spill] sm:$0xff] %v8714_v3 }
 0x3a6   : > { %v8507_v38 = vpop.f32.mrf.mxu1 }
 0x3a7   : > { %v2993_v15 = vmax.f32 %v2961_v0, 0.0  ;;  %v2612_v43 = vadd.f32 %v2578_v47, %v2334_v62 }
 0x3a8   : > { %v4004_v53 = vpop.f32.mrf.mxu0 }
 0x3a9   : > { %v8509_v4 = vld [vmem:[#allocation3 + $0x171] sm:$0xff]  ;;  %3080 = vst.msk [vmem:[#allocation3 + $0x181] sm:$0xff] %vm364_vm0, %v2993_v15  ;;  %v2890_v18 = vadd.f32 %v2856_v5, %v2612_v43  ;;  %6145 = vmatmul.msk.f32.gmra.mxu2 %vm364_vm0, %v8450_v54 }
 0x3aa   : > { %9797 = vst [vmem:[#allocation68_spill] sm:$0xff] %v8509_v4  ;;  %6177 = vmatmul.msk.f32.gmra.mxu3 %vm364_vm0, %v8511_v41  ;;  %6128 = vmatmul.msk.f32.gmra.mxu1 %vm364_vm0, %v8509_v4  ;;  %v8529_v15 = vld [vmem:[#allocation3 + $0xca] sm:$0xff]  ;;  %v8581_v4 = vld [vmem:[#allocation3 + $0xf2] sm:$0xff]  ;;  %v8657_v41 = vld [vmem:[#allocation3 + $0x122] sm:$0xff] }
 0x3ab   : > { %6210 = vmatmul.msk.f32.gmra.mxu0 %vm364_vm0, %v8518_v46  ;;  %v2926_v35 = vmul.f32 %v8414_v63, %v2890_v18  ;;  %9800 = vst [vmem:[#allocation67_spill] sm:$0xff] %v8529_v15  ;;  %v4129_v63 = vld [vmem:[#allocation3 + $0x19] sm:$0xff]  ;;  %v8536_v43 = vld [vmem:[#allocation3 + $0xf0] sm:$0xff] }
 0x3ac   : > { %v3477_v56 = vpop.f32.mrf.mxu2  ;;  %9801 = vst [vmem:[#allocation72_spill] sm:$0xff] %v8536_v43  ;;  %v4441_v54 = vld [vmem:[#allocation9 + $0xa8] sm:$0xff] }
 0x3ad   : > { %v3723_v16 = vpop.f32.mrf.mxu3  ;;  %v2962_v5 = vadd.f32 %v8420_v37, %v2926_v35  ;;  %v3478_v10 = vadd.f32 %v3477_v56, %v8238_v59  ;;  %9809 = vst [vmem:[#allocation80_spill] sm:$0xff] %v8581_v4 }
 0x3ae   : > { %v8527_v0 = vpop.f32.mrf.mxu1  ;;  %9821 = vst [vmem:[#allocation51_spill] sm:$0xff] %v8657_v41 }
 0x3af   : > { %v2994_v22 = vmax.f32 %v2962_v5, 0.0  ;;  %v3819_v47 = vadd.f32 %v3723_v16, %v3478_v10  ;;  %v8546_v10 = vld [vmem:[#allocation3 + $0xda] sm:$0xff] }
 0x3b0   : > { %v4007_v62 = vpop.f32.mrf.mxu0  ;;  %9803 = vst [vmem:[#allocation74_spill] sm:$0xff] %v8546_v10 }
 0x3b1   : > { %3081 = vst.msk [vmem:[#allocation3 + $0x189] sm:$0xff] %vm364_vm0, %v2994_v22  ;;  %6146 = vmatmul.msk.f32.gmra.mxu2 %vm364_vm0, %v8476_v13  ;;  %v8538_v37 = vadd.f32 %v4001_v50, %v3819_v47  ;;  %v4130_v50 = vld [vmem:[#allocation3 + $0x21] sm:$0xff]  ;;  %v8552_v22 = vld [vmem:[#allocation3 + $0xf8] sm:$0xff] }
 0x3b2   : > { %6178 = vmatmul.msk.f32.gmra.mxu3 %vm364_vm0, %v8529_v15  ;;  %6225 = vmatmul.msk.f32.vlgmr.msrb.gmra.mxu1 %vm364_vm0, %v4129_v63  ;;  %9804 = vst [vmem:[#allocation71_spill] sm:$0xff] %v8552_v22  ;;  %v8562_v15 = vld [vmem:[#allocation3 + $0xe2] sm:$0xff]  ;;  %v8695_v13 = vld [vmem:[#allocation3 + $0x13a] sm:$0xff] }
 0x3b3   : > { %9802 = vst [vmem:[#allocation69_spill] sm:$0xff] %v8538_v37  ;;  %6211 = vmatmul.msk.f32.gmra.mxu0 %vm364_vm0, %v8536_v43 }
 0x3b4   : > { %v3480_v59 = vpop.f32.mrf.mxu2  ;;  %9806 = vst [vmem:[#allocation73_spill] sm:$0xff] %v8562_v15 }
 0x3b5   : > { %v3726_v18 = vpop.f32.mrf.mxu3  ;;  %v3481_v35 = vadd.f32 %v3480_v59, %v8250_v33  ;;  %9827 = vst [vmem:[#allocation55_spill] sm:$0xff] %v8695_v13 }
 0x3b6   : > { %v8544_v16 = vpop.f32.mrf.mxu1 }
 0x3b7   : > { %v3820_v56 = vadd.f32 %v3726_v18, %v3481_v35 }
 0x3b8   : > { %v4010_v5 = vpop.f32.mrf.mxu0 }
 0x3b9   : > { %6147 = vmatmul.msk.f32.gmra.mxu2 %vm364_vm0, %v8497_v24  ;;  %v8554_v47 = vadd.f32 %v4004_v53, %v3820_v56  ;;  %v8568_v53 = vld [vmem:[#allocation3 + $0x31] sm:$0xff]  ;;  %v8570_v56 = vld [vmem:[#allocation3 + $0x108] sm:$0xff] }
 0x3ba   : > { %6179 = vmatmul.msk.f32.gmra.mxu3 %vm364_vm0, %v8546_v10  ;;  %6226 = vmatmul.msk.f32.gmra.mxu1 %vm364_vm0, %v4130_v50  ;;  %9807 = vst [vmem:[#allocation78_spill] sm:$0xff] %v8570_v56  ;;  %v4442_v10 = vld [vmem:[#allocation9 + $0xb0] sm:$0xff]  ;;  %v8619_v24 = vld [vmem:[#allocation3 + $0x10a] sm:$0xff] }
 0x3bb   : > { %9805 = vst [vmem:[#allocation76_spill] sm:$0xff] %v8554_v47  ;;  %6212 = vmatmul.msk.f32.gmra.mxu0 %vm364_vm0, %v8552_v22  ;;  %4553 = vmatpush.msra.mxu2 %v4442_v10 }
 0x3bc   : > { %v3483_v33 = vpop.f32.mrf.mxu2  ;;  %9815 = vst [vmem:[#allocation84_spill] sm:$0xff] %v8619_v24 }
 0x3bd   : > { %v3729_v63 = vpop.f32.mrf.mxu3  ;;  %v3484_v59 = vadd.f32 %v3483_v33, %v8261_v61  ;;  %4554 = vmatpush.msra.mxu2 %v4441_v54 }
 0x3be   : > { %v8560_v35 = vpop.f32.mrf.mxu1 }
 0x3bf   : > { %v3821_v18 = vadd.f32 %v3729_v63, %v3484_v59 }
 0x3c0   : > { %v4013_v37 = vpop.f32.mrf.mxu0 }
 0x3c1   : > { %6148 = vmatmul.msk.f32.gmra.mxu2 %vm364_vm0, %v8518_v46  ;;  %v8572_v50 = vadd.f32 %v4007_v62, %v3821_v18  ;;  %v4721_v46 = vld [vmem:[#allocation9 + $0xd0] sm:$0xff]  ;;  %v8589_v18 = vld [vmem:[#allocation3 + $0x110] sm:$0xff] }
 0x3c2   : > { %6180 = vmatmul.msk.f32.gmra.mxu3 %vm364_vm0, %v8562_v15  ;;  %6227 = vmatmul.msk.f32.gmra.mxu1 %vm364_vm0, %v8568_v53  ;;  %v8587_v62 = vld [vmem:[#allocation3 + $0x39] sm:$0xff]  ;;  %9810 = vst [vmem:[#allocation77_spill] sm:$0xff] %v8589_v18 }
 0x3c3   : > { %9808 = vst [vmem:[#allocation75_spill] sm:$0xff] %v8572_v50  ;;  %6213 = vmatmul.msk.f32.gmra.mxu0 %vm364_vm0, %v8570_v56  ;;  %4832 = vmatpush.msra.mxu3 %v4721_v46 }
 0x3c4   : > { %v3486_v61 = vpop.f32.mrf.mxu2 }
 0x3c5   : > { %v3732_v33 = vpop.f32.mrf.mxu3  ;;  %v3487_v63 = vadd.f32 %v3486_v61, %v8272_v7  ;;  %4833 = vmatpush.msra.mxu3 %v4720_v23 }
 0x3c6   : > { %v8579_v47 = vpop.f32.mrf.mxu1 }
 0x3c7   : > { %v3822_v59 = vadd.f32 %v3732_v33, %v3487_v63 }
 0x3c8   : > { %v4016_v15 = vpop.f32.mrf.mxu0 }
 0x3c9   : > { %6149 = vmatmul.msk.f32.gmra.mxu2 %vm364_vm0, %v8536_v43  ;;  %v8591_v7 = vadd.f32 %v4010_v5, %v3822_v59  ;;  %v8600_v43 = vld [vmem:[#allocation3 + $0xfa] sm:$0xff]  ;;  %v8606_v5 = vld [vmem:[#allocation3 + $0x49] sm:$0xff] }
 0x3ca   : > { %6181 = vmatmul.msk.f32.gmra.mxu3 %vm364_vm0, %v8581_v4  ;;  %6228 = vmatmul.msk.f32.gmra.mxu1 %vm364_vm0, %v8587_v62  ;;  %v4999_v4 = vld [vmem:[#allocation9 + $0xf0] sm:$0xff]  ;;  %9812 = vst [vmem:[#allocation79_spill] sm:$0xff] %v8600_v43 }
 0x3cb   : > { %9811 = vst [vmem:[#allocation82_spill] sm:$0xff] %v8591_v7  ;;  %6214 = vmatmul.msk.f32.gmra.mxu0 %vm364_vm0, %v8589_v18  ;;  %v8608_v59 = vld [vmem:[#allocation3 + $0x120] sm:$0xff] }
 0x3cc   : > { %v3489_v10 = vpop.f32.mrf.mxu2  ;;  %5110 = vmatpush.msra.mxu0 %v4999_v4  ;;  %9813 = vst [vmem:[#allocation81_spill] sm:$0xff] %v8608_v59 }
 0x3cd   : > { %v3735_v46 = vpop.f32.mrf.mxu3  ;;  %v3490_v61 = vadd.f32 %v3489_v10, %v8283_v42  ;;  %v5277_v42 = vld [vmem:[#allocation9 + $0x110] sm:$0xff] }
 0x3ce   : > { %v8598_v63 = vpop.f32.mrf.mxu1  ;;  %5388 = vmatpush.msra.mxu1 %v5277_v42 }
 0x3cf   : > { %v3823_v33 = vadd.f32 %v3735_v46, %v3490_v61 }
 0x3d0   : > { %v4019_v50 = vpop.f32.mrf.mxu0 }
 0x3d1   : > { %6150 = vmatmul.msk.f32.gmra.mxu2 %vm364_vm0, %v8552_v22  ;;  %v8610_v7 = vadd.f32 %v4013_v37, %v3823_v33  ;;  %v8625_v37 = vld [vmem:[#allocation3 + $0x51] sm:$0xff]  ;;  %v8627_v33 = vld [vmem:[#allocation3 + $0x128] sm:$0xff] }
 0x3d2   : > { %6182 = vmatmul.msk.f32.gmra.mxu3 %vm364_vm0, %v8600_v43  ;;  %6229 = vmatmul.msk.f32.gmra.mxu1 %vm364_vm0, %v8606_v5  ;;  %9816 = vst [vmem:[#allocation46_spill] sm:$0xff] %v8627_v33 }
 0x3d3   : > { %9814 = vst [vmem:[#allocation83_spill] sm:$0xff] %v8610_v7  ;;  %6215 = vmatmul.msk.f32.gmra.mxu0 %vm364_vm0, %v8608_v59 }
 0x3d4   : > { %v3492_v4 = vpop.f32.mrf.mxu2 }
 0x3d5   : > { %v3738_v10 = vpop.f32.mrf.mxu3  ;;  %v3493_v46 = vadd.f32 %v3492_v4, %v8294_v9 }
 0x3d6   : > { %v8617_v43 = vpop.f32.mrf.mxu1 }
 0x3d7   : > { %v3824_v61 = vadd.f32 %v3738_v10, %v3493_v46 }
 0x3d8   : > { %v4022_v22 = vpop.f32.mrf.mxu0 }
 0x3d9   : > { %6151 = vmatmul.msk.f32.gmra.mxu2 %vm364_vm0, %v8570_v56  ;;  %v8629_v42 = vadd.f32 %v4016_v15, %v3824_v61  ;;  %v8638_v56 = vld [vmem:[#allocation3 + $0x112] sm:$0xff]  ;;  %v8644_v15 = vld [vmem:[#allocation3 + $0x61] sm:$0xff] }
 0x3da   : > { %6183 = vmatmul.msk.f32.gmra.mxu3 %vm364_vm0, %v8619_v24  ;;  %6230 = vmatmul.msk.f32.gmra.mxu1 %vm364_vm0, %v8625_v37  ;;  %9818 = vst [vmem:[#allocation48_spill] sm:$0xff] %v8638_v56  ;;  %v8646_v61 = vld [vmem:[#allocation3 + $0x138] sm:$0xff] }
 0x3db   : > { %9817 = vst [vmem:[#allocation47_spill] sm:$0xff] %v8629_v42  ;;  %6216 = vmatmul.msk.f32.gmra.mxu0 %vm364_vm0, %v8627_v33 }
 0x3dc   : > { %v3495_v9 = vpop.f32.mrf.mxu2  ;;  %9819 = vst [vmem:[#allocation49_spill] sm:$0xff] %v8646_v61 }
 0x3dd   : > { %v3741_v4 = vpop.f32.mrf.mxu3  ;;  %v3496_v10 = vadd.f32 %v3495_v9, %v8311_v17 }
 0x3de   : > { %v8636_v7 = vpop.f32.mrf.mxu1 }
 0x3df   : > { %v3825_v46 = vadd.f32 %v3741_v4, %v3496_v10 }
 0x3e0   : > { %v4025_v24 = vpop.f32.mrf.mxu0 }
 0x3e1   : > { %6152 = vmatmul.msk.f32.gmra.mxu2 %vm364_vm0, %v8589_v18  ;;  %v8648_v42 = vadd.f32 %v4019_v50, %v3825_v46  ;;  %v8663_v50 = vld [vmem:[#allocation3 + $0x69] sm:$0xff]  ;;  %v8665_v46 = vld [vmem:[#allocation3 + $0x140] sm:$0xff] }
 0x3e2   : > { %6184 = vmatmul.msk.f32.gmra.mxu3 %vm364_vm0, %v8638_v56  ;;  %6231 = vmatmul.msk.f32.gmra.mxu1 %vm364_vm0, %v8644_v15  ;;  %9822 = vst [vmem:[#allocation52_spill] sm:$0xff] %v8665_v46 }
 0x3e3   : > { %9820 = vst [vmem:[#allocation50_spill] sm:$0xff] %v8648_v42  ;;  %6217 = vmatmul.msk.f32.gmra.mxu0 %vm364_vm0, %v8646_v61 }
 0x3e4   : > { %v3498_v17 = vpop.f32.mrf.mxu2 }
 0x3e5   : > { %v3744_v9 = vpop.f32.mrf.mxu3  ;;  %v3499_v4 = vadd.f32 %v3498_v17, %v8331_v45 }
 0x3e6   : > { %v8655_v18 = vpop.f32.mrf.mxu1 }
 0x3e7   : > { %v3826_v10 = vadd.f32 %v3744_v9, %v3499_v4 }
 0x3e8   : > { %v4028_v56 = vpop.f32.mrf.mxu0 }
 0x3e9   : > { %6153 = vmatmul.msk.f32.gmra.mxu2 %vm364_vm0, %v8608_v59  ;;  %v8667_v42 = vadd.f32 %v4022_v22, %v3826_v10  ;;  %v8682_v22 = vld [vmem:[#allocation3 + $0x79] sm:$0xff]  ;;  %v8684_v10 = vld [vmem:[#allocation3 + $0x150] sm:$0xff] }
 0x3ea   : > { %6185 = vmatmul.msk.f32.gmra.mxu3 %vm364_vm0, %v8657_v41  ;;  %6232 = vmatmul.msk.f32.gmra.mxu1 %vm364_vm0, %v8663_v50  ;;  %9825 = vst [vmem:[#allocation58_spill] sm:$0xff] %v8684_v10 }
 0x3eb   : > { %9823 = vst [vmem:[#allocation53_spill] sm:$0xff] %v8667_v42  ;;  %6218 = vmatmul.msk.f32.gmra.mxu0 %vm364_vm0, %v8665_v46 }
 0x3ec   : > { %v3501_v45 = vpop.f32.mrf.mxu2 }
 0x3ed   : > { %v3747_v17 = vpop.f32.mrf.mxu3  ;;  %v3502_v9 = vadd.f32 %v3501_v45, %v8351_v57 }
 0x3ee   : > { %v8674_v59 = vpop.f32.mrf.mxu1 }
 0x3ef   : > { %v3827_v4 = vadd.f32 %v3747_v17, %v3502_v9 }
 0x3f0   : > { %v4031_v41 = vpop.f32.mrf.mxu0 }
 0x3f1   : > { %6154 = vmatmul.msk.f32.gmra.mxu2 %vm364_vm0, %v8627_v33  ;;  %v8686_v42 = vadd.f32 %v4025_v24, %v3827_v4  ;;  %v8701_v24 = vld [vmem:[#allocation3 + $0x81] sm:$0xff]  ;;  %v8703_v4 = vld [vmem:[#allocation3 + $0x158] sm:$0xff] }
 0x3f2   : > { %6186 = vmatmul.msk.f32.gmra.mxu3 %vm364_vm0, %v8676_v34  ;;  %6233 = vmatmul.msk.f32.gmra.mxu1 %vm364_vm0, %v8682_v22  ;;  %9828 = vst [vmem:[#allocation85_spill] sm:$0xff] %v8703_v4 }
 0x3f3   : > { %9826 = vst [vmem:[#allocation54_spill] sm:$0xff] %v8686_v42  ;;  %6219 = vmatmul.msk.f32.gmra.mxu0 %vm364_vm0, %v8684_v10 }
 0x3f4   : > { %v3504_v57 = vpop.f32.mrf.mxu2 }
 0x3f5   : > { %v3750_v45 = vpop.f32.mrf.mxu3  ;;  %v3505_v17 = vadd.f32 %v3504_v57, %v8371_v52 }
 0x3f6   : > { %v8693_v33 = vpop.f32.mrf.mxu1 }
 0x3f7   : > { %v3828_v9 = vadd.f32 %v3750_v45, %v3505_v17 }
 0x3f8   : > { %v4034_v34 = vpop.f32.mrf.mxu0 }
 0x3f9   : > { %6155 = vmatmul.msk.f32.gmra.mxu2 %vm364_vm0, %v8646_v61  ;;  %v8705_v42 = vadd.f32 %v4028_v56, %v3828_v9  ;;  %v8720_v56 = vld [vmem:[#allocation3 + $0x91] sm:$0xff]  ;;  %v8722_v9 = vld [vmem:[#allocation3 + $0x168] sm:$0xff] }
 0x3fa   : > { %6187 = vmatmul.msk.f32.gmra.mxu3 %vm364_vm0, %v8695_v13  ;;  %6234 = vmatmul.msk.f32.gmra.mxu1 %vm364_vm0, %v8701_v24  ;;  %9831 = vst [vmem:[#allocation88_spill] sm:$0xff] %v8722_v9 }
 0x3fb   : > { %9829 = vst [vmem:[#allocation86_spill] sm:$0xff] %v8705_v42  ;;  %6220 = vmatmul.msk.f32.gmra.mxu0 %vm364_vm0, %v8703_v4 }
 0x3fc   : > { %v3507_v52 = vpop.f32.mrf.mxu2 }
 0x3fd   : > { %v3753_v57 = vpop.f32.mrf.mxu3  ;;  %v3508_v45 = vadd.f32 %v3507_v52, %v8392_v25 }
 0x3fe   : > { %v8712_v61 = vpop.f32.mrf.mxu1 }
 0x3ff   : > { %v3829_v17 = vadd.f32 %v3753_v57, %v3508_v45  ;;  %v4998_v45 = vld [vmem:[#allocation9 + $0xe8] sm:$0xff] }
 0x400   : > { %v4037_v13 = vpop.f32.mrf.mxu0  ;;  %5111 = vmatpush.msra.mxu0 %v4998_v45 }
 0x401   : > { %6156 = vmatmul.msk.f32.gmra.mxu2 %vm364_vm0, %v8665_v46  ;;  %v8724_v42 = vadd.f32 %v4031_v41, %v3829_v17  ;;  %v8733_v41 = vld [vmem:[#allocation3 + $0x152] sm:$0xff] }
 0x402   : > { %6188 = vmatmul.msk.f32.gmra.mxu3 %vm364_vm0, %v8714_v3  ;;  %6235 = vmatmul.msk.f32.gmra.mxu1 %vm364_vm0, %v8720_v56  ;;  %9834 = vst [vmem:[#allocation91_spill] sm:$0xff] %v8733_v41  ;;  %v4997_v17 = vld [vmem:[#allocation9 + $0xe0] sm:$0xff] }
 0x403   : > { %9832 = vst [vmem:[#allocation89_spill] sm:$0xff] %v8724_v42  ;;  %6221 = vmatmul.msk.f32.gmra.mxu0 %vm364_vm0, %v8722_v9  ;;  %v4440_v42 = vld [vmem:[#allocation9 + $0xa0] sm:$0xff] }
 0x404   : > { %v3510_v25 = vpop.f32.mrf.mxu2  ;;  %5112 = vmatpush.msra.mxu0 %v4997_v17  ;;  %4555 = vmatpush.msra.mxu2 %v4440_v42  ;;  %v8760_v42 = vld [vmem:[#allocation3 + $0x180] sm:$0xff] }
 0x405   : > { %v3756_v52 = vpop.f32.mrf.mxu3  ;;  %v3511_v57 = vadd.f32 %v3510_v25, %v8423_v44  ;;  %v8739_v44 = vld [vmem:[#allocation3 + $0x99] sm:$0xff]  ;;  %v8741_v25 = vld [vmem:[#allocation3 + $0x170] sm:$0xff]  ;;  %9838 = vst [vmem:[#allocation95_spill] sm:$0xff] %v8760_v42 }
 0x406   : > { %v8731_v19 = vpop.f32.mrf.mxu1  ;;  %9835 = vst [vmem:[#allocation92_spill] sm:$0xff] %v8741_v25 }
 0x407   : > { %v3830_v46 = vadd.f32 %v3756_v52, %v3511_v57  ;;  %9833 = vst [vmem:[#allocation90_spill] sm:$0xff] %v8731_v19  ;;  %v4719_v52 = vld [vmem:[#allocation9 + $0xc0] sm:$0xff] }
 0x408   : > { %v4040_v3 = vpop.f32.mrf.mxu0  ;;  %4834 = vmatpush.msra.mxu3 %v4719_v52 }
 0x409   : > { %6157 = vmatmul.msk.f32.gmra.mxu2 %vm364_vm0, %v8684_v10  ;;  %v8743_v57 = vadd.f32 %v4034_v34, %v3830_v46  ;;  %v8758_v34 = vld [vmem:[#allocation3 + $0xa9] sm:$0xff] }
 0x40a   : > { %6189 = vmatmul.msk.f32.gmra.mxu3 %vm364_vm0, %v8733_v41  ;;  %6236 = vmatmul.msk.f32.gmra.mxu1 %vm364_vm0, %v8739_v44 }
 0x40b   : > { %9836 = vst [vmem:[#allocation93_spill] sm:$0xff] %v8743_v57  ;;  %6222 = vmatmul.msk.f32.gmra.mxu0 %vm364_vm0, %v8741_v25 }
 0x40c   : > { %v3513_v54 = vpop.f32.mrf.mxu2 }
 0x40d   : > { %v3759_v23 = vpop.f32.mrf.mxu3  ;;  %v3514_v45 = vadd.f32 %v3513_v54, %v8444_v49  ;;  %v5276_v49 = vld [vmem:[#allocation9 + $0x108] sm:$0xff] }
 0x40e   : > { %v8750_v10 = vpop.f32.mrf.mxu1  ;;  %5389 = vmatpush.msra.mxu1 %v5276_v49 }
 0x40f   : > { %v3831_v41 = vadd.f32 %v3759_v23, %v3514_v45 }
 0x410   : > { %v4043_v19 = vpop.f32.mrf.mxu0 }
 0x411   : > { %6158 = vmatmul.msk.f32.gmra.mxu2 %vm364_vm0, %v8703_v4  ;;  %v8762_v46 = vadd.f32 %v4037_v13, %v3831_v41  ;;  %v8777_v13 = vld [vmem:[#allocation3 + $0xb1] sm:$0xff]  ;;  %v8779_v41 = vld [vmem:[#allocation3 + $0x188] sm:$0xff]  ;;  %v8820_v4 = vld [vmem:[#allocation3 + $0xd9] sm:$0xff] }
 0x412   : > { %6190 = vmatmul.msk.f32.gmra.mxu3 %vm364_vm0, %v8752_v48  ;;  %6237 = vmatmul.msk.f32.gmra.mxu1 %vm364_vm0, %v8758_v34  ;;  %v8771_v48 = vld [vmem:[#allocation3 + $0x16a] sm:$0xff]  ;;  %9841 = vst [vmem:[#allocation98_spill] sm:$0xff] %v8779_v41 }
 0x413   : > { %9839 = vst [vmem:[#allocation96_spill] sm:$0xff] %v8762_v46  ;;  %6223 = vmatmul.msk.f32.gmra.mxu0 %vm364_vm0, %v8760_v42 }
 0x414   : > { %v3516_v17 = vpop.f32.mrf.mxu2  ;;  %9840 = vst [vmem:[#allocation97_spill] sm:$0xff] %v8771_v48 }
 0x415   : > { %v3762_v52 = vpop.f32.mrf.mxu3  ;;  %v3517_v54 = vadd.f32 %v3516_v17, %v8465_v8 }
 0x417   : > { %v3832_v23 = vadd.f32 %v3762_v52, %v3517_v54  ;;  %v8769_v45 = vpop.f32.mrf.mxu1 }
 0x418   : > { %v4046_v57 = vpop.f32.mrf.mxu0 }
 0x419   : > { %6159 = vmatmul.msk.f32.gmra.mxu2 %vm364_vm0, %v8722_v9  ;;  %v8781_v49 = vadd.f32 %v4040_v3, %v3832_v23  ;;  %v8796_v3 = vld [vmem:[#allocation3 + $0xc1] sm:$0xff]  ;;  %v8807_v9 = vld [vmem:[#allocation3 + $0xc9] sm:$0xff] }
 0x41a   : > { %6191 = vmatmul.msk.f32.gmra.mxu3 %vm364_vm0, %v8771_v48  ;;  %6238 = vmatmul.msk.f32.gmra.mxu1 %vm364_vm0, %v8777_v13  ;;  %v8790_v48 = vld [vmem:[#allocation3 + $0x172] sm:$0xff] }
 0x41b   : > { %9842 = vst [vmem:[#allocation99_spill] sm:$0xff] %v8781_v49  ;;  %6224 = vmatmul.msk.f32.gmra.mxu0 %vm364_vm0, %v8779_v41 }
 0x41c   : > { %v3519_v8 = vpop.f32.mrf.mxu2  ;;  %9843 = vst [vmem:[#allocation100_spill] sm:$0xff] %v8790_v48 }
 0x41d   : > { %v3765_v17 = vpop.f32.mrf.mxu3  ;;  %v3520_v52 = vadd.f32 %v3519_v8, %v8486_v11 }
 0x41f   : > { %v3833_v54 = vadd.f32 %v3765_v17, %v3520_v52  ;;  %v8788_v46 = vpop.f32.mrf.mxu1 }
 0x420   : > { %v4049_v42 = vpop.f32.mrf.mxu0 }
 0x421   : > { %6160 = vmatmul.msk.f32.gmra.mxu2 %vm364_vm0, %v8741_v25  ;;  %v8798_v23 = vadd.f32 %v4043_v19, %v3833_v54  ;;  %v4407_v25 = vld [vmem:[#allocation3 + $0x1a] sm:$0xff] }
 0x422   : > { %6192 = vmatmul.msk.f32.gmra.mxu3 %vm364_vm0, %v8790_v48  ;;  %6239 = vmatmul.msk.f32.gmra.mxu1 %vm364_vm0, %v8796_v3  ;;  %v4686_v48 = vld [vmem:[#allocation3 + $0x30] sm:$0xff] }
 0x423   : > { %9844 = vst [vmem:[#allocation101_spill] sm:$0xff] %v8798_v23  ;;  %6321 = vmatmul.msk.f32.vlgmr.msra.gmra.mxu0 %vm364_vm0, %v8568_v53  ;;  %v4408_v23 = vld [vmem:[#allocation3 + $0x22] sm:$0xff] }
 0x424   : > { %v3522_v11 = vpop.f32.mrf.mxu2 }
 0x425   : > { %v3768_v8 = vpop.f32.mrf.mxu3  ;;  %v3523_v17 = vadd.f32 %v3522_v11, %v8507_v38 }
 0x427   : > { %v3834_v52 = vadd.f32 %v3768_v8, %v3523_v17  ;;  %v8805_v49 = vpop.f32.mrf.mxu1 }
 0x428   : > { %v4052_v41 = vpop.f32.mrf.mxu0 }
 0x429   : > { %6257 = vmatmul.msk.f32.vlgmr.msra.gmra.mxu2 %vm364_vm0, %v4407_v25  ;;  %v8811_v19 = vadd.f32 %v4046_v57, %v3834_v52  ;;  %v4687_v25 = vld [vmem:[#allocation3 + $0x38] sm:$0xff] }
 0x42a   : > { %6289 = vmatmul.msk.f32.vlgmr.msra.gmra.mxu3 %vm364_vm0, %v4686_v48  ;;  %6240 = vmatmul.msk.f32.gmra.mxu1 %vm364_vm0, %v8807_v9 }
 0x42b   : > { %9845 = vst [vmem:[#allocation102_spill] sm:$0xff] %v8811_v19  ;;  %6322 = vmatmul.msk.f32.gmra.mxu0 %vm364_vm0, %v8587_v62  ;;  %v8849_v19 = vld [vmem:[#allocation3 + $0xf1] sm:$0xff] }
 0x42c   : > { %v3525_v38 = vpop.f32.mrf.mxu2 }
 0x42d   : > { %v3771_v53 = vpop.f32.mrf.mxu3  ;;  %v3526_v54 = vadd.f32 %v3525_v38, %v8527_v0 }
 0x42f   : > { %v3835_v11 = vadd.f32 %v3771_v53, %v3526_v54  ;;  %v8818_v8 = vpop.f32.mrf.mxu1  ;;  %v8833_v54 = vld [vmem:[#allocation3 + $0x32] sm:$0xff] }
 0x430   : > { %v4055_v17 = vpop.f32.mrf.mxu0 }
 0x431   : > { %6258 = vmatmul.msk.f32.gmra.mxu2 %vm364_vm0, %v4408_v23  ;;  %v8824_v48 = vadd.f32 %v4049_v42, %v3835_v11  ;;  %v4688_v23 = vld [vmem:[#allocation3 + $0x48] sm:$0xff] }
 0x432   : > { %6290 = vmatmul.msk.f32.gmra.mxu3 %vm364_vm0, %v4687_v25  ;;  %6241 = vmatmul.msk.f32.gmra.mxu1 %vm364_vm0, %v8820_v4  ;;  %v8835_v25 = vld [vmem:[#allocation3 + $0xe1] sm:$0xff] }
 0x433   : > { %9846 = vst [vmem:[#allocation103_spill] sm:$0xff] %v8824_v48  ;;  %6323 = vmatmul.msk.f32.gmra.mxu0 %vm364_vm0, %v8606_v5  ;;  %v4689_v48 = vld [vmem:[#allocation3 + $0x50] sm:$0xff] }
 0x434   : > { %v3528_v0 = vpop.f32.mrf.mxu2 }
 0x435   : > { %v3774_v62 = vpop.f32.mrf.mxu3  ;;  %v3529_v57 = vadd.f32 %v3528_v0, %v8544_v16 }
 0x437   : > { %v3836_v52 = vadd.f32 %v3774_v62, %v3529_v57  ;;  %v8831_v38 = vpop.f32.mrf.mxu1 }
 0x438   : > { %v4058_v53 = vpop.f32.mrf.mxu0 }
 0x439   : > { %6259 = vmatmul.msk.f32.gmra.mxu2 %vm364_vm0, %v8833_v54  ;;  %v8840_v42 = vadd.f32 %v4052_v41, %v3836_v52 }
 0x43a   : > { %6291 = vmatmul.msk.f32.gmra.mxu3 %vm364_vm0, %v4688_v23  ;;  %6242 = vmatmul.msk.f32.gmra.mxu1 %vm364_vm0, %v8835_v25  ;;  %v6478_v23 = vld [vmem:[#allocation3 + $0x3a] sm:$0xff] }
 0x43b   : > { %9847 = vst [vmem:[#allocation104_spill] sm:$0xff] %v8840_v42  ;;  %6324 = vmatmul.msk.f32.gmra.mxu0 %vm364_vm0, %v8625_v37  ;;  %v4690_v42 = vld [vmem:[#allocation3 + $0x60] sm:$0xff] }
 0x43c   : > { %v3531_v16 = vpop.f32.mrf.mxu2 }
 0x43d   : > { %v3777_v5 = vpop.f32.mrf.mxu3  ;;  %v3532_v11 = vadd.f32 %v3531_v16, %v8560_v35 }
 0x43f   : > { %v3837_v0 = vadd.f32 %v3777_v5, %v3532_v11  ;;  %v8847_v62 = vpop.f32.mrf.mxu1 }
 0x440   : > { %v4061_v57 = vpop.f32.mrf.mxu0 }
 0x441   : > { %6260 = vmatmul.msk.f32.gmra.mxu2 %vm364_vm0, %v6478_v23  ;;  %v8853_v41 = vadd.f32 %v4055_v17, %v3837_v0 }
 0x442   : > { %6292 = vmatmul.msk.f32.gmra.mxu3 %vm364_vm0, %v4689_v48  ;;  %6243 = vmatmul.msk.f32.gmra.mxu1 %vm364_vm0, %v8849_v19 }
 0x443   : > { %6325 = vmatmul.msk.f32.gmra.mxu0 %vm364_vm0, %v8644_v15 }
 0x444   : > { %v3534_v35 = vpop.f32.mrf.mxu2 }
 0x445   : > { %v3780_v37 = vpop.f32.mrf.mxu3  ;;  %v3535_v52 = vadd.f32 %v3534_v35, %v8579_v47 }
 0x447   : > { %v3838_v16 = vadd.f32 %v3780_v37, %v3535_v52  ;;  %v8860_v5 = vpop.f32.mrf.mxu1  ;;  %v4691_v37 = vld [vmem:[#allocation3 + $0x68] sm:$0xff] }
 0x448   : > { %v4064_v11 = vpop.f32.mrf.mxu0 }
 0x449   : > { %6261 = vmatmul.msk.f32.gmra.mxu2 %vm364_vm0, %v8298_v55  ;;  %v8865_v17 = vadd.f32 %v4058_v53, %v3838_v16 }
 0x44a   : > { %6293 = vmatmul.msk.f32.gmra.mxu3 %vm364_vm0, %v4690_v42  ;;  %6244 = vmatmul.msk.f32.gmra.mxu1 %vm364_vm0, %v8296_v60  ;;  %v5275_v60 = vld [vmem:[#allocation9 + $0x100] sm:$0xff] }
 0x44b   : > { %6326 = vmatmul.msk.f32.gmra.mxu0 %vm364_vm0, %v8663_v50  ;;  %5390 = vmatpush.msra.mxu1 %v5275_v60 }
 0x44c   : > { %v3537_v15 = vpop.f32.mrf.mxu2 }
 0x44d   : > { %v3783_v47 = vpop.f32.mrf.mxu3  ;;  %v3538_v48 = vadd.f32 %v3537_v15, %v8598_v63 }
 0x44f   : > { %v3839_v0 = vadd.f32 %v3783_v47, %v3538_v48  ;;  %v8872_v23 = vpop.f32.mrf.mxu1 }
 0x450   : > { %v4067_v35 = vpop.f32.mrf.mxu0 }
 0x451   : > { %6262 = vmatmul.msk.f32.gmra.mxu2 %vm364_vm0, %v8315_v51  ;;  %v8877_v55 = vadd.f32 %v4061_v57, %v3839_v0 }
 0x452   : > { %6294 = vmatmul.msk.f32.gmra.mxu3 %vm364_vm0, %v4691_v37  ;;  %6245 = vmatmul.msk.f32.gmra.mxu1 %vm364_vm0, %v8313_v28 }
 0x453   : > { %6327 = vmatmul.msk.f32.gmra.mxu0 %vm364_vm0, %v8682_v22 }
 0x454   : > { %v3540_v63 = vpop.f32.mrf.mxu2 }
 0x455   : > { %v3786_v50 = vpop.f32.mrf.mxu3  ;;  %v3541_v53 = vadd.f32 %v3540_v63, %v8617_v43 }
 0x457   : > { %v3840_v42 = vadd.f32 %v3786_v50, %v3541_v53  ;;  %v8884_v52 = vpop.f32.mrf.mxu1 }
 0x458   : > { %v4070_v51 = vpop.f32.mrf.mxu0 }
 0x459   : > { %6263 = vmatmul.msk.f32.gmra.mxu2 %vm364_vm0, %v8335_v40  ;;  %v8890_v28 = vadd.f32 %v4064_v11, %v3840_v42 }
 0x45a   : > { %6295 = vmatmul.msk.f32.gmra.mxu3 %vm364_vm0, %v8321_v2  ;;  %6246 = vmatmul.msk.f32.gmra.mxu1 %vm364_vm0, %v8333_v14 }
 0x45b   : > { %6328 = vmatmul.msk.f32.gmra.mxu0 %vm364_vm0, %v8701_v24 }
 0x45c   : > { %v3543_v22 = vpop.f32.mrf.mxu2 }
 0x45d   : > { %v3789_v43 = vpop.f32.mrf.mxu3  ;;  %v3544_v57 = vadd.f32 %v3543_v22, %v8636_v7 }
 0x45f   : > { %v3841_v16 = vadd.f32 %v3789_v43, %v3544_v57  ;;  %v8897_v15 = vpop.f32.mrf.mxu1  ;;  %v9852_v57 = vld [vmem:[#allocation62_spill] sm:$0xff] }
 0x460   : > { %v4073_v47 = vpop.f32.mrf.mxu0 }
 0x461   : > { %6264 = vmatmul.msk.f32.gmra.mxu2 %vm364_vm0, %v8355_v32  ;;  %v8903_v2 = vadd.f32 %v4067_v35, %v3841_v16 }
 0x462   : > { %6296 = vmatmul.msk.f32.gmra.mxu3 %vm364_vm0, %v8341_v12  ;;  %6247 = vmatmul.msk.f32.gmra.mxu1 %vm364_vm0, %v8353_v31 }
 0x463   : > { %6329 = vmatmul.msk.f32.gmra.mxu0 %vm364_vm0, %v8720_v56 }
 0x464   : > { %v3546_v14 = vpop.f32.mrf.mxu2 }
 0x465   : > { %v3792_v40 = vpop.f32.mrf.mxu3  ;;  %v3547_v7 = vadd.f32 %v3546_v14, %v8655_v18 }
 0x467   : > { %v3842_v24 = vadd.f32 %v3792_v40, %v3547_v7  ;;  %v8910_v11 = vpop.f32.mrf.mxu1 }
 0x468   : > { %v4076_v48 = vpop.f32.mrf.mxu0 }
 0x469   : > { %6265 = vmatmul.msk.f32.gmra.mxu2 %vm364_vm0, %v8375_v20  ;;  %v8916_v12 = vadd.f32 %v4070_v51, %v3842_v24  ;;  %v9853_v24 = vld [vmem:[#allocation66_spill] sm:$0xff] }
 0x46a   : > { %6297 = vmatmul.msk.f32.gmra.mxu3 %vm364_vm0, %v8361_v30  ;;  %6248 = vmatmul.msk.f32.gmra.mxu1 %vm364_vm0, %v8373_v26 }
 0x46b   : > { %6330 = vmatmul.msk.f32.gmra.mxu0 %vm364_vm0, %v8739_v44 }
 0x46c   : > { %v3549_v31 = vpop.f32.mrf.mxu2 }
 0x46d   : > { %v3795_v32 = vpop.f32.mrf.mxu3  ;;  %v3550_v18 = vadd.f32 %v3549_v31, %v8674_v59 }
 0x46f   : > { %v3843_v56 = vadd.f32 %v3795_v32, %v3550_v18  ;;  %v8923_v0 = vpop.f32.mrf.mxu1  ;;  %v9855_v32 = vld [vmem:[#allocation61_spill] sm:$0xff] }
 0x470   : > { %v4079_v35 = vpop.f32.mrf.mxu0 }
 0x471   : > { %6266 = vmatmul.msk.f32.gmra.mxu2 %vm364_vm0, %v8396_v6  ;;  %v8929_v30 = vadd.f32 %v4073_v47, %v3843_v56 }
 0x472   : > { %6298 = vmatmul.msk.f32.gmra.mxu3 %vm364_vm0, %v8382_v58  ;;  %6249 = vmatmul.msk.f32.gmra.mxu1 %vm364_vm0, %v8394_v39 }
 0x473   : > { %6331 = vmatmul.msk.f32.gmra.mxu0 %vm364_vm0, %v8758_v34 }
 0x474   : > { %v3552_v26 = vpop.f32.mrf.mxu2 }
 0x475   : > { %v3798_v20 = vpop.f32.mrf.mxu3  ;;  %v3553_v59 = vadd.f32 %v3552_v26, %v8693_v33 }
 0x477   : > { %v3844_v44 = vadd.f32 %v3798_v20, %v3553_v59  ;;  %v8936_v37 = vpop.f32.mrf.mxu1  ;;  %v9856_v20 = vld [vmem:[#allocation65_spill] sm:$0xff]  ;;  %v9857_v59 = vld [vmem:[#allocation63_spill] sm:$0xff] }
 0x478   : > { %v4082_v60 = vpop.f32.mrf.mxu0 }
 0x479   : > { %6267 = vmatmul.msk.f32.gmra.mxu2 %vm364_vm0, %v8427_v27  ;;  %v8942_v58 = vadd.f32 %v4076_v48, %v3844_v44  ;;  %v9854_v48 = vld [vmem:[#allocation64_spill] sm:$0xff] }
 0x47a   : > { %6299 = vmatmul.msk.f32.gmra.mxu3 %vm364_vm0, %v8403_v21  ;;  %6250 = vmatmul.msk.f32.gmra.mxu1 %vm364_vm0, %v8425_v36  ;;  %v9848_v36 = vld [vmem:[#allocation60_spill] sm:$0xff] }
 0x47b   : > { %6332 = vmatmul.msk.f32.gmra.mxu0 %vm364_vm0, %v8777_v13  ;;  %v9849_v13 = vld [vmem:[#allocation90_spill] sm:$0xff] }
 0x47c   : > { %v3555_v39 = vpop.f32.mrf.mxu2 }
 0x47d   : > { %v3801_v6 = vpop.f32.mrf.mxu3  ;;  %v3556_v33 = vadd.f32 %v3555_v39, %v8712_v61 }
 0x47f   : > { %v3845_v34 = vadd.f32 %v3801_v6, %v3556_v33  ;;  %v8949_v63 = vpop.f32.mrf.mxu1 }
 0x480   : > { %v4085_v50 = vpop.f32.mrf.mxu0 }
 0x481   : > { %6268 = vmatmul.msk.f32.gmra.mxu2 %vm364_vm0, %v8448_v29  ;;  %v8955_v21 = vadd.f32 %v4079_v35, %v3845_v34  ;;  %v9850_v29 = vld [vmem:[#allocation59_spill] sm:$0xff]  ;;  %v9003_v34 = vld [vmem:[#allocation3 + $0x181] sm:$0xff] }
 0x482   : > { %6300 = vmatmul.msk.f32.gmra.mxu3 %vm364_vm0, %v8434_v1  ;;  %6251 = vmatmul.msk.f32.gmra.mxu1 %vm364_vm0, %v9848_v36  ;;  %v9851_v1 = vld [vmem:[#allocation57_spill] sm:$0xff]  ;;  %v9861_v36 = vld [vmem:[#allocation70_spill] sm:$0xff] }
 0x483   : > { %6333 = vmatmul.msk.f32.gmra.mxu0 %vm364_vm0, %v8796_v3 }
 0x484   : > { %v3558_v27 = vpop.f32.mrf.mxu2 }
 0x485   : > { %v3804_v61 = vpop.f32.mrf.mxu3  ;;  %v3559_v53 = vadd.f32 %v3558_v27, %v9849_v13 }
 0x487   : > { %v3846_v42 = vadd.f32 %v3804_v61, %v3559_v53  ;;  %v8962_v51 = vpop.f32.mrf.mxu1 }
 0x488   : > { %v4088_v22 = vpop.f32.mrf.mxu0 }
 0x489   : > { %6269 = vmatmul.msk.f32.gmra.mxu2 %vm364_vm0, %v9850_v29  ;;  %v8968_v43 = vadd.f32 %v4082_v60, %v3846_v42  ;;  %v9859_v60 = vld [vmem:[#allocation68_spill] sm:$0xff]  ;;  %v9863_v29 = vld [vmem:[#allocation74_spill] sm:$0xff] }
 0x48a   : > { %6301 = vmatmul.msk.f32.gmra.mxu3 %vm364_vm0, %v9851_v1  ;;  %6252 = vmatmul.msk.f32.gmra.mxu1 %vm364_vm0, %v9852_v57  ;;  %v9864_v1 = vld [vmem:[#allocation72_spill] sm:$0xff] }
 0x48b   : > { %6334 = vmatmul.msk.f32.gmra.mxu0 %vm364_vm0, %v8807_v9  ;;  %v4981_v57 = vld [vmem:[#allocation3 + $0xf9] sm:$0xff] }
 0x48c   : > { %v3561_v3 = vpop.f32.mrf.mxu2 }
 0x48d   : > { %v3807_v16 = vpop.f32.mrf.mxu3  ;;  %v3562_v47 = vadd.f32 %v3561_v3, %v8750_v10 }
 0x48f   : > { %v3847_v14 = vadd.f32 %v3807_v16, %v3562_v47  ;;  %v8975_v40 = vpop.f32.mrf.mxu1 }
 0x490   : > { %v4091_v7 = vpop.f32.mrf.mxu0 }
 0x491   : > { %6270 = vmatmul.msk.f32.gmra.mxu2 %vm364_vm0, %v9853_v24  ;;  %v8981_v31 = vadd.f32 %v4085_v50, %v3847_v14  ;;  %v9860_v50 = vld [vmem:[#allocation67_spill] sm:$0xff] }
 0x492   : > { %6302 = vmatmul.msk.f32.gmra.mxu3 %vm364_vm0, %v9854_v48  ;;  %6253 = vmatmul.msk.f32.gmra.mxu1 %vm364_vm0, %v9855_v32  ;;  %v9867_v32 = vld [vmem:[#allocation73_spill] sm:$0xff] }
 0x493   : > { %6335 = vmatmul.msk.f32.gmra.mxu0 %vm364_vm0, %v8820_v4 }
 0x494   : > { %v3564_v9 = vpop.f32.mrf.mxu2 }
 0x495   : > { %v3810_v10 = vpop.f32.mrf.mxu3  ;;  %v3565_v18 = vadd.f32 %v3564_v9, %v8769_v45  ;;  %v9868_v9 = vld [vmem:[#allocation71_spill] sm:$0xff] }
 0x497   : > { %v3848_v56 = vadd.f32 %v3810_v10, %v3565_v18  ;;  %v8988_v35 = vpop.f32.mrf.mxu1  ;;  %v4982_v10 = vld [vmem:[#allocation3 + $0x109] sm:$0xff] }
 0x498   : > { %v4094_v26 = vpop.f32.mrf.mxu0 }
 0x499   : > { %6271 = vmatmul.msk.f32.gmra.mxu2 %vm364_vm0, %v9856_v20  ;;  %v8994_v44 = vadd.f32 %v4088_v22, %v3848_v56  ;;  %v9018_v22 = vld [vmem:[#allocation3 + $0x189] sm:$0xff] }
 0x49a   : > { %6303 = vmatmul.msk.f32.gmra.mxu3 %vm364_vm0, %v9857_v59  ;;  %6254 = vmatmul.msk.f32.gmra.mxu1 %vm364_vm0, %v9859_v60 }
 0x49b   : > { %9858 = vst [vmem:[#allocation60_spill] sm:$0xff] %v8994_v44  ;;  %6336 = vmatmul.msk.f32.gmra.mxu0 %vm364_vm0, %v8835_v25 }
 0x49c   : > { %v3567_v4 = vpop.f32.mrf.mxu2 }
 0x49d   : > { %v3813_v45 = vpop.f32.mrf.mxu3  ;;  %v3568_v39 = vadd.f32 %v3567_v4, %v8788_v46 }
 0x49f   : > { %v3849_v6 = vadd.f32 %v3813_v45, %v3568_v39  ;;  %v9001_v33 = vpop.f32.mrf.mxu1  ;;  %v9870_v39 = vld [vmem:[#allocation80_spill] sm:$0xff] }
 0x4a0   : > { %v5114_v27 = vpop.f32.mrf.mxu0 }
 0x4a1   : > { %6272 = vmatmul.msk.f32.gmra.mxu2 %vm364_vm0, %v9860_v50  ;;  %v9009_v61 = vadd.f32 %v4091_v7, %v3849_v6  ;;  %v9871_v6 = vld [vmem:[#allocation78_spill] sm:$0xff]  ;;  %v5243_v50 = vld [vmem:[#allocation3 + $0x3a] sm:$0xff] }
 0x4a2   : > { %6304 = vmatmul.msk.f32.gmra.mxu3 %vm364_vm0, %v9861_v36  ;;  %6255 = vmatmul.msk.f32.gmra.mxu1 %vm364_vm0, %v9003_v34 }
 0x4a3   : > { %9862 = vst [vmem:[#allocation90_spill] sm:$0xff] %v9009_v61  ;;  %6337 = vmatmul.msk.f32.gmra.mxu0 %vm364_vm0, %v8849_v19 }
 0x4a4   : > { %v3570_v46 = vpop.f32.mrf.mxu2 }
 0x4a5   : > { %v3816_v25 = vpop.f32.mrf.mxu3  ;;  %v3571_v13 = vadd.f32 %v3570_v46, %v8805_v49  ;;  %v9866_v49 = vld [vmem:[#allocation69_spill] sm:$0xff] }
 0x4a6   : > { %v4375_v19 = vadd.f32 %v8818_v8, %v9866_v49  ;;  %v9869_v8 = vld [vmem:[#allocation76_spill] sm:$0xff]  ;;  %v9874_v49 = vld [vmem:[#allocation77_spill] sm:$0xff] }
 0x4a7   : > { %v3850_v53 = vadd.f32 %v3816_v25, %v3571_v13  ;;  %v9016_v42 = vpop.f32.mrf.mxu1  ;;  %v4376_v56 = vadd.f32 %v8831_v38, %v9869_v8  ;;  %v9872_v38 = vld [vmem:[#allocation75_spill] sm:$0xff] }
 0x4a8   : > { %v5117_v16 = vpop.f32.mrf.mxu0 }
 0x4a9   : > { %6273 = vmatmul.msk.f32.gmra.mxu2 %vm364_vm0, %v9863_v29  ;;  %v9024_v3 = vadd.f32 %v4094_v26, %v3850_v53 }
 0x4aa   : > { %6305 = vmatmul.msk.f32.gmra.mxu3 %vm364_vm0, %v9864_v1  ;;  %6256 = vmatmul.msk.f32.gmra.mxu1 %vm364_vm0, %v9018_v22 }
 0x4ab   : > { %9865 = vst [vmem:[#allocation59_spill] sm:$0xff] %v9024_v3  ;;  %6338 = vmatmul.msk.f32.gmra.mxu0 %vm364_vm0, %v4981_v57  ;;  %v9873_v57 = vld [vmem:[#allocation79_spill] sm:$0xff] }
 0x4ac   : > { %v4557_v47 = vpop.f32.mrf.mxu2 }
 0x4ad   : > { %v4836_v14 = vpop.f32.mrf.mxu3  ;;  %v4653_v7 = vadd.f32 %v4557_v47, %v4375_v19  ;;  %v5244_v19 = vld [vmem:[#allocation3 + $0x4a] sm:$0xff] }
 0x4af   : > { %v4932_v24 = vadd.f32 %v4836_v14, %v4653_v7  ;;  %v9031_v48 = vpop.f32.mrf.mxu1 }
 0x4b0   : > { %v5120_v60 = vpop.f32.mrf.mxu0 }
 0x4b1   : > { %6274 = vmatmul.msk.f32.gmra.mxu2 %vm364_vm0, %v9867_v32  ;;  %v9037_v18 = vadd.f32 %v5114_v27, %v4932_v24  ;;  %v4377_v27 = vadd.f32 %v8847_v62, %v9872_v38  ;;  %v9875_v62 = vld [vmem:[#allocation82_spill] sm:$0xff] }
 0x4b2   : > { %6306 = vmatmul.msk.f32.gmra.mxu3 %vm364_vm0, %v9868_v9  ;;  %6353 = vmatmul.msk.f32.vlgmr.msra.gmra.mxu1 %vm364_vm0, %v8833_v54  ;;  %v4983_v54 = vld [vmem:[#allocation3 + $0x111] sm:$0xff]  ;;  %v4378_v14 = vadd.f32 %v8860_v5, %v9875_v62 }
 0x4b3   : > { %6339 = vmatmul.msk.f32.gmra.mxu0 %vm364_vm0, %v4982_v10  ;;  %v9878_v5 = vld [vmem:[#allocation83_spill] sm:$0xff] }
 0x4b4   : > { %v4560_v26 = vpop.f32.mrf.mxu2 }
 0x4b5   : > { %v4839_v20 = vpop.f32.mrf.mxu3  ;;  %v4654_v59 = vadd.f32 %v4560_v26, %v4376_v56  ;;  %v9876_v56 = vld [vmem:[#allocation84_spill] sm:$0xff]  ;;  %v9877_v26 = vld [vmem:[#allocation81_spill] sm:$0xff] }
 0x4b7   : > { %v4933_v4 = vadd.f32 %v4839_v20, %v4654_v59  ;;  %v9044_v45 = vpop.f32.mrf.mxu1  ;;  %v5245_v20 = vld [vmem:[#allocation3 + $0x52] sm:$0xff]  ;;  %v4985_v59 = vld [vmem:[#allocation3 + $0x129] sm:$0xff] }
 0x4b8   : > { %v5123_v29 = vpop.f32.mrf.mxu0 }
 0x4b9   : > { %6275 = vmatmul.msk.f32.gmra.mxu2 %vm364_vm0, %v9870_v39  ;;  %v9050_v36 = vadd.f32 %v5117_v16, %v4933_v4  ;;  %v4984_v16 = vld [vmem:[#allocation3 + $0x121] sm:$0xff]  ;;  %v4379_v4 = vadd.f32 %v8872_v23, %v9878_v5  ;;  %v9881_v23 = vld [vmem:[#allocation47_spill] sm:$0xff] }
 0x4ba   : > { %6307 = vmatmul.msk.f32.gmra.mxu3 %vm364_vm0, %v9871_v6  ;;  %6354 = vmatmul.msk.f32.gmra.mxu1 %vm364_vm0, %v5243_v50 }
 0x4bb   : > { %6340 = vmatmul.msk.f32.gmra.mxu0 %vm364_vm0, %v4983_v54 }
 0x4bc   : > { %v4563_v46 = vpop.f32.mrf.mxu2 }
 0x4bd   : > { %v4842_v25 = vpop.f32.mrf.mxu3  ;;  %v4655_v13 = vadd.f32 %v4563_v46, %v4377_v27  ;;  %v9879_v27 = vld [vmem:[#allocation48_spill] sm:$0xff]  ;;  %v9880_v46 = vld [vmem:[#allocation46_spill] sm:$0xff] }
 0x4bf   : > { %v4934_v53 = vadd.f32 %v4842_v25, %v4655_v13  ;;  %v9056_v1 = vpop.f32.mrf.mxu1  ;;  %v5246_v25 = vld [vmem:[#allocation3 + $0x62] sm:$0xff]  ;;  %v4986_v13 = vld [vmem:[#allocation3 + $0x139] sm:$0xff] }
 0x4c0   : > { %v5126_v8 = vpop.f32.mrf.mxu0 }
 0x4c1   : > { %6276 = vmatmul.msk.f32.gmra.mxu2 %vm364_vm0, %v9873_v57  ;;  %v9062_v47 = vadd.f32 %v5120_v60, %v4934_v53 }
 0x4c2   : > { %6308 = vmatmul.msk.f32.gmra.mxu3 %vm364_vm0, %v9874_v49  ;;  %6355 = vmatmul.msk.f32.gmra.mxu1 %vm364_vm0, %v5244_v19 }
 0x4c3   : > { %6341 = vmatmul.msk.f32.gmra.mxu0 %vm364_vm0, %v4984_v16 }
 0x4c4   : > { %v4566_v7 = vpop.f32.mrf.mxu2 }
 0x4c5   : > { %v4845_v24 = vpop.f32.mrf.mxu3  ;;  %v4656_v32 = vadd.f32 %v4566_v7, %v4378_v14  ;;  %v9882_v7 = vld [vmem:[#allocation51_spill] sm:$0xff] }
 0x4c7   : > { %v4935_v9 = vadd.f32 %v4845_v24, %v4656_v32  ;;  %v9068_v10 = vpop.f32.mrf.mxu1  ;;  %v9883_v24 = vld [vmem:[#allocation49_spill] sm:$0xff] }
 0x4c8   : > { %v5129_v57 = vpop.f32.mrf.mxu0  ;;  %v5247_v32 = vld [vmem:[#allocation3 + $0x6a] sm:$0xff] }
 0x4c9   : > { %6277 = vmatmul.msk.f32.gmra.mxu2 %vm364_vm0, %v9876_v56  ;;  %v9074_v60 = vadd.f32 %v5123_v29, %v4935_v9  ;;  %v4380_v29 = vadd.f32 %v8884_v52, %v9881_v23  ;;  %v4987_v9 = vld [vmem:[#allocation3 + $0x141] sm:$0xff]  ;;  %v9884_v52 = vld [vmem:[#allocation50_spill] sm:$0xff] }
 0x4ca   : > { %6309 = vmatmul.msk.f32.gmra.mxu3 %vm364_vm0, %v9877_v26  ;;  %6356 = vmatmul.msk.f32.gmra.mxu1 %vm364_vm0, %v5245_v20  ;;  %v4381_v56 = vadd.f32 %v8897_v15, %v9884_v52  ;;  %v9887_v15 = vld [vmem:[#allocation53_spill] sm:$0xff] }
 0x4cb   : > { %6342 = vmatmul.msk.f32.gmra.mxu0 %vm364_vm0, %v4985_v59  ;;  %v9891_v52 = vld [vmem:[#allocation85_spill] sm:$0xff] }
 0x4cc   : > { %v4569_v39 = vpop.f32.mrf.mxu2 }
 0x4cd   : > { %v4848_v6 = vpop.f32.mrf.mxu3  ;;  %v4657_v50 = vadd.f32 %v4569_v39, %v4379_v4 }
 0x4cf   : > { %v4936_v54 = vadd.f32 %v4848_v6, %v4657_v50  ;;  %v9080_v38 = vpop.f32.mrf.mxu1  ;;  %v9885_v6 = vld [vmem:[#allocation56_spill] sm:$0xff] }
 0x4d0   : > { %v5132_v5 = vpop.f32.mrf.mxu0  ;;  %v9886_v50 = vld [vmem:[#allocation52_spill] sm:$0xff] }
 0x4d1   : > { %6278 = vmatmul.msk.f32.gmra.mxu2 %vm364_vm0, %v9879_v27  ;;  %v9086_v53 = vadd.f32 %v5126_v8, %v4936_v54  ;;  %v5248_v54 = vld [vmem:[#allocation3 + $0x7a] sm:$0xff]  ;;  %v4988_v27 = vld [vmem:[#allocation3 + $0x151] sm:$0xff] }
 0x4d2   : > { %6310 = vmatmul.msk.f32.gmra.mxu3 %vm364_vm0, %v9880_v46  ;;  %6357 = vmatmul.msk.f32.gmra.mxu1 %vm364_vm0, %v5246_v25  ;;  %v4382_v25 = vadd.f32 %v8910_v11, %v9887_v15  ;;  %v5252_v15 = vld [vmem:[#allocation3 + $0xaa] sm:$0xff] }
 0x4d3   : > { %6343 = vmatmul.msk.f32.gmra.mxu0 %vm364_vm0, %v4986_v13 }
 0x4d4   : > { %v4572_v49 = vpop.f32.mrf.mxu2 }
 0x4d5   : > { %v4851_v19 = vpop.f32.mrf.mxu3  ;;  %v4658_v16 = vadd.f32 %v4572_v49, %v4380_v29 }
 0x4d7   : > { %v4937_v62 = vadd.f32 %v4851_v19, %v4658_v16  ;;  %v9092_v14 = vpop.f32.mrf.mxu1  ;;  %v9888_v16 = vld [vmem:[#allocation55_spill] sm:$0xff] }
 0x4d8   : > { %v5135_v19 = vpop.f32.mrf.mxu0 }
 0x4d9   : > { %6279 = vmatmul.msk.f32.gmra.mxu2 %vm364_vm0, %v9882_v7  ;;  %v9098_v8 = vadd.f32 %v5129_v57, %v4937_v62  ;;  %v9889_v62 = vld [vmem:[#allocation58_spill] sm:$0xff]  ;;  %v5249_v7 = vld [vmem:[#allocation3 + $0x82] sm:$0xff] }
 0x4da   : > { %6311 = vmatmul.msk.f32.gmra.mxu3 %vm364_vm0, %v9883_v24  ;;  %6358 = vmatmul.msk.f32.gmra.mxu1 %vm364_vm0, %v5247_v32  ;;  %v4989_v24 = vld [vmem:[#allocation3 + $0x159] sm:$0xff] }
 0x4db   : > { %6344 = vmatmul.msk.f32.gmra.mxu0 %vm364_vm0, %v4987_v9  ;;  %v9890_v9 = vld [vmem:[#allocation87_spill] sm:$0xff] }
 0x4dc   : > { %v4575_v26 = vpop.f32.mrf.mxu2 }
 0x4dd   : > { %v4854_v20 = vpop.f32.mrf.mxu3  ;;  %v4659_v59 = vadd.f32 %v4575_v26, %v4381_v56  ;;  %v5250_v56 = vld [vmem:[#allocation3 + $0x92] sm:$0xff]  ;;  %v4990_v26 = vld [vmem:[#allocation3 + $0x169] sm:$0xff] }
 0x4df   : > { %v4938_v4 = vadd.f32 %v4854_v20, %v4659_v59  ;;  %v9104_v39 = vpop.f32.mrf.mxu1  ;;  %v9892_v59 = vld [vmem:[#allocation91_spill] sm:$0xff] }
 0x4e1   : > { %6280 = vmatmul.msk.f32.gmra.mxu2 %vm364_vm0, %v9885_v6  ;;  %v9110_v46 = vadd.f32 %v5132_v5, %v4938_v4  ;;  %v9893_v5 = vld [vmem:[#allocation88_spill] sm:$0xff]  ;;  %v4991_v6 = vld [vmem:[#allocation3 + $0x171] sm:$0xff] }
 0x4e2   : > { %6312 = vmatmul.msk.f32.gmra.mxu3 %vm364_vm0, %v9886_v50  ;;  %6359 = vmatmul.msk.f32.gmra.mxu1 %vm364_vm0, %v5248_v54  ;;  %v5251_v4 = vld [vmem:[#allocation3 + $0x9a] sm:$0xff]  ;;  %v9894_v54 = vld [vmem:[#allocation94_spill] sm:$0xff] }
 0x4e3   : > { %6345 = vmatmul.msk.f32.gmra.mxu0 %vm364_vm0, %v4988_v27  ;;  %v9895_v27 = vld [vmem:[#allocation92_spill] sm:$0xff] }
 0x4e4   : > { %v4578_v13 = vpop.f32.mrf.mxu2 }
 0x4e5   : > { %v4660_v23 = vadd.f32 %v4578_v13, %v4382_v25  ;;  %v4857_v29 = vpop.f32.mrf.mxu3  ;;  %v9896_v13 = vld [vmem:[#allocation97_spill] sm:$0xff] }
 0x4e7   : > { %v4939_v57 = vadd.f32 %v4857_v29, %v4660_v23  ;;  %v9116_v49 = vpop.f32.mrf.mxu1  ;;  %v9897_v23 = vld [vmem:[#allocation95_spill] sm:$0xff] }
 0x4e8   : > { %v5253_v29 = vld [vmem:[#allocation3 + $0xb2] sm:$0xff] }
 0x4e9   : > { %6281 = vmatmul.msk.f32.gmra.mxu2 %vm364_vm0, %v9888_v16  ;;  %v9122_v32 = vadd.f32 %v5135_v19, %v4939_v57  ;;  %v4994_v19 = vld [vmem:[#allocation3 + $0x199] sm:$0xff] }
 0x4ea   : > { %6313 = vmatmul.msk.f32.gmra.mxu3 %vm364_vm0, %v9889_v62  ;;  %6360 = vmatmul.msk.f32.gmra.mxu1 %vm364_vm0, %v5249_v7  ;;  %v9899_v16 = vld [vmem:[#allocation100_spill] sm:$0xff]  ;;  %v4716_v7 = vld [vmem:[#allocation3 + $0x198] sm:$0xff] }
 0x4eb   : > { %6346 = vmatmul.msk.f32.gmra.mxu0 %vm364_vm0, %v4989_v24  ;;  %v5254_v62 = vld [vmem:[#allocation3 + $0xc2] sm:$0xff] }
 0x4ef   : > { %v9126_v11 = vpop.f32.mrf.mxu1 }
 0x4f1   : > { %6282 = vmatmul.msk.f32.gmra.mxu2 %vm364_vm0, %v9890_v9  ;;  %v4995_v9 = vld [vmem:[#allocation3 + $0x1a1] sm:$0xff] }
 0x4f2   : > { %6314 = vmatmul.msk.f32.gmra.mxu3 %vm364_vm0, %v9891_v52  ;;  %6361 = vmatmul.msk.f32.gmra.mxu1 %vm364_vm0, %v5250_v56  ;;  %v9170_v52 = vld [vmem:[#allocation3 + $0x182] sm:$0xff] }
 0x4f3   : > { %6347 = vmatmul.msk.f32.gmra.mxu0 %vm364_vm0, %v4990_v26  ;;  %v4717_v56 = vld [vmem:[#allocation3 + $0x1a0] sm:$0xff] }
 0x4f7   : > { %v9134_v20 = vpop.f32.mrf.mxu1 }
 0x4f9   : > { %6283 = vmatmul.msk.f32.gmra.mxu2 %vm364_vm0, %v9892_v59  ;;  %v9179_v59 = vld [vmem:[#allocation3 + $0x18a] sm:$0xff] }
 0x4fa   : > { %6315 = vmatmul.msk.f32.gmra.mxu3 %vm364_vm0, %v9893_v5  ;;  %6362 = vmatmul.msk.f32.gmra.mxu1 %vm364_vm0, %v5251_v4  ;;  %v5256_v5 = vld [vmem:[#allocation3 + $0xda] sm:$0xff] }
 0x4fb   : > { %6348 = vmatmul.msk.f32.gmra.mxu0 %vm364_vm0, %v4991_v6  ;;  %v5257_v6 = vld [vmem:[#allocation3 + $0xe2] sm:$0xff] }
 0x4ff   : > { %v9142_v50 = vpop.f32.mrf.mxu1 }
 0x501   : > { %6284 = vmatmul.msk.f32.gmra.mxu2 %vm364_vm0, %v9894_v54  ;;  %v9191_v54 = vld [vmem:[%s9541_s5] ss:$0 sm:$0xff] }
 0x502   : > { %6316 = vmatmul.msk.f32.gmra.mxu3 %vm364_vm0, %v9895_v27  ;;  %6363 = vmatmul.msk.f32.gmra.mxu1 %vm364_vm0, %v5252_v15 }
 0x503   : > { %6349 = vmatmul.msk.f32.gmra.mxu0 %vm364_vm0, %v9003_v34  ;;  %v9900_v34 = vld [vmem:[#allocation98_spill] sm:$0xff] }
 0x507   : > { %v9151_v25 = vpop.f32.mrf.mxu1 }
 0x509   : > { %6285 = vmatmul.msk.f32.gmra.mxu2 %vm364_vm0, %v9896_v13  ;;  %v9197_v13 = vld [vmem:[%s9542_s6] ss:$0 sm:$0xff] }
 0x50a   : > { %6317 = vmatmul.msk.f32.gmra.mxu3 %vm364_vm0, %v9897_v23  ;;  %6364 = vmatmul.msk.f32.gmra.mxu1 %vm364_vm0, %v5253_v29  ;;  %v5258_v23 = vld [vmem:[#allocation3 + $0xf2] sm:$0xff] }
 0x50b   : > { %6350 = vmatmul.msk.f32.gmra.mxu0 %vm364_vm0, %v9018_v22  ;;  %v5255_v22 = vld [vmem:[#allocation3 + $0xca] sm:$0xff] }
 0x50f   : > { %v9160_v57 = vpop.f32.mrf.mxu1 }
 0x510   : > { %9898 = vst [vmem:[#allocation57_spill] sm:$0xff] %v9160_v57 }
 0x511   : > { %6286 = vmatmul.msk.f32.gmra.mxu2 %vm364_vm0, %v9899_v16  ;;  %v9202_v16 = vpop.f32.mrf.mxu2 }
 0x512   : > { %6318 = vmatmul.msk.f32.gmra.mxu3 %vm364_vm0, %v9900_v34  ;;  %6365 = vmatmul.msk.f32.gmra.mxu1 %vm364_vm0, %v5254_v62  ;;  %v9904_v34 = vld [vmem:[#allocation16_spill] sm:$0xff] }
 0x513   : > { %6351 = vmatmul.msk.f32.gmra.mxu0 %vm364_vm0, %v4994_v19 }
 0x517   : > { %v9168_v24 = vpop.f32.mrf.mxu1 }
 0x518   : > { %9901 = vst [vmem:[#allocation62_spill] sm:$0xff] %v9168_v24 }
 0x519   : > { %6287 = vmatmul.msk.f32.gmra.mxu2 %vm364_vm0, %v9170_v52 }
 0x51a   : > { %6319 = vmatmul.msk.f32.gmra.mxu3 %vm364_vm0, %v4716_v7  ;;  %6366 = vmatmul.msk.f32.gmra.mxu1 %vm364_vm0, %v5255_v22  ;;  %v5259_v22 = vld [vmem:[#allocation3 + $0xfa] sm:$0xff] }
 0x51b   : > { %6352 = vmatmul.msk.f32.gmra.mxu0 %vm364_vm0, %v4995_v9 }
 0x51f   : > { %v9177_v26 = vpop.f32.mrf.mxu1 }
 0x520   : > { %9902 = vst [vmem:[#allocation66_spill] sm:$0xff] %v9177_v26  ;;  %v5263_v26 = vld [vmem:[#allocation3 + $0x12a] sm:$0xff] }
 0x521   : > { %6288 = vmatmul.msk.f32.gmra.mxu2 %vm364_vm0, %v9179_v59 }
 0x522   : > { %6320 = vmatmul.msk.f32.gmra.mxu3 %vm364_vm0, %v4717_v56  ;;  %6367 = vmatmul.msk.f32.gmra.mxu1 %vm364_vm0, %v5256_v5  ;;  %v9214_v5 = vpop.f32.mrf.mxu3 }
 0x527   : > { %v9185_v4 = vpop.f32.mrf.mxu1 }
 0x528   : > { %9903 = vst [vmem:[#allocation64_spill] sm:$0xff] %v9185_v4 }
 0x52a   : > { %6368 = vmatmul.msk.f32.gmra.mxu1 %vm364_vm0, %v5257_v6 }
 0x52f   : > { %v5392_v27 = vpop.f32.mrf.mxu1 }
 0x530   : > { %v5488_v15 = vadd.f32 %v5392_v27, %v9037_v18  ;;  %v9217_v27 = vpop.f32.mrf.mxu0 }
 0x532   : > { %v5524_v29 = vmul.f32 %v9191_v54, %v5488_v15  ;;  %6369 = vmatmul.msk.f32.gmra.mxu1 %vm364_vm0, %v5258_v23  ;;  %v9905_v15 = vld [vmem:[#allocation18_spill] sm:$0xff]  ;;  %v9220_v23 = vpop.f32.mrf.mxu2 }
 0x534   : > { %v5560_v19 = vadd.f32 %v9197_v13, %v5524_v29 }
 0x536   : > { %v5592_v62 = vadd.f32 %v5560_v19, %v9904_v34 }
 0x537   : > { %v5395_v7 = vpop.f32.mrf.mxu1 }
 0x538   : > { %v5624_v9 = vmax.f32 %v5592_v62, 0.0  ;;  %v5489_v18 = vadd.f32 %v5395_v7, %v9050_v36  ;;  %v5260_v62 = vld [vmem:[#allocation3 + $0x10a] sm:$0xff] }
 0x53a   : > { %5656 = vst.msk [vmem:[%s9208_s13] sm:$0xff] %vm364_vm0, %v5624_v9  ;;  %v5525_v56 = vmul.f32 %v9191_v54, %v5489_v18  ;;  %6370 = vmatmul.msk.f32.gmra.mxu1 %vm364_vm0, %v5259_v22  ;;  %v9228_v18 = vpop.f32.mrf.mxu3  ;;  %v9906_v22 = vld [vmem:[#allocation20_spill] sm:$0xff] }
 0x53c   : > { %v5561_v6 = vadd.f32 %v9197_v13, %v5525_v56 }
 0x53e   : > { %v5593_v36 = vadd.f32 %v5561_v6, %v9905_v15  ;;  %v9231_v15 = vpop.f32.mrf.mxu0 }
 0x53f   : > { %v5398_v29 = vpop.f32.mrf.mxu1 }
 0x540   : > { %v5625_v19 = vmax.f32 %v5593_v36, 0.0  ;;  %v5490_v34 = vadd.f32 %v5398_v29, %v9062_v47  ;;  %v9234_v29 = vpop.f32.mrf.mxu2 }
 0x542   : > { %5657 = vst.msk [vmem:[%s9208_s13 + $0x8] sm:$0xff] %vm364_vm0, %v5625_v19  ;;  %v5526_v7 = vmul.f32 %v9191_v54, %v5490_v34  ;;  %6371 = vmatmul.msk.f32.gmra.mxu1 %vm364_vm0, %v5260_v62  ;;  %v5261_v19 = vld [vmem:[#allocation3 + $0x112] sm:$0xff] }
 0x544   : > { %v5562_v9 = vadd.f32 %v9197_v13, %v5526_v7  ;;  %v9907_v7 = vld [vmem:[#allocation22_spill] sm:$0xff] }
 0x546   : > { %v5594_v56 = vadd.f32 %v5562_v9, %v9906_v22  ;;  %v9242_v22 = vpop.f32.mrf.mxu3  ;;  %v9245_v3 = vpop.f32.mrf.mxu0 }
 0x547   : > { %v5401_v6 = vpop.f32.mrf.mxu1 }
 0x548   : > { %v5626_v36 = vmax.f32 %v5594_v56, 0.0  ;;  %v5491_v47 = vadd.f32 %v5401_v6, %v9074_v60  ;;  %v5262_v6 = vld [vmem:[#allocation3 + $0x122] sm:$0xff] }
 0x54a   : > { %5658 = vst.msk [vmem:[%s9208_s13 + $0x10] sm:$0xff] %vm364_vm0, %v5626_v36  ;;  %v5527_v34 = vmul.f32 %v9191_v54, %v5491_v47  ;;  %6372 = vmatmul.msk.f32.gmra.mxu1 %vm364_vm0, %v5261_v19  ;;  %v9251_v47 = vpop.f32.mrf.mxu2 }
 0x54c   : > { %v5563_v62 = vadd.f32 %v9197_v13, %v5527_v34  ;;  %v9908_v34 = vld [vmem:[#allocation24_spill] sm:$0xff] }
 0x54e   : > { %v5595_v9 = vadd.f32 %v5563_v62, %v9907_v7 }
 0x54f   : > { %v5404_v4 = vpop.f32.mrf.mxu1 }
 0x550   : > { %v5627_v56 = vmax.f32 %v5595_v9, 0.0  ;;  %v5492_v60 = vadd.f32 %v5404_v4, %v9086_v53  ;;  %v9256_v4 = vpop.f32.mrf.mxu3 }
 0x552   : > { %5659 = vst.msk [vmem:[%s9208_s13 + $0x18] sm:$0xff] %vm364_vm0, %v5627_v56  ;;  %v5528_v36 = vmul.f32 %v9191_v54, %v5492_v60  ;;  %6373 = vmatmul.msk.f32.gmra.mxu1 %vm364_vm0, %v5262_v6  ;;  %v9262_v60 = vpop.f32.mrf.mxu0 }
 0x554   : > { %v5564_v19 = vadd.f32 %v9197_v13, %v5528_v36  ;;  %v9265_v36 = vpop.f32.mrf.mxu2 }
 0x556   : > { %v5596_v62 = vadd.f32 %v5564_v19, %v9908_v34  ;;  %v9909_v19 = vld [vmem:[#allocation26_spill] sm:$0xff] }
 0x557   : > { %v5407_v7 = vpop.f32.mrf.mxu1 }
 0x558   : > { %v5628_v9 = vmax.f32 %v5596_v62, 0.0  ;;  %v5493_v53 = vadd.f32 %v5407_v7, %v9098_v8  ;;  %v5264_v7 = vld [vmem:[#allocation3 + $0x13a] sm:$0xff] }
 0x55a   : > { %5660 = vst.msk [vmem:[%s9208_s13 + $0x20] sm:$0xff] %vm364_vm0, %v5628_v9  ;;  %v5529_v56 = vmul.f32 %v9191_v54, %v5493_v53  ;;  %6374 = vmatmul.msk.f32.gmra.mxu1 %vm364_vm0, %v5263_v26  ;;  %v9273_v26 = vpop.f32.mrf.mxu3  ;;  %v9910_v53 = vld [vmem:[#allocation54_spill] sm:$0xff] }
 0x55c   : > { %v5565_v6 = vadd.f32 %v9197_v13, %v5529_v56  ;;  %v4383_v56 = vadd.f32 %v8923_v0, %v9910_v53 }
 0x55e   : > { %v5597_v34 = vadd.f32 %v5565_v6, %v9909_v19  ;;  %v4661_v6 = vadd.f32 %v9202_v16, %v4383_v56  ;;  %v9279_v19 = vpop.f32.mrf.mxu0  ;;  %v9912_v16 = vld [vmem:[#allocation86_spill] sm:$0xff] }
 0x55f   : > { %v5410_v62 = vpop.f32.mrf.mxu1 }
 0x560   : > { %v5629_v61 = vmax.f32 %v5597_v34, 0.0  ;;  %v5494_v8 = vadd.f32 %v5410_v62, %v9110_v46  ;;  %v9911_v46 = vld [vmem:[#allocation28_spill] sm:$0xff]  ;;  %v9282_v62 = vpop.f32.mrf.mxu2  ;;  %v4940_v57 = vadd.f32 %v9214_v5, %v4661_v6 }
 0x562   : > { %5661 = vst.msk [vmem:[%s9208_s13 + $0x28] sm:$0xff] %vm364_vm0, %v5629_v61  ;;  %v5530_v9 = vmul.f32 %v9191_v54, %v5494_v8  ;;  %6375 = vmatmul.msk.f32.gmra.mxu1 %vm364_vm0, %v5264_v7  ;;  %v5265_v7 = vld [vmem:[#allocation3 + $0x142] sm:$0xff]  ;;  %v9293_v53 = vpop.f32.mrf.mxu3  ;;  %v5218_v5 = vadd.f32 %v9217_v27, %v4940_v57 }
 0x564   : > { %v5566_v24 = vadd.f32 %v9197_v13, %v5530_v9  ;;  %v4384_v9 = vadd.f32 %v8936_v37, %v9912_v16 }
 0x566   : > { %v5598_v34 = vadd.f32 %v5566_v24, %v9911_v46  ;;  %v4662_v56 = vadd.f32 %v9220_v23, %v4384_v9  ;;  %v9914_v23 = vld [vmem:[#allocation89_spill] sm:$0xff]  ;;  %v9915_v9 = vld [vmem:[#allocation32_spill] sm:$0xff] }
 0x567   : > { %v5413_v61 = vpop.f32.mrf.mxu1  ;;  %v4385_v57 = vadd.f32 %v8949_v63, %v9914_v23  ;;  %v9917_v23 = vld [vmem:[#allocation34_spill] sm:$0xff] }
 0x568   : > { %v5630_v44 = vmax.f32 %v5598_v34, 0.0  ;;  %v5495_v8 = vadd.f32 %v5413_v61, %v9122_v32  ;;  %v9913_v32 = vld [vmem:[#allocation30_spill] sm:$0xff]  ;;  %v4941_v37 = vadd.f32 %v9228_v18, %v4662_v56 }
 0x569   : > { %v4663_v16 = vadd.f32 %v9234_v29, %v4385_v57 }
 0x56a   : > { %5662 = vst.msk [vmem:[%s9208_s13 + $0x30] sm:$0xff] %vm364_vm0, %v5630_v44  ;;  %v5531_v0 = vmul.f32 %v9191_v54, %v5495_v8  ;;  %6376 = vmatmul.msk.f32.gmra.mxu1 %vm364_vm0, %v5265_v7  ;;  %v9298_v44 = vpop.f32.mrf.mxu0  ;;  %v9300_v8 = vpop.f32.mrf.mxu2  ;;  %v5266_v7 = vld [vmem:[#allocation3 + $0x152] sm:$0xff] }
 0x56c   : > { %v5567_v24 = vadd.f32 %v9197_v13, %v5531_v0 }
 0x56e   : > { %v5599_v46 = vadd.f32 %v5567_v24, %v9913_v32  ;;  %v5219_v32 = vadd.f32 %v9231_v15, %v4941_v37 }
 0x56f   : > { %v5416_v6 = vpop.f32.mrf.mxu1 }
 0x570   : > { %v5631_v34 = vmax.f32 %v5599_v46, 0.0  ;;  %v5496_v61 = vadd.f32 %v5416_v6, %v5218_v5  ;;  %v9313_v46 = vpop.f32.mrf.mxu3  ;;  %v5267_v6 = vld [vmem:[#allocation3 + $0x15a] sm:$0xff] }
 0x572   : > { %5663 = vst.msk [vmem:[%s9208_s13 + $0x38] sm:$0xff] %vm364_vm0, %v5631_v34  ;;  %v5532_v0 = vmul.f32 %v9191_v54, %v5496_v61  ;;  %6377 = vmatmul.msk.f32.gmra.mxu1 %vm364_vm0, %v5266_v7  ;;  %v4942_v34 = vadd.f32 %v9242_v22, %v4663_v16  ;;  %v9316_v61 = vpop.f32.mrf.mxu0  ;;  %v4602_v29 = vpop.f32.mrf.mxu2  ;;  %v9916_v7 = vld [vmem:[#allocation93_spill] sm:$0xff] }
 0x573   : > { %v4386_v15 = vadd.f32 %v8962_v51, %v9916_v7 }
 0x574   : > { %v5568_v27 = vadd.f32 %v9197_v13, %v5532_v0  ;;  %v5220_v22 = vadd.f32 %v9245_v3, %v4942_v34 }
 0x575   : > { %v4664_v0 = vadd.f32 %v9251_v47, %v4386_v15 }
 0x576   : > { %v5600_v24 = vadd.f32 %v5568_v27, %v9915_v9 }
 0x577   : > { %v5419_v18 = vpop.f32.mrf.mxu1 }
 0x578   : > { %v5632_v56 = vmax.f32 %v5600_v24, 0.0  ;;  %v5497_v5 = vadd.f32 %v5419_v18, %v5219_v32  ;;  %v4881_v24 = vpop.f32.mrf.mxu3  ;;  %v5268_v32 = vld [vmem:[#allocation3 + $0x16a] sm:$0xff]  ;;  %v4943_v18 = vadd.f32 %v9256_v4, %v4664_v0 }
 0x57a   : > { %5664 = vst.msk [vmem:[%s9208_s13 + $0x40] sm:$0xff] %vm364_vm0, %v5632_v56  ;;  %v5533_v63 = vmul.f32 %v9191_v54, %v5497_v5  ;;  %6378 = vmatmul.msk.f32.gmra.mxu1 %vm364_vm0, %v5267_v6  ;;  %v9918_v56 = vld [vmem:[#allocation96_spill] sm:$0xff]  ;;  %v9335_v5 = vpop.f32.mrf.mxu0  ;;  %v4605_v6 = vpop.f32.mrf.mxu2  ;;  %v5221_v4 = vadd.f32 %v9262_v60, %v4943_v18 }
 0x57b   : > { %v4387_v47 = vadd.f32 %v8975_v40, %v9918_v56 }
 0x57c   : > { %v5569_v37 = vadd.f32 %v9197_v13, %v5533_v63  ;;  %v9919_v63 = vld [vmem:[#allocation36_spill] sm:$0xff] }
 0x57d   : > { %v4665_v34 = vadd.f32 %v9265_v36, %v4387_v47 }
 0x57e   : > { %v5601_v57 = vadd.f32 %v5569_v37, %v9917_v23  ;;  %v5269_v23 = vld [vmem:[#allocation3 + $0x172] sm:$0xff] }
 0x57f   : > { %v5422_v27 = vpop.f32.mrf.mxu1 }
 0x580   : > { %v5633_v16 = vmax.f32 %v5601_v57, 0.0  ;;  %v5498_v9 = vadd.f32 %v5422_v27, %v5220_v22  ;;  %v4944_v57 = vadd.f32 %v9273_v26, %v4665_v34  ;;  %v4884_v22 = vpop.f32.mrf.mxu3  ;;  %v9920_v27 = vld [vmem:[#allocation99_spill] sm:$0xff] }
 0x581   : > { %v4388_v36 = vadd.f32 %v8988_v35, %v9920_v27 }
 0x582   : > { %5665 = vst.msk [vmem:[%s9208_s13 + $0x48] sm:$0xff] %vm364_vm0, %v5633_v16  ;;  %v5534_v51 = vmul.f32 %v9191_v54, %v5498_v9  ;;  %6379 = vmatmul.msk.f32.gmra.mxu1 %vm364_vm0, %v5268_v32  ;;  %v5162_v9 = vpop.f32.mrf.mxu0  ;;  %v9921_v32 = vld [vmem:[#allocation38_spill] sm:$0xff]  ;;  %v5222_v26 = vadd.f32 %v9279_v19, %v4944_v57 }
 0x583   : > { %v4666_v60 = vadd.f32 %v9282_v62, %v4388_v36  ;;  %v9922_v62 = vld [vmem:[#allocation101_spill] sm:$0xff] }
 0x584   : > { %v5570_v3 = vadd.f32 %v9197_v13, %v5534_v51  ;;  %v4608_v51 = vpop.f32.mrf.mxu2 }
 0x585   : > { %v4945_v34 = vadd.f32 %v9293_v53, %v4666_v60  ;;  %v9925_v60 = vld [vmem:[#allocation42_spill] sm:$0xff] }
 0x586   : > { %v5602_v7 = vadd.f32 %v5570_v3, %v9919_v63  ;;  %v4389_v63 = vadd.f32 %v9001_v33, %v9922_v62 }
 0x587   : > { %v5425_v15 = vpop.f32.mrf.mxu1  ;;  %v5223_v53 = vadd.f32 %v9298_v44, %v4945_v34 }
 0x588   : > { %v5634_v37 = vmax.f32 %v5602_v7, 0.0  ;;  %v5499_v0 = vadd.f32 %v5425_v15, %v5221_v4  ;;  %v4887_v19 = vpop.f32.mrf.mxu3  ;;  %v4667_v4 = vadd.f32 %v9300_v8, %v4389_v63  ;;  %v9923_v15 = vld [vmem:[#allocation40_spill] sm:$0xff] }
 0x58a   : > { %5666 = vst.msk [vmem:[%s9208_s13 + $0x50] sm:$0xff] %vm364_vm0, %v5634_v37  ;;  %v5535_v40 = vmul.f32 %v9191_v54, %v5499_v0  ;;  %6380 = vmatmul.msk.f32.gmra.mxu1 %vm364_vm0, %v5269_v23  ;;  %v5165_v23 = vpop.f32.mrf.mxu0  ;;  %v4946_v36 = vadd.f32 %v9313_v46, %v4667_v4 }
 0x58c   : > { %v5571_v16 = vadd.f32 %v9197_v13, %v5535_v40  ;;  %v4611_v27 = vpop.f32.mrf.mxu2 }
 0x58e   : > { %v5603_v18 = vadd.f32 %v5571_v16, %v9921_v32 }
 0x58f   : > { %v5428_v56 = vpop.f32.mrf.mxu1 }
 0x590   : > { %v5635_v47 = vmax.f32 %v5603_v18, 0.0  ;;  %v5500_v3 = vadd.f32 %v5428_v56, %v5222_v26  ;;  %v5224_v18 = vadd.f32 %v9316_v61, %v4946_v36  ;;  %v4890_v26 = vpop.f32.mrf.mxu3  ;;  %v5272_v56 = vld [vmem:[#allocation3 + $0x19a] sm:$0xff] }
 0x592   : > { %5667 = vst.msk [vmem:[%s9208_s13 + $0x58] sm:$0xff] %vm364_vm0, %v5635_v47  ;;  %v5536_v35 = vmul.f32 %v9191_v54, %v5500_v3  ;;  %6381 = vmatmul.msk.f32.gmra.mxu1 %vm364_vm0, %v9170_v52  ;;  %v9924_v52 = vld [vmem:[#allocation102_spill] sm:$0xff] }
 0x593   : > { %v4390_v8 = vadd.f32 %v9016_v42, %v9924_v52 }
 0x594   : > { %v5572_v7 = vadd.f32 %v9197_v13, %v5536_v35  ;;  %v5168_v35 = vpop.f32.mrf.mxu0  ;;  %v4614_v42 = vpop.f32.mrf.mxu2 }
 0x595   : > { %v4668_v16 = vadd.f32 %v4602_v29, %v4390_v8  ;;  %v9926_v29 = vld [vmem:[#allocation103_spill] sm:$0xff] }
 0x596   : > { %v5604_v37 = vadd.f32 %v5572_v7, %v9923_v15  ;;  %v4391_v62 = vadd.f32 %v9031_v48, %v9926_v29  ;;  %v9927_v7 = vld [vmem:[#allocation14_spill] sm:$0xff]  ;;  %v9928_v48 = vld [vmem:[#allocation104_spill] sm:$0xff] }
 0x597   : > { %v5431_v0 = vpop.f32.mrf.mxu1  ;;  %v4947_v34 = vadd.f32 %v4881_v24, %v4668_v16 }
 0x598   : > { %v5636_v57 = vmax.f32 %v5604_v37, 0.0  ;;  %v5501_v40 = vadd.f32 %v5431_v0, %v5223_v53  ;;  %v4669_v63 = vadd.f32 %v4605_v6, %v4391_v62  ;;  %v5273_v37 = vld [vmem:[#allocation3 + $0x1a2] sm:$0xff]  ;;  %v4392_v6 = vadd.f32 %v9044_v45, %v9928_v48 }
 0x599   : > { %v5225_v15 = vadd.f32 %v9335_v5, %v4947_v34  ;;  %v4393_v45 = vadd.f32 %v9056_v1, %v8853_v41  ;;  %v4394_v41 = vadd.f32 %v9068_v10, %v8865_v17  ;;  %v4395_v17 = vadd.f32 %v9080_v38, %v8877_v55 }
 0x59a   : > { %5668 = vst.msk [vmem:[%s9208_s13 + $0x60] sm:$0xff] %vm364_vm0, %v5636_v57  ;;  %v5537_v33 = vmul.f32 %v9191_v54, %v5501_v40  ;;  %6382 = vmatmul.msk.f32.gmra.mxu1 %vm364_vm0, %v9179_v59  ;;  %v4893_v57 = vpop.f32.mrf.mxu3  ;;  %v4948_v40 = vadd.f32 %v4884_v22, %v4669_v63  ;;  %v4670_v8 = vadd.f32 %v4608_v51, %v4392_v6 }
 0x59b   : > { %v4671_v34 = vadd.f32 %v4611_v27, %v4393_v45  ;;  %v4396_v55 = vadd.f32 %v9092_v14, %v8890_v28 }
 0x59c   : > { %v5573_v44 = vadd.f32 %v9197_v13, %v5537_v33  ;;  %v5171_v33 = vpop.f32.mrf.mxu0  ;;  %v4617_v5 = vpop.f32.mrf.mxu2 }
 0x59e   : > { %v5605_v32 = vadd.f32 %v5573_v44, %v9925_v60  ;;  %v9929_v44 = vld [vmem:[#allocation15_spill] sm:$0xff]  ;;  %v5226_v60 = vadd.f32 %v5162_v9, %v4948_v40 }
 0x59f   : > { %v5434_v46 = vpop.f32.mrf.mxu1 }
 0x5a0   : > { %v5637_v47 = vmax.f32 %v5605_v32, 0.0  ;;  %v5502_v3 = vadd.f32 %v5434_v46, %v5224_v18  ;;  %v4949_v46 = vadd.f32 %v4887_v19, %v4670_v8  ;;  %v4950_v19 = vadd.f32 %v4890_v26, %v4671_v34 }
 0x5a2   : > { %5669 = vst.msk [vmem:[%s9208_s13 + $0x68] sm:$0xff] %vm364_vm0, %v5637_v47  ;;  %v5538_v59 = vmul.f32 %v9191_v54, %v5502_v3  ;;  %6383 = vmatmul.msk.f32.gmra.mxu1 %vm364_vm0, %v5272_v56  ;;  %v4896_v47 = vpop.f32.mrf.mxu3  ;;  %v5227_v9 = vadd.f32 %v5165_v23, %v4949_v46  ;;  %v5228_v23 = vadd.f32 %v5168_v35, %v4950_v19 }
 0x5a4   : > { %v5574_v61 = vadd.f32 %v9197_v13, %v5538_v59  ;;  %v5174_v51 = vpop.f32.mrf.mxu0  ;;  %v9930_v59 = vld [vmem:[#allocation17_spill] sm:$0xff]  ;;  %v4620_v62 = vpop.f32.mrf.mxu2 }
 0x5a6   : > { %v5606_v4 = vadd.f32 %v5574_v61, %v9927_v7 }
 0x5a7   : > { %v5437_v24 = vpop.f32.mrf.mxu1 }
 0x5a8   : > { %v5638_v53 = vmax.f32 %v5606_v4, 0.0  ;;  %v5503_v0 = vadd.f32 %v5437_v24, %v5225_v15  ;;  %v4672_v15 = vadd.f32 %v4614_v42, %v4394_v41  ;;  %v9931_v24 = vld [vmem:[#allocation19_spill] sm:$0xff]  ;;  %v4673_v42 = vadd.f32 %v4617_v5, %v4395_v17 }
 0x5a9   : > { %v4674_v5 = vadd.f32 %v4620_v62, %v4396_v55 }
 0x5aa   : > { %5670 = vst.msk [vmem:[%s9208_s13 + $0x70] sm:$0xff] %vm364_vm0, %v5638_v53  ;;  %v5539_v36 = vmul.f32 %v9191_v54, %v5503_v0  ;;  %6384 = vmatmul.msk.f32.gmra.mxu1 %vm364_vm0, %v5273_v37  ;;  %v4899_v27 = vpop.f32.mrf.mxu3  ;;  %v4951_v48 = vadd.f32 %v4893_v57, %v4672_v15 }
 0x5ac   : > { %v5575_v52 = vadd.f32 %v9197_v13, %v5539_v36  ;;  %v5177_v0 = vpop.f32.mrf.mxu0  ;;  %v4623_v26 = vpop.f32.mrf.mxu2  ;;  %v5229_v35 = vadd.f32 %v5171_v33, %v4951_v48 }
 0x5ae   : > { %v5607_v16 = vadd.f32 %v5575_v52, %v9929_v44  ;;  %v9932_v52 = vld [vmem:[#allocation21_spill] sm:$0xff] }
 0x5af   : > { %v5440_v32 = vpop.f32.mrf.mxu1 }
 0x5b0   : > { %v5639_v18 = vmax.f32 %v5607_v16, 0.0  ;;  %v5504_v22 = vadd.f32 %v5440_v32, %v5226_v60 }
 0x5b2   : > { %5671 = vst.msk [vmem:[%s9208_s13 + $0x78] sm:$0xff] %vm364_vm0, %v5639_v18  ;;  %v5540_v56 = vmul.f32 %v9191_v54, %v5504_v22  ;;  %v4902_v44 = vpop.f32.mrf.mxu3  ;;  %v4952_v18 = vadd.f32 %v4896_v47, %v4673_v42 }
 0x5b4   : > { %v5576_v3 = vadd.f32 %v9197_v13, %v5540_v56  ;;  %v5180_v57 = vpop.f32.mrf.mxu0  ;;  %v4626_v46 = vpop.f32.mrf.mxu2  ;;  %v9933_v56 = vld [vmem:[#allocation23_spill] sm:$0xff]  ;;  %v5230_v45 = vadd.f32 %v5174_v51, %v4952_v18 }
 0x5b6   : > { %v5608_v29 = vadd.f32 %v5576_v3, %v9930_v59 }
 0x5b7   : > { %v5443_v61 = vpop.f32.mrf.mxu1 }
 0x5b8   : > { %v5640_v63 = vmax.f32 %v5608_v29, 0.0  ;;  %v5505_v7 = vadd.f32 %v5443_v61, %v5227_v9  ;;  %v4953_v29 = vadd.f32 %v4899_v27, %v4674_v5  ;;  %v4397_v61 = vadd.f32 %v9104_v39, %v8903_v2 }
 0x5b9   : > { %v4398_v2 = vadd.f32 %v9116_v49, %v8916_v12  ;;  %v4399_v12 = vadd.f32 %v9126_v11, %v8929_v30  ;;  %v4400_v30 = vadd.f32 %v9134_v20, %v8942_v58  ;;  %v4401_v58 = vadd.f32 %v9142_v50, %v8955_v21 }
 0x5ba   : > { %5672 = vst.msk [vmem:[%s9208_s13 + $0x80] sm:$0xff] %vm364_vm0, %v5640_v63  ;;  %v5541_v4 = vmul.f32 %v9191_v54, %v5505_v7  ;;  %v4905_v47 = vpop.f32.mrf.mxu3  ;;  %v4675_v63 = vadd.f32 %v4623_v26, %v4397_v61  ;;  %v9934_v7 = vld [vmem:[#allocation25_spill] sm:$0xff]  ;;  %v5231_v19 = vadd.f32 %v5177_v0, %v4953_v29 }
 0x5bc   : > { %v5577_v1 = vadd.f32 %v9197_v13, %v5541_v4  ;;  %v5183_v28 = vpop.f32.mrf.mxu0  ;;  %v4629_v62 = vpop.f32.mrf.mxu2  ;;  %v4954_v27 = vadd.f32 %v4902_v44, %v4675_v63 }
 0x5be   : > { %v5609_v37 = vadd.f32 %v5577_v1, %v9931_v24  ;;  %v5232_v0 = vadd.f32 %v5180_v57, %v4954_v27 }
 0x5bf   : > { %v5446_v53 = vpop.f32.mrf.mxu1 }
 0x5c0   : > { %v5641_v40 = vmax.f32 %v5609_v37, 0.0  ;;  %v5506_v36 = vadd.f32 %v5446_v53, %v5228_v23  ;;  %v4676_v37 = vadd.f32 %v4626_v46, %v4398_v2  ;;  %v9935_v53 = vld [vmem:[#allocation27_spill] sm:$0xff] }
 0x5c2   : > { %5673 = vst.msk [vmem:[%s9208_s13 + $0x88] sm:$0xff] %vm364_vm0, %v5641_v40  ;;  %v5542_v6 = vmul.f32 %v9191_v54, %v5506_v36  ;;  %v4908_v24 = vpop.f32.mrf.mxu3  ;;  %v4955_v17 = vadd.f32 %v4905_v47, %v4676_v37 }
 0x5c4   : > { %v5578_v10 = vadd.f32 %v9197_v13, %v5542_v6  ;;  %v5186_v23 = vpop.f32.mrf.mxu0  ;;  %v4632_v36 = vpop.f32.mrf.mxu2  ;;  %v5233_v44 = vadd.f32 %v5183_v28, %v4955_v17  ;;  %v9938_v28 = vld [vmem:[#allocation33_spill] sm:$0xff] }
 0x5c5   : > { %v4678_v55 = vadd.f32 %v4632_v36, %v4400_v30  ;;  %v9941_v17 = vld [vmem:[#allocation37_spill] sm:$0xff] }
 0x5c6   : > { %v5610_v8 = vadd.f32 %v5578_v10, %v9932_v52  ;;  %v4677_v52 = vadd.f32 %v4629_v62, %v4399_v12 }
 0x5c7   : > { %v5449_v16 = vpop.f32.mrf.mxu1 }
 0x5c8   : > { %v5642_v60 = vmax.f32 %v5610_v8, 0.0  ;;  %v5507_v32 = vadd.f32 %v5449_v16, %v5229_v35  ;;  %v9936_v8 = vld [vmem:[#allocation29_spill] sm:$0xff] }
 0x5ca   : > { %5674 = vst.msk [vmem:[%s9208_s13 + $0x90] sm:$0xff] %vm364_vm0, %v5642_v60  ;;  %v5543_v22 = vmul.f32 %v9191_v54, %v5507_v32  ;;  %v4911_v42 = vpop.f32.mrf.mxu3 }
 0x5cc   : > { %v5579_v38 = vadd.f32 %v9197_v13, %v5543_v22  ;;  %v5189_v60 = vpop.f32.mrf.mxu0  ;;  %v4635_v57 = vpop.f32.mrf.mxu2  ;;  %v4956_v22 = vadd.f32 %v4908_v24, %v4677_v52  ;;  %v9939_v24 = vld [vmem:[#allocation35_spill] sm:$0xff] }
 0x5cd   : > { %v4679_v61 = vadd.f32 %v4635_v57, %v4401_v58  ;;  %v9947_v58 = vld [vmem:[#allocation41_spill] sm:$0xff] }
 0x5ce   : > { %v5611_v33 = vadd.f32 %v5579_v38, %v9933_v56  ;;  %v9937_v38 = vld [vmem:[#allocation31_spill] sm:$0xff]  ;;  %v5234_v56 = vadd.f32 %v5186_v23, %v4956_v22 }
 0x5cf   : > { %v5452_v3 = vpop.f32.mrf.mxu1  ;;  %v9944_v22 = vld [vmem:[#allocation39_spill] sm:$0xff] }
 0x5d0   : > { %v5643_v34 = vmax.f32 %v5611_v33, 0.0  ;;  %v5508_v59 = vadd.f32 %v5452_v3, %v5230_v45 }
 0x5d2   : > { %5675 = vst.msk [vmem:[%s9208_s13 + $0x98] sm:$0xff] %vm364_vm0, %v5643_v34  ;;  %v5544_v9 = vmul.f32 %v9191_v54, %v5508_v59  ;;  %v4914_v33 = vpop.f32.mrf.mxu3  ;;  %v4957_v59 = vadd.f32 %v4911_v42, %v4678_v55 }
 0x5d4   : > { %v5580_v14 = vadd.f32 %v9197_v13, %v5544_v9  ;;  %v5192_v47 = vpop.f32.mrf.mxu0  ;;  %v4638_v9 = vpop.f32.mrf.mxu2  ;;  %v5235_v62 = vadd.f32 %v5189_v60, %v4957_v59  ;;  %v9943_v60 = vld [vmem:[#allocation62_spill] sm:$0xff] }
 0x5d6   : > { %v5612_v51 = vadd.f32 %v5580_v14, %v9934_v7 }
 0x5d7   : > { %v5455_v4 = vpop.f32.mrf.mxu1 }
 0x5d8   : > { %v5644_v41 = vmax.f32 %v5612_v51, 0.0  ;;  %v5509_v1 = vadd.f32 %v5455_v4, %v5231_v19  ;;  %v4958_v4 = vadd.f32 %v4914_v33, %v4679_v61 }
 0x5da   : > { %5676 = vst.msk [vmem:[%s9208_s13 + $0xa0] sm:$0xff] %vm364_vm0, %v5644_v41  ;;  %v5545_v15 = vmul.f32 %v9191_v54, %v5509_v1  ;;  %v4917_v19 = vpop.f32.mrf.mxu3  ;;  %v4402_v1 = vadd.f32 %v9151_v25, %v8968_v43  ;;  %v9940_v43 = vld [vmem:[#allocation57_spill] sm:$0xff] }
 0x5db   : > { %v4403_v25 = vadd.f32 %v9940_v43, %v8981_v31 }
 0x5dc   : > { %v5581_v39 = vadd.f32 %v9197_v13, %v5545_v15  ;;  %v5195_v21 = vpop.f32.mrf.mxu0  ;;  %v4641_v27 = vpop.f32.mrf.mxu2  ;;  %v4680_v15 = vadd.f32 %v4638_v9, %v4402_v1 }
 0x5de   : > { %v5613_v40 = vadd.f32 %v5581_v39, %v9935_v53  ;;  %v5236_v39 = vadd.f32 %v5192_v47, %v4958_v4  ;;  %v9948_v4 = vld [vmem:[#allocation59_spill] sm:$0xff] }
 0x5df   : > { %v5458_v26 = vpop.f32.mrf.mxu1 }
 0x5e0   : > { %v5645_v48 = vmax.f32 %v5613_v40, 0.0  ;;  %v5510_v6 = vadd.f32 %v5458_v26, %v5232_v0  ;;  %v4959_v40 = vadd.f32 %v4917_v19, %v4680_v15  ;;  %v9950_v15 = vld [vmem:[#allocation43_spill] sm:$0xff] }
 0x5e2   : > { %5677 = vst.msk [vmem:[%s9208_s13 + $0xa8] sm:$0xff] %vm364_vm0, %v5645_v48  ;;  %v5546_v10 = vmul.f32 %v9191_v54, %v5510_v6  ;;  %v4920_v36 = vpop.f32.mrf.mxu3  ;;  %v4681_v6 = vadd.f32 %v4641_v27, %v4403_v25  ;;  %v5237_v12 = vadd.f32 %v5195_v21, %v4959_v40  ;;  %v9951_v25 = vld [vmem:[#allocation44_spill] sm:$0xff] }
 0x5e4   : > { %v5582_v49 = vadd.f32 %v9197_v13, %v5546_v10  ;;  %v5198_v48 = vpop.f32.mrf.mxu0 }
 0x5e6   : > { %v5614_v35 = vadd.f32 %v5582_v49, %v9936_v8  ;;  %v4644_v49 = vpop.f32.mrf.mxu2 }
 0x5e7   : > { %v5461_v16 = vpop.f32.mrf.mxu1 }
 0x5e8   : > { %v5646_v32 = vmax.f32 %v5614_v35, 0.0  ;;  %v5511_v18 = vadd.f32 %v5461_v16, %v5233_v44  ;;  %v4960_v35 = vadd.f32 %v4920_v36, %v4681_v6  ;;  %v9942_v16 = vld [vmem:[#allocation60_spill] sm:$0xff] }
 0x5e9   : > { %v4404_v31 = vadd.f32 %v9943_v60, %v9942_v16 }
 0x5ea   : > { %5678 = vst.msk [vmem:[%s9208_s13 + $0xb0] sm:$0xff] %vm364_vm0, %v5646_v32  ;;  %v5547_v46 = vmul.f32 %v9191_v54, %v5511_v18  ;;  %v4923_v18 = vpop.f32.mrf.mxu3  ;;  %v5238_v30 = vadd.f32 %v5198_v48, %v4960_v35 }
 0x5eb   : > { %v4682_v57 = vadd.f32 %v4644_v49, %v4404_v31  ;;  %v9952_v49 = vld [vmem:[#allocation45_spill] sm:$0xff] }
 0x5ec   : > { %v5583_v11 = vadd.f32 %v9197_v13, %v5547_v46 }
 0x5ed   : > { %v4961_v33 = vadd.f32 %v4923_v18, %v4682_v57 }
 0x5ee   : > { %v5615_v5 = vadd.f32 %v5583_v11, %v9937_v38 }
 0x5ef   : > { %v5464_v45 = vpop.f32.mrf.mxu1 }
 0x5f0   : > { %v5647_v3 = vmax.f32 %v5615_v5, 0.0  ;;  %v5512_v34 = vadd.f32 %v5464_v45, %v5234_v56  ;;  %v5201_v5 = vpop.f32.mrf.mxu0  ;;  %v4647_v56 = vpop.f32.mrf.mxu2 }
 0x5f1   : > { %v5239_v61 = vadd.f32 %v5201_v5, %v4961_v33 }
 0x5f2   : > { %5679 = vst.msk [vmem:[%s9208_s13 + $0xb8] sm:$0xff] %vm364_vm0, %v5647_v3  ;;  %v5548_v29 = vmul.f32 %v9191_v54, %v5512_v34  ;;  %v9945_v3 = vld [vmem:[#allocation90_spill] sm:$0xff] }
 0x5f3   : > { %v9946_v34 = vld [vmem:[#allocation66_spill] sm:$0xff] }
 0x5f4   : > { %v5584_v20 = vadd.f32 %v9197_v13, %v5548_v29  ;;  %v4405_v59 = vadd.f32 %v9946_v34, %v9945_v3  ;;  %v4926_v29 = vpop.f32.mrf.mxu3 }
 0x5f6   : > { %v5616_v14 = vadd.f32 %v5584_v20, %v9938_v28  ;;  %v4683_v9 = vadd.f32 %v4647_v56, %v4405_v59 }
 0x5f7   : > { %v5467_v63 = vpop.f32.mrf.mxu1 }
 0x5f8   : > { %v5648_v7 = vmax.f32 %v5616_v14, 0.0  ;;  %v5513_v51 = vadd.f32 %v5467_v63, %v5235_v62  ;;  %v5204_v63 = vpop.f32.mrf.mxu0  ;;  %v4650_v19 = vpop.f32.mrf.mxu2 }
 0x5fa   : > { %5680 = vst.msk [vmem:[%s9208_s13 + $0xc0] sm:$0xff] %vm364_vm0, %v5648_v7  ;;  %v5549_v41 = vmul.f32 %v9191_v54, %v5513_v51  ;;  %v4962_v7 = vadd.f32 %v4926_v29, %v4683_v9 }
 0x5fc   : > { %v5585_v50 = vadd.f32 %v9197_v13, %v5549_v41  ;;  %v9949_v41 = vld [vmem:[#allocation64_spill] sm:$0xff] }
 0x5fd   : > { %v4406_v1 = vadd.f32 %v9949_v41, %v9948_v4 }
 0x5fe   : > { %v5617_v2 = vadd.f32 %v5585_v50, %v9939_v24  ;;  %v5240_v50 = vadd.f32 %v5204_v63, %v4962_v7 }
 0x5ff   : > { %v5470_v37 = vpop.f32.mrf.mxu1  ;;  %v4684_v27 = vadd.f32 %v4650_v19, %v4406_v1 }
 0x600   : > { %v5649_v23 = vmax.f32 %v5617_v2, 0.0  ;;  %v5514_v53 = vadd.f32 %v5470_v37, %v5236_v39  ;;  %v4929_v2 = vpop.f32.mrf.mxu3 }
 0x602   : > { %5681 = vst.msk [vmem:[%s9208_s13 + $0xc8] sm:$0xff] %vm364_vm0, %v5649_v23  ;;  %v5550_v0 = vmul.f32 %v9191_v54, %v5514_v53  ;;  %v4963_v53 = vadd.f32 %v4929_v2, %v4684_v27 }
 0x604   : > { %v5586_v26 = vadd.f32 %v9197_v13, %v5550_v0  ;;  %v5207_v0 = vpop.f32.mrf.mxu0 }
 0x605   : > { %v5241_v43 = vadd.f32 %v5207_v0, %v4963_v53 }
 0x606   : > { %v5618_v10 = vadd.f32 %v5586_v26, %v9941_v17 }
 0x607   : > { %v5473_v42 = vpop.f32.mrf.mxu1 }
 0x608   : > { %v5650_v52 = vmax.f32 %v5618_v10, 0.0  ;;  %v5515_v8 = vadd.f32 %v5473_v42, %v5237_v12 }
 0x60a   : > { %5682 = vst.msk [vmem:[%s9208_s13 + $0xd0] sm:$0xff] %vm364_vm0, %v5650_v52  ;;  %v5551_v44 = vmul.f32 %v9191_v54, %v5515_v8 }
 0x60c   : > { %v5587_v32 = vadd.f32 %v9197_v13, %v5551_v44 }
 0x60e   : > { %v5619_v46 = vadd.f32 %v5587_v32, %v9944_v22 }
 0x60f   : > { %v5476_v11 = vpop.f32.mrf.mxu1 }
 0x610   : > { %v5651_v55 = vmax.f32 %v5619_v46, 0.0  ;;  %v5516_v38 = vadd.f32 %v5476_v11, %v5238_v30 }
 0x612   : > { %5683 = vst.msk [vmem:[%s9208_s13 + $0xd8] sm:$0xff] %vm364_vm0, %v5651_v55  ;;  %v5552_v45 = vmul.f32 %v9191_v54, %v5516_v38 }
 0x614   : > { %v5588_v47 = vadd.f32 %v9197_v13, %v5552_v45 }
 0x616   : > { %v5620_v20 = vadd.f32 %v5588_v47, %v9947_v58 }
 0x617   : > { %v5479_v28 = vpop.f32.mrf.mxu1 }
 0x618   : > { %v5652_v14 = vmax.f32 %v5620_v20, 0.0  ;;  %v5517_v62 = vadd.f32 %v5479_v28, %v5239_v61 }
 0x61a   : > { %5684 = vst.msk [vmem:[%s9208_s13 + $0xe0] sm:$0xff] %vm364_vm0, %v5652_v14  ;;  %v5553_v51 = vmul.f32 %v9191_v54, %v5517_v62 }
 0x61c   : > { %v5589_v21 = vadd.f32 %v9197_v13, %v5553_v51 }
 0x61e   : > { %v5621_v24 = vadd.f32 %v5589_v21, %v9950_v15 }
 0x61f   : > { %v5482_v39 = vpop.f32.mrf.mxu1 }
 0x620   : > { %v5653_v37 = vmax.f32 %v5621_v24, 0.0  ;;  %v5518_v23 = vadd.f32 %v5482_v39, %v5240_v50 }
 0x622   : > { %5685 = vst.msk [vmem:[%s9208_s13 + $0xe8] sm:$0xff] %vm364_vm0, %v5653_v37  ;;  %v5554_v40 = vmul.f32 %v9191_v54, %v5518_v23 }
 0x624   : > { %v5590_v36 = vadd.f32 %v9197_v13, %v5554_v40 }
 0x626   : > { %v5622_v26 = vadd.f32 %v5590_v36, %v9951_v25 }
 0x627   : > { %v5485_v48 = vpop.f32.mrf.mxu1 }
 0x628   : > { %v5654_v6 = vmax.f32 %v5622_v26, 0.0  ;;  %v5519_v17 = vadd.f32 %v5485_v48, %v5241_v43 }
 0x62a   : > { %5686 = vst.msk [vmem:[%s9208_s13 + $0xf0] sm:$0xff] %vm364_vm0, %v5654_v6  ;;  %v5555_v10 = vmul.f32 %v9191_v54, %v5519_v17 }
 0x62c   : > { %v5591_v12 = vadd.f32 %v9197_v13, %v5555_v10 }
 0x62e   : > { %v5623_v42 = vadd.f32 %v5591_v12, %v9952_v49 }
 0x630   : > { %v5655_v52 = vmax.f32 %v5623_v42, 0.0 }
 0x632   : > { %5687 = vst.msk [vmem:[%s9208_s13 + $0xf8] sm:$0xff] %vm364_vm0, %v5655_v52 }
 0x633   : > { %6596 = shalt.err (!%p6593_p10)
}
 0x634   : > { %s6646_s14 = smov 128   ;;  %s6647_s13 = smov 8  }
 0x635   : > { %6410 = dma.vmem_to_hbm [thread:$0]  (%p6760_p3), %s5702_s21, 4096, %s5704_s29, %s5689_s28, %s6646_s14, %s6646_s14, %s6647_s13  }
 0x636 PF: > { %s5718_s1 = sand.u32 1, %s6627_s24   ;;  %p9953_p12 = scmp.ge.s32.totalorder %s6639_s27, 2 }
 0x637   : > { %s5719_s30 = scalar_lea.sflag [#allocation6], %s5718_s1 }
 0x638   : > { %p6424_p13 = pnand %p9953_p12, %p6723_p6 }
 0x63a   : > { %p6425_p0 = pneg %p6424_p13 }
 0x63c   : > { %6622 = dma.done.wait (%p6425_p0), %s5719_s30, 4096  }
 0x63d   : > { %6624 = vsyncadd (%p6425_p0), %s5719_s30, 4294963200  ;;  %p21_p5 = scmp.ge.s32.totalorder %s6750_s22, 4   ;;  %s9954_s24 = smov %s6631_s25 }
 0x63e   : > { %s9955_s25 = smov %s6635_s26  ;;  %s9956_s26 = smov %s6766_s10 }
 0x63f   : > { %s9957_s27 = smov %s6750_s22  ;;  %23 = sbr.rel (!%p21_p5) target bundleno = 8 (0x8), region = 121 }
 0x644   :  { %5725 = vsyncpa [#allocation5], 1 }
 0x645   :  { %5727 = vsyncpa [#allocation5 + $0x1], 1 }
 0x646   :  { %5728 = vsyncpa [#allocation8], 1 }
 0x647   :  { %5729 = vsyncpa [#allocation6], 1 }
 0x648   :  { %5731 = vsyncpa [#allocation6 + $0x1], 1 }

</bundles_post_ra>
